<compile_context>
chip_gen: v7x
topology: tpu7x:2x2x1
jax: 0.10.0
libtpu: 0.0.40
codegen_flags: <defaults>
</compile_context>

<pallas_src>
import functools

import jax
import jax.numpy as jnp
import numpy as np
from jax.experimental import pallas as pl
from jax.experimental.pallas import tpu as pltpu


def _bottleneck_kernel(x_ref, w1_ref, s1_ref, b1_ref,
                       wr_ref, sr_ref, br_ref,
                       ws_ref, bs_ref,
                       s2_ref, b2_ref,
                       w3_ref, s3_ref, b3_ref,
                       cmask_ref,
                       out_ref,
                       feat_ref, mid_ref,
                       *, H, W, Cmid, Cout, K, G, GC):
    M = H * W
    P = (K - 1) // 2
    KK = K * K
    POFF = P * W + P          # largest |flat-index shift| of any involution tap

    # ---- conv1 (1x1, no bias) + bn1 + relu : (Cmid, M) f32 -------------------
    h1 = jnp.dot(w1_ref[...], x_ref[0].astype(jnp.bfloat16),
                 preferred_element_type=jnp.float32)
    h1 = jnp.maximum(h1 * s1_ref[...] + b1_ref[...], 0.0)

    # ---- involution kernel generation: reduce (1x1+BN+ReLU), span (1x1+bias) -
    r = jnp.dot(wr_ref[...], h1.astype(jnp.bfloat16),
                preferred_element_type=jnp.float32)
    r = jnp.maximum(r * sr_ref[...] + br_ref[...], 0.0)                # (Cr, M)
    kern = jnp.dot(ws_ref[...], r.astype(jnp.bfloat16),
                   preferred_element_type=jnp.float32) + bs_ref[...]   # (G*KK, M)

    # ---- stage h1 into the lane-dense shift buffer ---------------------------
    # feat_ref is (Cmid, M + 2*POFF).  Only the two POFF-wide margins are zeroed
    # (tiny strips, and safe even if the batch axis is split across cores); the
    # interior is overwritten every grid step.
    feat_ref[:, pl.ds(0, POFF)] = jnp.zeros((Cmid, POFF), jnp.float32)
    feat_ref[:, pl.ds(POFF + M, POFF)] = jnp.zeros((Cmid, POFF), jnp.float32)
    feat_ref[:, pl.ds(POFF, M)] = h1

    cmask = cmask_ref[...]    # (K, M) 0/1 column-validity per horizontal offset

    # ---- involution: group-outer / tap-inner, one live accumulator -----------
    # Tap (ki, kj) == static lane shift of (ki-P)*W + (kj-P) on the flat slab.
    # Out-of-image rows read the zero margins; column wraparound into the
    # neighbouring row is zeroed by cmask on the per-pixel kernel weights.
    for g in range(G):
        acc = jnp.zeros((GC, M), jnp.float32)
        for k in range(KK):
            ki, kj = divmod(k, K)
            shift = (ki - P) * W + (kj - P)
            patch = feat_ref[g * GC:(g + 1) * GC, pl.ds(POFF + shift, M)]
            wk = kern[g * KK + k:g * KK + k + 1, :] * cmask[kj:kj + 1, :]
            acc = acc + wk * patch                 # sublane-broadcast of wk
        # bn2 + relu for this group's channels; write to the mid scratch so a
        # single (GC, M) accumulator is live at a time.
        sg = s2_ref[g * GC:(g + 1) * GC, :]
        bg = b2_ref[g * GC:(g + 1) * GC, :]
        mid_ref[g * GC:(g + 1) * GC, :] = jnp.maximum(acc * sg + bg, 0.0)

    # ---- conv3 (1x1, no bias) + bn3 + residual + relu ------------------------
    h3 = jnp.dot(w3_ref[...], mid_ref[...].astype(jnp.bfloat16),
                 preferred_element_type=jnp.float32)
    h3 = h3 * s3_ref[...] + b3_ref[...]
    out_ref[0] = jnp.maximum(h3 + x_ref[0], 0.0)   # identity residual, f32


def bottleneck_forward(x_nchw, p, *, K=7, group_channels=16):
    """x_nchw: (B, Cin, H, W) float32 (PyTorch layout). Returns (B, Cout, H, W)."""
    B, Cin, H, W = x_nchw.shape
    Cmid = p["w1"].shape[1]
    Cout = p["w3"].shape[1]
    Cr = p["wr"].shape[1]
    assert Cin == Cout, "downsample=None requires in_channels == out_channels"
    assert Cmid % group_channels == 0
    G = Cmid // group_channels
    GC = group_channels
    P = (K - 1) // 2
    M = H * W
    KK = K * K
    POFF = P * W + P

    # channels-first, spatially flattened: lane dim = H*W (lane-dense in & out)
    x_flat = x_nchw.reshape(B, Cin, M).astype(jnp.float32)

    # transposed (output-channels-first) weights in bf16 for the MXU
    w1t = p["w1"].T.astype(jnp.bfloat16)          # (Cmid, Cin)
    wrt = p["wr"].T.astype(jnp.bfloat16)          # (Cr,   Cmid)
    wst = p["ws"].T.astype(jnp.bfloat16)          # (G*KK, Cr)
    w3t = p["w3"].T.astype(jnp.bfloat16)          # (Cout, Cmid)

    def col(v):  # per-channel BN params as (C, 1) columns (broadcast over lanes)
        return jnp.asarray(v, jnp.float32).reshape(-1, 1)

    s1, b1 = col(p["s1"]), col(p["b1"])
    sr, br = col(p["sr"]), col(p["br"])
    bs = col(p["bs"])
    s2, b2 = col(p["s2"]), col(p["b2"])
    s3, b3 = col(p["s3"]), col(p["b3"])

    # column-validity mask: cmask[kj, q] = 1 iff (q % W) + (kj - P) is in [0, W)
    wcol = np.arange(M) % W
    cmask = np.stack([((wcol + (kj - P) >= 0) & (wcol + (kj - P) < W))
                      for kj in range(K)]).astype(np.float32)          # (K, M)
    cmask = jnp.asarray(cmask)

    kernel = functools.partial(_bottleneck_kernel, H=H, W=W, Cmid=Cmid,
                               Cout=Cout, K=K, G=G, GC=GC)

    def full_spec(shape):
        return pl.BlockSpec(shape, lambda b: (0,) * len(shape))

    grid_spec = pltpu.PrefetchScalarGridSpec(
        num_scalar_prefetch=0,
        grid=(B,),
        in_specs=[
            pl.BlockSpec((1, Cin, M), lambda b: (b, 0, 0)),            # x
            full_spec((Cmid, Cin)),                                    # w1^T
            full_spec((Cmid, 1)), full_spec((Cmid, 1)),                # bn1
            full_spec((Cr, Cmid)),                                     # reduce w^T
            full_spec((Cr, 1)), full_spec((Cr, 1)),                    # reduce BN
            full_spec((KK * G, Cr)),                                   # span w^T
            full_spec((KK * G, 1)),                                    # span bias
            full_spec((Cmid, 1)), full_spec((Cmid, 1)),                # bn2
            full_spec((Cout, Cmid)),                                   # w3^T
            full_spec((Cout, 1)), full_spec((Cout, 1)),                # bn3
            full_spec((K, M)),                                         # col mask
        ],
        out_specs=pl.BlockSpec((1, Cout, M), lambda b: (b, 0, 0)),
        scratch_shapes=[
            pltpu.VMEM((Cmid, M + 2 * POFF), jnp.float32),   # shift buffer
            pltpu.VMEM((Cmid, M), jnp.float32),              # post-involution mid
        ],
    )

    out_flat = pl.pallas_call(
        kernel,
        out_shape=jax.ShapeDtypeStruct((B, Cout, M), jnp.float32),
        grid_spec=grid_spec,
        compiler_params=pltpu.CompilerParams(
            dimension_semantics=("parallel",),
            vmem_limit_bytes=32 * 1024 * 1024),
    )(x_flat, w1t, s1, b1, wrt, sr, br, wst, bs, s2, b2, w3t, s3, b3, cmask)

    return out_flat.reshape(B, Cout, H, W)


def reference_forward(x_nchw, p, *, K=7, group_channels=16):
    """Pure-JAX reference mirroring the PyTorch Bottleneck forward (eval-mode BN),
    with the same bf16-input / f32-accumulate matmul precision as the kernel."""
    B, Cin, H, W = x_nchw.shape
    Cmid = p["w1"].shape[1]
    Cout = p["w3"].shape[1]
    GC = group_channels
    G = Cmid // GC
    P = (K - 1) // 2

    def mm(a, b):
        return jnp.dot(a.astype(jnp.bfloat16), b.astype(jnp.bfloat16),
                       preferred_element_type=jnp.float32)

    x = jnp.transpose(x_nchw, (0, 2, 3, 1))                       # NHWC
    x2 = x.reshape(B, H * W, Cin)
    h1 = jnp.maximum(mm(x2, p["w1"]) * p["s1"] + p["b1"], 0.0)
    r = jnp.maximum(mm(h1, p["wr"]) * p["sr"] + p["br"], 0.0)
    kern = (mm(r, p["ws"]) + p["bs"]).reshape(B, H, W, G, K * K)
    h1m = h1.reshape(B, H, W, Cmid)
    h1p = jnp.pad(h1m, ((0, 0), (P, P), (P, P), (0, 0)))
    out = jnp.zeros((B, H, W, Cmid), jnp.float32)
    for k in range(K * K):
        ki, kj = divmod(k, K)
        patch = h1p[:, ki:ki + H, kj:kj + W, :].reshape(B, H, W, G, GC)
        out = out + (kern[..., k:k + 1] * patch).reshape(B, H, W, Cmid)
    o2 = jnp.maximum(out.reshape(B, H * W, Cmid) * p["s2"] + p["b2"], 0.0)
    o3 = mm(o2, p["w3"]) * p["s3"] + p["b3"]
    out_nhwc = jnp.maximum(o3 + x2, 0.0).reshape(B, H, W, Cout)
    return jnp.transpose(out_nhwc, (0, 3, 1, 2))


def _fold_bn(gamma, beta, mean, var, eps=1e-5):
    scale = gamma / jnp.sqrt(var + eps)
    bias = beta - mean * scale
    return scale[None, :], bias[None, :]


def make_params(key, Cin, Cout, expansion=4, K=7, group_channels=16, reduction_ratio=4):
    Cmid = Cout // expansion
    Cr = Cmid // reduction_ratio
    G = Cmid // group_channels
    ks = jax.random.split(key, 24)

    def bn(i, c):
        gamma = 1.0 + 0.1 * jax.random.normal(ks[i], (c,), jnp.float32)
        beta = 0.1 * jax.random.normal(ks[i + 1], (c,), jnp.float32)
        mean = 0.1 * jax.random.normal(ks[i + 2], (c,), jnp.float32)
        var = 1.0 + 0.1 * jnp.abs(jax.random.normal(ks[i + 3], (c,), jnp.float32))
        return _fold_bn(gamma, beta, mean, var)

    p = {}
    p["w1"] = 0.05 * jax.random.normal(ks[0], (Cin, Cmid), jnp.float32)
    p["s1"], p["b1"] = bn(1, Cmid)
    p["wr"] = 0.05 * jax.random.normal(ks[5], (Cmid, Cr), jnp.float32)
    p["sr"], p["br"] = bn(6, Cr)
    p["ws"] = 0.05 * jax.random.normal(ks[10], (Cr, K * K * G), jnp.float32)
    p["bs"] = (0.1 * jax.random.normal(ks[11], (K * K * G,), jnp.float32))[None, :]
    p["s2"], p["b2"] = bn(12, Cmid)
    p["w3"] = 0.05 * jax.random.normal(ks[16], (Cmid, Cout), jnp.float32)
    p["s3"], p["b3"] = bn(17, Cout)
    return p


if __name__ == "__main__":
    # in_channels = out_channels = 64 (identity residual), expansion=4 ->
    # mid_channels=16, involution K=7, group_channels=16 -> 1 group, r=4.
    B, H, W = 2, 16, 16
    Cin = Cout = 64

    key = jax.random.PRNGKey(0)
    kx, kp = jax.random.split(key)
    x = jax.random.normal(kx, (B, Cin, H, W), jnp.float32)   # NCHW like PyTorch
    params = make_params(kp, Cin, Cout)

    out = jax.block_until_ready(bottleneck_forward(x, params))
    ref = jax.block_until_ready(reference_forward(x, params))
    np.testing.assert_allclose(np.asarray(out), np.asarray(ref), rtol=1e-3, atol=1e-3)

    print("KERNEL_OK")
</pallas_src>

<mosaic_0001>
module attributes {stable_mosaic.version = 11 : i64} {
  func.func @_bottleneck_kernel(%arg0: i32, %arg1: memref<1x64x256xf32, #tpu.memory_space<vmem>>, %arg2: memref<16x64xbf16, #tpu.memory_space<vmem>>, %arg3: memref<16x1xf32, #tpu.memory_space<vmem>>, %arg4: memref<16x1xf32, #tpu.memory_space<vmem>>, %arg5: memref<4x16xbf16, #tpu.memory_space<vmem>>, %arg6: memref<4x1xf32, #tpu.memory_space<vmem>>, %arg7: memref<4x1xf32, #tpu.memory_space<vmem>>, %arg8: memref<49x4xbf16, #tpu.memory_space<vmem>>, %arg9: memref<49x1xf32, #tpu.memory_space<vmem>>, %arg10: memref<16x1xf32, #tpu.memory_space<vmem>>, %arg11: memref<16x1xf32, #tpu.memory_space<vmem>>, %arg12: memref<64x16xbf16, #tpu.memory_space<vmem>>, %arg13: memref<64x1xf32, #tpu.memory_space<vmem>>, %arg14: memref<64x1xf32, #tpu.memory_space<vmem>>, %arg15: memref<7x256xf32, #tpu.memory_space<vmem>>, %arg16: memref<1x64x256xf32, #tpu.memory_space<vmem>>, %arg17: memref<16x358xf32, #tpu.memory_space<vmem>>, %arg18: memref<16x256xf32, #tpu.memory_space<vmem>>) attributes {dimension_semantics = [#tpu.dimension_semantics<parallel>], iteration_bounds = array<i64: 2>, scalar_prefetch = 0 : i64, scratch_operands = 2 : i64, tpu.core_type = #tpu.core_type<tc>, window_params = [{transform_indices = @transform_0, window_bounds = array<i64: 1, 64, 256>}, {pipeline_mode = #tpu.pipeline_mode<synchronous>, transform_indices = @transform_1, window_bounds = array<i64: 16, 64>}, {pipeline_mode = #tpu.pipeline_mode<synchronous>, transform_indices = @transform_2, window_bounds = array<i64: 16, 1>}, {pipeline_mode = #tpu.pipeline_mode<synchronous>, transform_indices = @transform_3, window_bounds = array<i64: 16, 1>}, {pipeline_mode = #tpu.pipeline_mode<synchronous>, transform_indices = @transform_4, window_bounds = array<i64: 4, 16>}, {pipeline_mode = #tpu.pipeline_mode<synchronous>, transform_indices = @transform_5, window_bounds = array<i64: 4, 1>}, {pipeline_mode = #tpu.pipeline_mode<synchronous>, transform_indices = @transform_6, window_bounds = array<i64: 4, 1>}, {pipeline_mode = #tpu.pipeline_mode<synchronous>, transform_indices = @transform_7, window_bounds = array<i64: 49, 4>}, {pipeline_mode = #tpu.pipeline_mode<synchronous>, transform_indices = @transform_8, window_bounds = array<i64: 49, 1>}, {pipeline_mode = #tpu.pipeline_mode<synchronous>, transform_indices = @transform_9, window_bounds = array<i64: 16, 1>}, {pipeline_mode = #tpu.pipeline_mode<synchronous>, transform_indices = @transform_10, window_bounds = array<i64: 16, 1>}, {pipeline_mode = #tpu.pipeline_mode<synchronous>, transform_indices = @transform_11, window_bounds = array<i64: 64, 16>}, {pipeline_mode = #tpu.pipeline_mode<synchronous>, transform_indices = @transform_12, window_bounds = array<i64: 64, 1>}, {pipeline_mode = #tpu.pipeline_mode<synchronous>, transform_indices = @transform_13, window_bounds = array<i64: 64, 1>}, {pipeline_mode = #tpu.pipeline_mode<synchronous>, transform_indices = @transform_14, window_bounds = array<i64: 7, 256>}, {transform_indices = @transform_15, window_bounds = array<i64: 1, 64, 256>}]} {
    %c0 = arith.constant 0 : index
    %c0_0 = arith.constant 0 : index
    %0 = vector.load %arg2[%c0, %c0_0] : memref<16x64xbf16, #tpu.memory_space<vmem>>, vector<16x64xbf16>
    %c0_1 = arith.constant 0 : index
    %c0_2 = arith.constant 0 : index
    %c0_3 = arith.constant 0 : index
    %1 = vector.load %arg1[%c0_1, %c0_2, %c0_3] : memref<1x64x256xf32, #tpu.memory_space<vmem>>, vector<1x64x256xf32>
    %2 = vector.shape_cast %1 : vector<1x64x256xf32> to vector<64x256xf32>
    %3 = arith.truncf %2 : vector<64x256xf32> to vector<64x256xbf16>
    %cst = arith.constant dense<0.000000e+00> : vector<16x256xf32>
    %4 = tpu.matmul %0, %3, %cst {dimension_numbers = #tpu.dot_dimension_numbers<[1], [0], [0], [1], [0, 0, 1, 1], [], []>} : vector<16x64xbf16>, vector<64x256xbf16>, vector<16x256xf32> -> vector<16x256xf32>
    %c0_4 = arith.constant 0 : index
    %c0_5 = arith.constant 0 : index
    %5 = vector.load %arg3[%c0_4, %c0_5] : memref<16x1xf32, #tpu.memory_space<vmem>>, vector<16x1xf32>
    %6 = vector.broadcast %5 : vector<16x1xf32> to vector<16x256xf32>
    %7 = arith.mulf %4, %6 : vector<16x256xf32>
    %c0_6 = arith.constant 0 : index
    %c0_7 = arith.constant 0 : index
    %8 = vector.load %arg4[%c0_6, %c0_7] : memref<16x1xf32, #tpu.memory_space<vmem>>, vector<16x1xf32>
    %9 = vector.broadcast %8 : vector<16x1xf32> to vector<16x256xf32>
    %10 = arith.addf %7, %9 : vector<16x256xf32>
    %cst_8 = arith.constant 0.000000e+00 : f32
    %11 = vector.broadcast %cst_8 : f32 to vector<16x256xf32>
    %12 = arith.maximumf %10, %11 : vector<16x256xf32>
    %c0_9 = arith.constant 0 : index
    %c0_10 = arith.constant 0 : index
    %13 = vector.load %arg5[%c0_9, %c0_10] : memref<4x16xbf16, #tpu.memory_space<vmem>>, vector<4x16xbf16>
    %14 = arith.truncf %12 : vector<16x256xf32> to vector<16x256xbf16>
    %cst_11 = arith.constant dense<0.000000e+00> : vector<4x256xf32>
    %15 = tpu.matmul %13, %14, %cst_11 {dimension_numbers = #tpu.dot_dimension_numbers<[1], [0], [0], [1], [0, 0, 1, 1], [], []>} : vector<4x16xbf16>, vector<16x256xbf16>, vector<4x256xf32> -> vector<4x256xf32>
    %c0_12 = arith.constant 0 : index
    %c0_13 = arith.constant 0 : index
    %16 = vector.load %arg6[%c0_12, %c0_13] : memref<4x1xf32, #tpu.memory_space<vmem>>, vector<4x1xf32>
    %17 = vector.broadcast %16 : vector<4x1xf32> to vector<4x256xf32>
    %18 = arith.mulf %15, %17 : vector<4x256xf32>
    %c0_14 = arith.constant 0 : index
    %c0_15 = arith.constant 0 : index
    %19 = vector.load %arg7[%c0_14, %c0_15] : memref<4x1xf32, #tpu.memory_space<vmem>>, vector<4x1xf32>
    %20 = vector.broadcast %19 : vector<4x1xf32> to vector<4x256xf32>
    %21 = arith.addf %18, %20 : vector<4x256xf32>
    %cst_16 = arith.constant 0.000000e+00 : f32
    %22 = vector.broadcast %cst_16 : f32 to vector<4x256xf32>
    %23 = arith.maximumf %21, %22 : vector<4x256xf32>
    %c0_17 = arith.constant 0 : index
    %c0_18 = arith.constant 0 : index
    %24 = vector.load %arg8[%c0_17, %c0_18] : memref<49x4xbf16, #tpu.memory_space<vmem>>, vector<49x4xbf16>
    %25 = arith.truncf %23 : vector<4x256xf32> to vector<4x256xbf16>
    %cst_19 = arith.constant dense<0.000000e+00> : vector<49x256xf32>
    %26 = tpu.matmul %24, %25, %cst_19 {dimension_numbers = #tpu.dot_dimension_numbers<[1], [0], [0], [1], [0, 0, 1, 1], [], []>} : vector<49x4xbf16>, vector<4x256xbf16>, vector<49x256xf32> -> vector<49x256xf32>
    %c0_20 = arith.constant 0 : index
    %c0_21 = arith.constant 0 : index
    %27 = vector.load %arg9[%c0_20, %c0_21] : memref<49x1xf32, #tpu.memory_space<vmem>>, vector<49x1xf32>
    %28 = vector.broadcast %27 : vector<49x1xf32> to vector<49x256xf32>
    %29 = arith.addf %26, %28 : vector<49x256xf32>
    %cst_22 = arith.constant 0.000000e+00 : f32
    %30 = vector.broadcast %cst_22 : f32 to vector<16x51xf32>
    %c0_23 = arith.constant 0 : index
    %c0_24 = arith.constant 0 : index
    %31 = vector.load %arg17[%c0_23, %c0_24] : memref<16x358xf32, #tpu.memory_space<vmem>>, vector<16x51xf32>
    tpu.vector_store %arg17[%c0_23, %c0_24], %30 {strides = array<i32>} : memref<16x358xf32, #tpu.memory_space<vmem>>, vector<16x51xf32>,
    %cst_25 = arith.constant 0.000000e+00 : f32
    %32 = vector.broadcast %cst_25 : f32 to vector<16x51xf32>
    %c0_26 = arith.constant 0 : index
    %c307 = arith.constant 307 : index
    %33 = vector.load %arg17[%c0_26, %c307] : memref<16x358xf32, #tpu.memory_space<vmem>>, vector<16x51xf32>
    tpu.vector_store %arg17[%c0_26, %c307], %32 {strides = array<i32>} : memref<16x358xf32, #tpu.memory_space<vmem>>, vector<16x51xf32>,
    %c0_27 = arith.constant 0 : index
    %c51 = arith.constant 51 : index
    %34 = vector.load %arg17[%c0_27, %c51] : memref<16x358xf32, #tpu.memory_space<vmem>>, vector<16x256xf32>
    tpu.vector_store %arg17[%c0_27, %c51], %12 {strides = array<i32>} : memref<16x358xf32, #tpu.memory_space<vmem>>, vector<16x256xf32>,
    %c0_28 = arith.constant 0 : index
    %c0_29 = arith.constant 0 : index
    %35 = vector.load %arg15[%c0_28, %c0_29] : memref<7x256xf32, #tpu.memory_space<vmem>>, vector<7x256xf32>
    %cst_30 = arith.constant 0.000000e+00 : f32
    %36 = vector.broadcast %cst_30 : f32 to vector<16x256xf32>
    %c0_31 = arith.constant 0 : index
    %c0_32 = arith.constant 0 : index
    %37 = vector.load %arg17[%c0_31, %c0_32] : memref<16x358xf32, #tpu.memory_space<vmem>>, vector<16x256xf32>
    %38 = vector.extract_strided_slice %29 {offsets = [0, 0], sizes = [1, 256], strides = [1, 1]} : vector<49x256xf32> to vector<1x256xf32>
    %39 = vector.extract_strided_slice %35 {offsets = [0, 0], sizes = [1, 256], strides = [1, 1]} : vector<7x256xf32> to vector<1x256xf32>
    %40 = arith.mulf %38, %39 : vector<1x256xf32>
    %41 = vector.broadcast %40 : vector<1x256xf32> to vector<16x256xf32>
    %42 = arith.mulf %41, %37 : vector<16x256xf32>
    %43 = arith.addf %36, %42 : vector<16x256xf32>
    %c0_33 = arith.constant 0 : index
    %c1 = arith.constant 1 : index
    %44 = vector.load %arg17[%c0_33, %c1] : memref<16x358xf32, #tpu.memory_space<vmem>>, vector<16x256xf32>
    %45 = vector.extract_strided_slice %29 {offsets = [1, 0], sizes = [1, 256], strides = [1, 1]} : vector<49x256xf32> to vector<1x256xf32>
    %46 = vector.extract_strided_slice %35 {offsets = [1, 0], sizes = [1, 256], strides = [1, 1]} : vector<7x256xf32> to vector<1x256xf32>
    %47 = arith.mulf %45, %46 : vector<1x256xf32>
    %48 = vector.broadcast %47 : vector<1x256xf32> to vector<16x256xf32>
    %49 = arith.mulf %48, %44 : vector<16x256xf32>
    %50 = arith.addf %43, %49 : vector<16x256xf32>
    %c0_34 = arith.constant 0 : index
    %c2 = arith.constant 2 : index
    %51 = vector.load %arg17[%c0_34, %c2] : memref<16x358xf32, #tpu.memory_space<vmem>>, vector<16x256xf32>
    %52 = vector.extract_strided_slice %29 {offsets = [2, 0], sizes = [1, 256], strides = [1, 1]} : vector<49x256xf32> to vector<1x256xf32>
    %53 = vector.extract_strided_slice %35 {offsets = [2, 0], sizes = [1, 256], strides = [1, 1]} : vector<7x256xf32> to vector<1x256xf32>
    %54 = arith.mulf %52, %53 : vector<1x256xf32>
    %55 = vector.broadcast %54 : vector<1x256xf32> to vector<16x256xf32>
    %56 = arith.mulf %55, %51 : vector<16x256xf32>
    %57 = arith.addf %50, %56 : vector<16x256xf32>
    %c0_35 = arith.constant 0 : index
    %c3 = arith.constant 3 : index
    %58 = vector.load %arg17[%c0_35, %c3] : memref<16x358xf32, #tpu.memory_space<vmem>>, vector<16x256xf32>
    %59 = vector.extract_strided_slice %29 {offsets = [3, 0], sizes = [1, 256], strides = [1, 1]} : vector<49x256xf32> to vector<1x256xf32>
    %60 = vector.extract_strided_slice %35 {offsets = [3, 0], sizes = [1, 256], strides = [1, 1]} : vector<7x256xf32> to vector<1x256xf32>
    %61 = arith.mulf %59, %60 : vector<1x256xf32>
    %62 = vector.broadcast %61 : vector<1x256xf32> to vector<16x256xf32>
    %63 = arith.mulf %62, %58 : vector<16x256xf32>
    %64 = arith.addf %57, %63 : vector<16x256xf32>
    %c0_36 = arith.constant 0 : index
    %c4 = arith.constant 4 : index
    %65 = vector.load %arg17[%c0_36, %c4] : memref<16x358xf32, #tpu.memory_space<vmem>>, vector<16x256xf32>
    %66 = vector.extract_strided_slice %29 {offsets = [4, 0], sizes = [1, 256], strides = [1, 1]} : vector<49x256xf32> to vector<1x256xf32>
    %67 = vector.extract_strided_slice %35 {offsets = [4, 0], sizes = [1, 256], strides = [1, 1]} : vector<7x256xf32> to vector<1x256xf32>
    %68 = arith.mulf %66, %67 : vector<1x256xf32>
    %69 = vector.broadcast %68 : vector<1x256xf32> to vector<16x256xf32>
    %70 = arith.mulf %69, %65 : vector<16x256xf32>
    %71 = arith.addf %64, %70 : vector<16x256xf32>
    %c0_37 = arith.constant 0 : index
    %c5 = arith.constant 5 : index
    %72 = vector.load %arg17[%c0_37, %c5] : memref<16x358xf32, #tpu.memory_space<vmem>>, vector<16x256xf32>
    %73 = vector.extract_strided_slice %29 {offsets = [5, 0], sizes = [1, 256], strides = [1, 1]} : vector<49x256xf32> to vector<1x256xf32>
    %74 = vector.extract_strided_slice %35 {offsets = [5, 0], sizes = [1, 256], strides = [1, 1]} : vector<7x256xf32> to vector<1x256xf32>
    %75 = arith.mulf %73, %74 : vector<1x256xf32>
    %76 = vector.broadcast %75 : vector<1x256xf32> to vector<16x256xf32>
    %77 = arith.mulf %76, %72 : vector<16x256xf32>
    %78 = arith.addf %71, %77 : vector<16x256xf32>
    %c0_38 = arith.constant 0 : index
    %c6 = arith.constant 6 : index
    %79 = vector.load %arg17[%c0_38, %c6] : memref<16x358xf32, #tpu.memory_space<vmem>>, vector<16x256xf32>
    %80 = vector.extract_strided_slice %29 {offsets = [6, 0], sizes = [1, 256], strides = [1, 1]} : vector<49x256xf32> to vector<1x256xf32>
    %81 = vector.extract_strided_slice %35 {offsets = [6, 0], sizes = [1, 256], strides = [1, 1]} : vector<7x256xf32> to vector<1x256xf32>
    %82 = arith.mulf %80, %81 : vector<1x256xf32>
    %83 = vector.broadcast %82 : vector<1x256xf32> to vector<16x256xf32>
    %84 = arith.mulf %83, %79 : vector<16x256xf32>
    %85 = arith.addf %78, %84 : vector<16x256xf32>
    %c0_39 = arith.constant 0 : index
    %c16 = arith.constant 16 : index
    %86 = vector.load %arg17[%c0_39, %c16] : memref<16x358xf32, #tpu.memory_space<vmem>>, vector<16x256xf32>
    %87 = vector.extract_strided_slice %29 {offsets = [7, 0], sizes = [1, 256], strides = [1, 1]} : vector<49x256xf32> to vector<1x256xf32>
    %88 = vector.extract_strided_slice %35 {offsets = [0, 0], sizes = [1, 256], strides = [1, 1]} : vector<7x256xf32> to vector<1x256xf32>
    %89 = arith.mulf %87, %88 : vector<1x256xf32>
    %90 = vector.broadcast %89 : vector<1x256xf32> to vector<16x256xf32>
    %91 = arith.mulf %90, %86 : vector<16x256xf32>
    %92 = arith.addf %85, %91 : vector<16x256xf32>
    %c0_40 = arith.constant 0 : index
    %c17 = arith.constant 17 : index
    %93 = vector.load %arg17[%c0_40, %c17] : memref<16x358xf32, #tpu.memory_space<vmem>>, vector<16x256xf32>
    %94 = vector.extract_strided_slice %29 {offsets = [8, 0], sizes = [1, 256], strides = [1, 1]} : vector<49x256xf32> to vector<1x256xf32>
    %95 = vector.extract_strided_slice %35 {offsets = [1, 0], sizes = [1, 256], strides = [1, 1]} : vector<7x256xf32> to vector<1x256xf32>
    %96 = arith.mulf %94, %95 : vector<1x256xf32>
    %97 = vector.broadcast %96 : vector<1x256xf32> to vector<16x256xf32>
    %98 = arith.mulf %97, %93 : vector<16x256xf32>
    %99 = arith.addf %92, %98 : vector<16x256xf32>
    %c0_41 = arith.constant 0 : index
    %c18 = arith.constant 18 : index
    %100 = vector.load %arg17[%c0_41, %c18] : memref<16x358xf32, #tpu.memory_space<vmem>>, vector<16x256xf32>
    %101 = vector.extract_strided_slice %29 {offsets = [9, 0], sizes = [1, 256], strides = [1, 1]} : vector<49x256xf32> to vector<1x256xf32>
    %102 = vector.extract_strided_slice %35 {offsets = [2, 0], sizes = [1, 256], strides = [1, 1]} : vector<7x256xf32> to vector<1x256xf32>
    %103 = arith.mulf %101, %102 : vector<1x256xf32>
    %104 = vector.broadcast %103 : vector<1x256xf32> to vector<16x256xf32>
    %105 = arith.mulf %104, %100 : vector<16x256xf32>
    %106 = arith.addf %99, %105 : vector<16x256xf32>
    %c0_42 = arith.constant 0 : index
    %c19 = arith.constant 19 : index
    %107 = vector.load %arg17[%c0_42, %c19] : memref<16x358xf32, #tpu.memory_space<vmem>>, vector<16x256xf32>
    %108 = vector.extract_strided_slice %29 {offsets = [10, 0], sizes = [1, 256], strides = [1, 1]} : vector<49x256xf32> to vector<1x256xf32>
    %109 = vector.extract_strided_slice %35 {offsets = [3, 0], sizes = [1, 256], strides = [1, 1]} : vector<7x256xf32> to vector<1x256xf32>
    %110 = arith.mulf %108, %109 : vector<1x256xf32>
    %111 = vector.broadcast %110 : vector<1x256xf32> to vector<16x256xf32>
    %112 = arith.mulf %111, %107 : vector<16x256xf32>
    %113 = arith.addf %106, %112 : vector<16x256xf32>
    %c0_43 = arith.constant 0 : index
    %c20 = arith.constant 20 : index
    %114 = vector.load %arg17[%c0_43, %c20] : memref<16x358xf32, #tpu.memory_space<vmem>>, vector<16x256xf32>
    %115 = vector.extract_strided_slice %29 {offsets = [11, 0], sizes = [1, 256], strides = [1, 1]} : vector<49x256xf32> to vector<1x256xf32>
    %116 = vector.extract_strided_slice %35 {offsets = [4, 0], sizes = [1, 256], strides = [1, 1]} : vector<7x256xf32> to vector<1x256xf32>
    %117 = arith.mulf %115, %116 : vector<1x256xf32>
    %118 = vector.broadcast %117 : vector<1x256xf32> to vector<16x256xf32>
    %119 = arith.mulf %118, %114 : vector<16x256xf32>
    %120 = arith.addf %113, %119 : vector<16x256xf32>
    %c0_44 = arith.constant 0 : index
    %c21 = arith.constant 21 : index
    %121 = vector.load %arg17[%c0_44, %c21] : memref<16x358xf32, #tpu.memory_space<vmem>>, vector<16x256xf32>
    %122 = vector.extract_strided_slice %29 {offsets = [12, 0], sizes = [1, 256], strides = [1, 1]} : vector<49x256xf32> to vector<1x256xf32>
    %123 = vector.extract_strided_slice %35 {offsets = [5, 0], sizes = [1, 256], strides = [1, 1]} : vector<7x256xf32> to vector<1x256xf32>
    %124 = arith.mulf %122, %123 : vector<1x256xf32>
    %125 = vector.broadcast %124 : vector<1x256xf32> to vector<16x256xf32>
    %126 = arith.mulf %125, %121 : vector<16x256xf32>
    %127 = arith.addf %120, %126 : vector<16x256xf32>
    %c0_45 = arith.constant 0 : index
    %c22 = arith.constant 22 : index
    %128 = vector.load %arg17[%c0_45, %c22] : memref<16x358xf32, #tpu.memory_space<vmem>>, vector<16x256xf32>
    %129 = vector.extract_strided_slice %29 {offsets = [13, 0], sizes = [1, 256], strides = [1, 1]} : vector<49x256xf32> to vector<1x256xf32>
    %130 = vector.extract_strided_slice %35 {offsets = [6, 0], sizes = [1, 256], strides = [1, 1]} : vector<7x256xf32> to vector<1x256xf32>
    %131 = arith.mulf %129, %130 : vector<1x256xf32>
    %132 = vector.broadcast %131 : vector<1x256xf32> to vector<16x256xf32>
    %133 = arith.mulf %132, %128 : vector<16x256xf32>
    %134 = arith.addf %127, %133 : vector<16x256xf32>
    %c0_46 = arith.constant 0 : index
    %c32 = arith.constant 32 : index
    %135 = vector.load %arg17[%c0_46, %c32] : memref<16x358xf32, #tpu.memory_space<vmem>>, vector<16x256xf32>
    %136 = vector.extract_strided_slice %29 {offsets = [14, 0], sizes = [1, 256], strides = [1, 1]} : vector<49x256xf32> to vector<1x256xf32>
    %137 = vector.extract_strided_slice %35 {offsets = [0, 0], sizes = [1, 256], strides = [1, 1]} : vector<7x256xf32> to vector<1x256xf32>
    %138 = arith.mulf %136, %137 : vector<1x256xf32>
    %139 = vector.broadcast %138 : vector<1x256xf32> to vector<16x256xf32>
    %140 = arith.mulf %139, %135 : vector<16x256xf32>
    %141 = arith.addf %134, %140 : vector<16x256xf32>
    %c0_47 = arith.constant 0 : index
    %c33 = arith.constant 33 : index
    %142 = vector.load %arg17[%c0_47, %c33] : memref<16x358xf32, #tpu.memory_space<vmem>>, vector<16x256xf32>
    %143 = vector.extract_strided_slice %29 {offsets = [15, 0], sizes = [1, 256], strides = [1, 1]} : vector<49x256xf32> to vector<1x256xf32>
    %144 = vector.extract_strided_slice %35 {offsets = [1, 0], sizes = [1, 256], strides = [1, 1]} : vector<7x256xf32> to vector<1x256xf32>
    %145 = arith.mulf %143, %144 : vector<1x256xf32>
    %146 = vector.broadcast %145 : vector<1x256xf32> to vector<16x256xf32>
    %147 = arith.mulf %146, %142 : vector<16x256xf32>
    %148 = arith.addf %141, %147 : vector<16x256xf32>
    %c0_48 = arith.constant 0 : index
    %c34 = arith.constant 34 : index
    %149 = vector.load %arg17[%c0_48, %c34] : memref<16x358xf32, #tpu.memory_space<vmem>>, vector<16x256xf32>
    %150 = vector.extract_strided_slice %29 {offsets = [16, 0], sizes = [1, 256], strides = [1, 1]} : vector<49x256xf32> to vector<1x256xf32>
    %151 = vector.extract_strided_slice %35 {offsets = [2, 0], sizes = [1, 256], strides = [1, 1]} : vector<7x256xf32> to vector<1x256xf32>
    %152 = arith.mulf %150, %151 : vector<1x256xf32>
    %153 = vector.broadcast %152 : vector<1x256xf32> to vector<16x256xf32>
    %154 = arith.mulf %153, %149 : vector<16x256xf32>
    %155 = arith.addf %148, %154 : vector<16x256xf32>
    %c0_49 = arith.constant 0 : index
    %c35 = arith.constant 35 : index
    %156 = vector.load %arg17[%c0_49, %c35] : memref<16x358xf32, #tpu.memory_space<vmem>>, vector<16x256xf32>
    %157 = vector.extract_strided_slice %29 {offsets = [17, 0], sizes = [1, 256], strides = [1, 1]} : vector<49x256xf32> to vector<1x256xf32>
    %158 = vector.extract_strided_slice %35 {offsets = [3, 0], sizes = [1, 256], strides = [1, 1]} : vector<7x256xf32> to vector<1x256xf32>
    %159 = arith.mulf %157, %158 : vector<1x256xf32>
    %160 = vector.broadcast %159 : vector<1x256xf32> to vector<16x256xf32>
    %161 = arith.mulf %160, %156 : vector<16x256xf32>
    %162 = arith.addf %155, %161 : vector<16x256xf32>
    %c0_50 = arith.constant 0 : index
    %c36 = arith.constant 36 : index
    %163 = vector.load %arg17[%c0_50, %c36] : memref<16x358xf32, #tpu.memory_space<vmem>>, vector<16x256xf32>
    %164 = vector.extract_strided_slice %29 {offsets = [18, 0], sizes = [1, 256], strides = [1, 1]} : vector<49x256xf32> to vector<1x256xf32>
    %165 = vector.extract_strided_slice %35 {offsets = [4, 0], sizes = [1, 256], strides = [1, 1]} : vector<7x256xf32> to vector<1x256xf32>
    %166 = arith.mulf %164, %165 : vector<1x256xf32>
    %167 = vector.broadcast %166 : vector<1x256xf32> to vector<16x256xf32>
    %168 = arith.mulf %167, %163 : vector<16x256xf32>
    %169 = arith.addf %162, %168 : vector<16x256xf32>
    %c0_51 = arith.constant 0 : index
    %c37 = arith.constant 37 : index
    %170 = vector.load %arg17[%c0_51, %c37] : memref<16x358xf32, #tpu.memory_space<vmem>>, vector<16x256xf32>
    %171 = vector.extract_strided_slice %29 {offsets = [19, 0], sizes = [1, 256], strides = [1, 1]} : vector<49x256xf32> to vector<1x256xf32>
    %172 = vector.extract_strided_slice %35 {offsets = [5, 0], sizes = [1, 256], strides = [1, 1]} : vector<7x256xf32> to vector<1x256xf32>
    %173 = arith.mulf %171, %172 : vector<1x256xf32>
    %174 = vector.broadcast %173 : vector<1x256xf32> to vector<16x256xf32>
    %175 = arith.mulf %174, %170 : vector<16x256xf32>
    %176 = arith.addf %169, %175 : vector<16x256xf32>
    %c0_52 = arith.constant 0 : index
    %c38 = arith.constant 38 : index
    %177 = vector.load %arg17[%c0_52, %c38] : memref<16x358xf32, #tpu.memory_space<vmem>>, vector<16x256xf32>
    %178 = vector.extract_strided_slice %29 {offsets = [20, 0], sizes = [1, 256], strides = [1, 1]} : vector<49x256xf32> to vector<1x256xf32>
    %179 = vector.extract_strided_slice %35 {offsets = [6, 0], sizes = [1, 256], strides = [1, 1]} : vector<7x256xf32> to vector<1x256xf32>
    %180 = arith.mulf %178, %179 : vector<1x256xf32>
    %181 = vector.broadcast %180 : vector<1x256xf32> to vector<16x256xf32>
    %182 = arith.mulf %181, %177 : vector<16x256xf32>
    %183 = arith.addf %176, %182 : vector<16x256xf32>
    %c0_53 = arith.constant 0 : index
    %c48 = arith.constant 48 : index
    %184 = vector.load %arg17[%c0_53, %c48] : memref<16x358xf32, #tpu.memory_space<vmem>>, vector<16x256xf32>
    %185 = vector.extract_strided_slice %29 {offsets = [21, 0], sizes = [1, 256], strides = [1, 1]} : vector<49x256xf32> to vector<1x256xf32>
    %186 = vector.extract_strided_slice %35 {offsets = [0, 0], sizes = [1, 256], strides = [1, 1]} : vector<7x256xf32> to vector<1x256xf32>
    %187 = arith.mulf %185, %186 : vector<1x256xf32>
    %188 = vector.broadcast %187 : vector<1x256xf32> to vector<16x256xf32>
    %189 = arith.mulf %188, %184 : vector<16x256xf32>
    %190 = arith.addf %183, %189 : vector<16x256xf32>
    %c0_54 = arith.constant 0 : index
    %c49 = arith.constant 49 : index
    %191 = vector.load %arg17[%c0_54, %c49] : memref<16x358xf32, #tpu.memory_space<vmem>>, vector<16x256xf32>
    %192 = vector.extract_strided_slice %29 {offsets = [22, 0], sizes = [1, 256], strides = [1, 1]} : vector<49x256xf32> to vector<1x256xf32>
    %193 = vector.extract_strided_slice %35 {offsets = [1, 0], sizes = [1, 256], strides = [1, 1]} : vector<7x256xf32> to vector<1x256xf32>
    %194 = arith.mulf %192, %193 : vector<1x256xf32>
    %195 = vector.broadcast %194 : vector<1x256xf32> to vector<16x256xf32>
    %196 = arith.mulf %195, %191 : vector<16x256xf32>
    %197 = arith.addf %190, %196 : vector<16x256xf32>
    %c0_55 = arith.constant 0 : index
    %c50 = arith.constant 50 : index
    %198 = vector.load %arg17[%c0_55, %c50] : memref<16x358xf32, #tpu.memory_space<vmem>>, vector<16x256xf32>
    %199 = vector.extract_strided_slice %29 {offsets = [23, 0], sizes = [1, 256], strides = [1, 1]} : vector<49x256xf32> to vector<1x256xf32>
    %200 = vector.extract_strided_slice %35 {offsets = [2, 0], sizes = [1, 256], strides = [1, 1]} : vector<7x256xf32> to vector<1x256xf32>
    %201 = arith.mulf %199, %200 : vector<1x256xf32>
    %202 = vector.broadcast %201 : vector<1x256xf32> to vector<16x256xf32>
    %203 = arith.mulf %202, %198 : vector<16x256xf32>
    %204 = arith.addf %197, %203 : vector<16x256xf32>
    %c0_56 = arith.constant 0 : index
    %c51_57 = arith.constant 51 : index
    %205 = vector.load %arg17[%c0_56, %c51_57] : memref<16x358xf32, #tpu.memory_space<vmem>>, vector<16x256xf32>
    %206 = vector.extract_strided_slice %29 {offsets = [24, 0], sizes = [1, 256], strides = [1, 1]} : vector<49x256xf32> to vector<1x256xf32>
    %207 = vector.extract_strided_slice %35 {offsets = [3, 0], sizes = [1, 256], strides = [1, 1]} : vector<7x256xf32> to vector<1x256xf32>
    %208 = arith.mulf %206, %207 : vector<1x256xf32>
    %209 = vector.broadcast %208 : vector<1x256xf32> to vector<16x256xf32>
    %210 = arith.mulf %209, %205 : vector<16x256xf32>
    %211 = arith.addf %204, %210 : vector<16x256xf32>
    %c0_58 = arith.constant 0 : index
    %c52 = arith.constant 52 : index
    %212 = vector.load %arg17[%c0_58, %c52] : memref<16x358xf32, #tpu.memory_space<vmem>>, vector<16x256xf32>
    %213 = vector.extract_strided_slice %29 {offsets = [25, 0], sizes = [1, 256], strides = [1, 1]} : vector<49x256xf32> to vector<1x256xf32>
    %214 = vector.extract_strided_slice %35 {offsets = [4, 0], sizes = [1, 256], strides = [1, 1]} : vector<7x256xf32> to vector<1x256xf32>
    %215 = arith.mulf %213, %214 : vector<1x256xf32>
    %216 = vector.broadcast %215 : vector<1x256xf32> to vector<16x256xf32>
    %217 = arith.mulf %216, %212 : vector<16x256xf32>
    %218 = arith.addf %211, %217 : vector<16x256xf32>
    %c0_59 = arith.constant 0 : index
    %c53 = arith.constant 53 : index
    %219 = vector.load %arg17[%c0_59, %c53] : memref<16x358xf32, #tpu.memory_space<vmem>>, vector<16x256xf32>
    %220 = vector.extract_strided_slice %29 {offsets = [26, 0], sizes = [1, 256], strides = [1, 1]} : vector<49x256xf32> to vector<1x256xf32>
    %221 = vector.extract_strided_slice %35 {offsets = [5, 0], sizes = [1, 256], strides = [1, 1]} : vector<7x256xf32> to vector<1x256xf32>
    %222 = arith.mulf %220, %221 : vector<1x256xf32>
    %223 = vector.broadcast %222 : vector<1x256xf32> to vector<16x256xf32>
    %224 = arith.mulf %223, %219 : vector<16x256xf32>
    %225 = arith.addf %218, %224 : vector<16x256xf32>
    %c0_60 = arith.constant 0 : index
    %c54 = arith.constant 54 : index
    %226 = vector.load %arg17[%c0_60, %c54] : memref<16x358xf32, #tpu.memory_space<vmem>>, vector<16x256xf32>
    %227 = vector.extract_strided_slice %29 {offsets = [27, 0], sizes = [1, 256], strides = [1, 1]} : vector<49x256xf32> to vector<1x256xf32>
    %228 = vector.extract_strided_slice %35 {offsets = [6, 0], sizes = [1, 256], strides = [1, 1]} : vector<7x256xf32> to vector<1x256xf32>
    %229 = arith.mulf %227, %228 : vector<1x256xf32>
    %230 = vector.broadcast %229 : vector<1x256xf32> to vector<16x256xf32>
    %231 = arith.mulf %230, %226 : vector<16x256xf32>
    %232 = arith.addf %225, %231 : vector<16x256xf32>
    %c0_61 = arith.constant 0 : index
    %c64 = arith.constant 64 : index
    %233 = vector.load %arg17[%c0_61, %c64] : memref<16x358xf32, #tpu.memory_space<vmem>>, vector<16x256xf32>
    %234 = vector.extract_strided_slice %29 {offsets = [28, 0], sizes = [1, 256], strides = [1, 1]} : vector<49x256xf32> to vector<1x256xf32>
    %235 = vector.extract_strided_slice %35 {offsets = [0, 0], sizes = [1, 256], strides = [1, 1]} : vector<7x256xf32> to vector<1x256xf32>
    %236 = arith.mulf %234, %235 : vector<1x256xf32>
    %237 = vector.broadcast %236 : vector<1x256xf32> to vector<16x256xf32>
    %238 = arith.mulf %237, %233 : vector<16x256xf32>
    %239 = arith.addf %232, %238 : vector<16x256xf32>
    %c0_62 = arith.constant 0 : index
    %c65 = arith.constant 65 : index
    %240 = vector.load %arg17[%c0_62, %c65] : memref<16x358xf32, #tpu.memory_space<vmem>>, vector<16x256xf32>
    %241 = vector.extract_strided_slice %29 {offsets = [29, 0], sizes = [1, 256], strides = [1, 1]} : vector<49x256xf32> to vector<1x256xf32>
    %242 = vector.extract_strided_slice %35 {offsets = [1, 0], sizes = [1, 256], strides = [1, 1]} : vector<7x256xf32> to vector<1x256xf32>
    %243 = arith.mulf %241, %242 : vector<1x256xf32>
    %244 = vector.broadcast %243 : vector<1x256xf32> to vector<16x256xf32>
    %245 = arith.mulf %244, %240 : vector<16x256xf32>
    %246 = arith.addf %239, %245 : vector<16x256xf32>
    %c0_63 = arith.constant 0 : index
    %c66 = arith.constant 66 : index
    %247 = vector.load %arg17[%c0_63, %c66] : memref<16x358xf32, #tpu.memory_space<vmem>>, vector<16x256xf32>
    %248 = vector.extract_strided_slice %29 {offsets = [30, 0], sizes = [1, 256], strides = [1, 1]} : vector<49x256xf32> to vector<1x256xf32>
    %249 = vector.extract_strided_slice %35 {offsets = [2, 0], sizes = [1, 256], strides = [1, 1]} : vector<7x256xf32> to vector<1x256xf32>
    %250 = arith.mulf %248, %249 : vector<1x256xf32>
    %251 = vector.broadcast %250 : vector<1x256xf32> to vector<16x256xf32>
    %252 = arith.mulf %251, %247 : vector<16x256xf32>
    %253 = arith.addf %246, %252 : vector<16x256xf32>
    %c0_64 = arith.constant 0 : index
    %c67 = arith.constant 67 : index
    %254 = vector.load %arg17[%c0_64, %c67] : memref<16x358xf32, #tpu.memory_space<vmem>>, vector<16x256xf32>
    %255 = vector.extract_strided_slice %29 {offsets = [31, 0], sizes = [1, 256], strides = [1, 1]} : vector<49x256xf32> to vector<1x256xf32>
    %256 = vector.extract_strided_slice %35 {offsets = [3, 0], sizes = [1, 256], strides = [1, 1]} : vector<7x256xf32> to vector<1x256xf32>
    %257 = arith.mulf %255, %256 : vector<1x256xf32>
    %258 = vector.broadcast %257 : vector<1x256xf32> to vector<16x256xf32>
    %259 = arith.mulf %258, %254 : vector<16x256xf32>
    %260 = arith.addf %253, %259 : vector<16x256xf32>
    %c0_65 = arith.constant 0 : index
    %c68 = arith.constant 68 : index
    %261 = vector.load %arg17[%c0_65, %c68] : memref<16x358xf32, #tpu.memory_space<vmem>>, vector<16x256xf32>
    %262 = vector.extract_strided_slice %29 {offsets = [32, 0], sizes = [1, 256], strides = [1, 1]} : vector<49x256xf32> to vector<1x256xf32>
    %263 = vector.extract_strided_slice %35 {offsets = [4, 0], sizes = [1, 256], strides = [1, 1]} : vector<7x256xf32> to vector<1x256xf32>
    %264 = arith.mulf %262, %263 : vector<1x256xf32>
    %265 = vector.broadcast %264 : vector<1x256xf32> to vector<16x256xf32>
    %266 = arith.mulf %265, %261 : vector<16x256xf32>
    %267 = arith.addf %260, %266 : vector<16x256xf32>
    %c0_66 = arith.constant 0 : index
    %c69 = arith.constant 69 : index
    %268 = vector.load %arg17[%c0_66, %c69] : memref<16x358xf32, #tpu.memory_space<vmem>>, vector<16x256xf32>
    %269 = vector.extract_strided_slice %29 {offsets = [33, 0], sizes = [1, 256], strides = [1, 1]} : vector<49x256xf32> to vector<1x256xf32>
    %270 = vector.extract_strided_slice %35 {offsets = [5, 0], sizes = [1, 256], strides = [1, 1]} : vector<7x256xf32> to vector<1x256xf32>
    %271 = arith.mulf %269, %270 : vector<1x256xf32>
    %272 = vector.broadcast %271 : vector<1x256xf32> to vector<16x256xf32>
    %273 = arith.mulf %272, %268 : vector<16x256xf32>
    %274 = arith.addf %267, %273 : vector<16x256xf32>
    %c0_67 = arith.constant 0 : index
    %c70 = arith.constant 70 : index
    %275 = vector.load %arg17[%c0_67, %c70] : memref<16x358xf32, #tpu.memory_space<vmem>>, vector<16x256xf32>
    %276 = vector.extract_strided_slice %29 {offsets = [34, 0], sizes = [1, 256], strides = [1, 1]} : vector<49x256xf32> to vector<1x256xf32>
    %277 = vector.extract_strided_slice %35 {offsets = [6, 0], sizes = [1, 256], strides = [1, 1]} : vector<7x256xf32> to vector<1x256xf32>
    %278 = arith.mulf %276, %277 : vector<1x256xf32>
    %279 = vector.broadcast %278 : vector<1x256xf32> to vector<16x256xf32>
    %280 = arith.mulf %279, %275 : vector<16x256xf32>
    %281 = arith.addf %274, %280 : vector<16x256xf32>
    %c0_68 = arith.constant 0 : index
    %c80 = arith.constant 80 : index
    %282 = vector.load %arg17[%c0_68, %c80] : memref<16x358xf32, #tpu.memory_space<vmem>>, vector<16x256xf32>
    %283 = vector.extract_strided_slice %29 {offsets = [35, 0], sizes = [1, 256], strides = [1, 1]} : vector<49x256xf32> to vector<1x256xf32>
    %284 = vector.extract_strided_slice %35 {offsets = [0, 0], sizes = [1, 256], strides = [1, 1]} : vector<7x256xf32> to vector<1x256xf32>
    %285 = arith.mulf %283, %284 : vector<1x256xf32>
    %286 = vector.broadcast %285 : vector<1x256xf32> to vector<16x256xf32>
    %287 = arith.mulf %286, %282 : vector<16x256xf32>
    %288 = arith.addf %281, %287 : vector<16x256xf32>
    %c0_69 = arith.constant 0 : index
    %c81 = arith.constant 81 : index
    %289 = vector.load %arg17[%c0_69, %c81] : memref<16x358xf32, #tpu.memory_space<vmem>>, vector<16x256xf32>
    %290 = vector.extract_strided_slice %29 {offsets = [36, 0], sizes = [1, 256], strides = [1, 1]} : vector<49x256xf32> to vector<1x256xf32>
    %291 = vector.extract_strided_slice %35 {offsets = [1, 0], sizes = [1, 256], strides = [1, 1]} : vector<7x256xf32> to vector<1x256xf32>
    %292 = arith.mulf %290, %291 : vector<1x256xf32>
    %293 = vector.broadcast %292 : vector<1x256xf32> to vector<16x256xf32>
    %294 = arith.mulf %293, %289 : vector<16x256xf32>
    %295 = arith.addf %288, %294 : vector<16x256xf32>
    %c0_70 = arith.constant 0 : index
    %c82 = arith.constant 82 : index
    %296 = vector.load %arg17[%c0_70, %c82] : memref<16x358xf32, #tpu.memory_space<vmem>>, vector<16x256xf32>
    %297 = vector.extract_strided_slice %29 {offsets = [37, 0], sizes = [1, 256], strides = [1, 1]} : vector<49x256xf32> to vector<1x256xf32>
    %298 = vector.extract_strided_slice %35 {offsets = [2, 0], sizes = [1, 256], strides = [1, 1]} : vector<7x256xf32> to vector<1x256xf32>
    %299 = arith.mulf %297, %298 : vector<1x256xf32>
    %300 = vector.broadcast %299 : vector<1x256xf32> to vector<16x256xf32>
    %301 = arith.mulf %300, %296 : vector<16x256xf32>
    %302 = arith.addf %295, %301 : vector<16x256xf32>
    %c0_71 = arith.constant 0 : index
    %c83 = arith.constant 83 : index
    %303 = vector.load %arg17[%c0_71, %c83] : memref<16x358xf32, #tpu.memory_space<vmem>>, vector<16x256xf32>
    %304 = vector.extract_strided_slice %29 {offsets = [38, 0], sizes = [1, 256], strides = [1, 1]} : vector<49x256xf32> to vector<1x256xf32>
    %305 = vector.extract_strided_slice %35 {offsets = [3, 0], sizes = [1, 256], strides = [1, 1]} : vector<7x256xf32> to vector<1x256xf32>
    %306 = arith.mulf %304, %305 : vector<1x256xf32>
    %307 = vector.broadcast %306 : vector<1x256xf32> to vector<16x256xf32>
    %308 = arith.mulf %307, %303 : vector<16x256xf32>
    %309 = arith.addf %302, %308 : vector<16x256xf32>
    %c0_72 = arith.constant 0 : index
    %c84 = arith.constant 84 : index
    %310 = vector.load %arg17[%c0_72, %c84] : memref<16x358xf32, #tpu.memory_space<vmem>>, vector<16x256xf32>
    %311 = vector.extract_strided_slice %29 {offsets = [39, 0], sizes = [1, 256], strides = [1, 1]} : vector<49x256xf32> to vector<1x256xf32>
    %312 = vector.extract_strided_slice %35 {offsets = [4, 0], sizes = [1, 256], strides = [1, 1]} : vector<7x256xf32> to vector<1x256xf32>
    %313 = arith.mulf %311, %312 : vector<1x256xf32>
    %314 = vector.broadcast %313 : vector<1x256xf32> to vector<16x256xf32>
    %315 = arith.mulf %314, %310 : vector<16x256xf32>
    %316 = arith.addf %309, %315 : vector<16x256xf32>
    %c0_73 = arith.constant 0 : index
    %c85 = arith.constant 85 : index
    %317 = vector.load %arg17[%c0_73, %c85] : memref<16x358xf32, #tpu.memory_space<vmem>>, vector<16x256xf32>
    %318 = vector.extract_strided_slice %29 {offsets = [40, 0], sizes = [1, 256], strides = [1, 1]} : vector<49x256xf32> to vector<1x256xf32>
    %319 = vector.extract_strided_slice %35 {offsets = [5, 0], sizes = [1, 256], strides = [1, 1]} : vector<7x256xf32> to vector<1x256xf32>
    %320 = arith.mulf %318, %319 : vector<1x256xf32>
    %321 = vector.broadcast %320 : vector<1x256xf32> to vector<16x256xf32>
    %322 = arith.mulf %321, %317 : vector<16x256xf32>
    %323 = arith.addf %316, %322 : vector<16x256xf32>
    %c0_74 = arith.constant 0 : index
    %c86 = arith.constant 86 : index
    %324 = vector.load %arg17[%c0_74, %c86] : memref<16x358xf32, #tpu.memory_space<vmem>>, vector<16x256xf32>
    %325 = vector.extract_strided_slice %29 {offsets = [41, 0], sizes = [1, 256], strides = [1, 1]} : vector<49x256xf32> to vector<1x256xf32>
    %326 = vector.extract_strided_slice %35 {offsets = [6, 0], sizes = [1, 256], strides = [1, 1]} : vector<7x256xf32> to vector<1x256xf32>
    %327 = arith.mulf %325, %326 : vector<1x256xf32>
    %328 = vector.broadcast %327 : vector<1x256xf32> to vector<16x256xf32>
    %329 = arith.mulf %328, %324 : vector<16x256xf32>
    %330 = arith.addf %323, %329 : vector<16x256xf32>
    %c0_75 = arith.constant 0 : index
    %c96 = arith.constant 96 : index
    %331 = vector.load %arg17[%c0_75, %c96] : memref<16x358xf32, #tpu.memory_space<vmem>>, vector<16x256xf32>
    %332 = vector.extract_strided_slice %29 {offsets = [42, 0], sizes = [1, 256], strides = [1, 1]} : vector<49x256xf32> to vector<1x256xf32>
    %333 = vector.extract_strided_slice %35 {offsets = [0, 0], sizes = [1, 256], strides = [1, 1]} : vector<7x256xf32> to vector<1x256xf32>
    %334 = arith.mulf %332, %333 : vector<1x256xf32>
    %335 = vector.broadcast %334 : vector<1x256xf32> to vector<16x256xf32>
    %336 = arith.mulf %335, %331 : vector<16x256xf32>
    %337 = arith.addf %330, %336 : vector<16x256xf32>
    %c0_76 = arith.constant 0 : index
    %c97 = arith.constant 97 : index
    %338 = vector.load %arg17[%c0_76, %c97] : memref<16x358xf32, #tpu.memory_space<vmem>>, vector<16x256xf32>
    %339 = vector.extract_strided_slice %29 {offsets = [43, 0], sizes = [1, 256], strides = [1, 1]} : vector<49x256xf32> to vector<1x256xf32>
    %340 = vector.extract_strided_slice %35 {offsets = [1, 0], sizes = [1, 256], strides = [1, 1]} : vector<7x256xf32> to vector<1x256xf32>
    %341 = arith.mulf %339, %340 : vector<1x256xf32>
    %342 = vector.broadcast %341 : vector<1x256xf32> to vector<16x256xf32>
    %343 = arith.mulf %342, %338 : vector<16x256xf32>
    %344 = arith.addf %337, %343 : vector<16x256xf32>
    %c0_77 = arith.constant 0 : index
    %c98 = arith.constant 98 : index
    %345 = vector.load %arg17[%c0_77, %c98] : memref<16x358xf32, #tpu.memory_space<vmem>>, vector<16x256xf32>
    %346 = vector.extract_strided_slice %29 {offsets = [44, 0], sizes = [1, 256], strides = [1, 1]} : vector<49x256xf32> to vector<1x256xf32>
    %347 = vector.extract_strided_slice %35 {offsets = [2, 0], sizes = [1, 256], strides = [1, 1]} : vector<7x256xf32> to vector<1x256xf32>
    %348 = arith.mulf %346, %347 : vector<1x256xf32>
    %349 = vector.broadcast %348 : vector<1x256xf32> to vector<16x256xf32>
    %350 = arith.mulf %349, %345 : vector<16x256xf32>
    %351 = arith.addf %344, %350 : vector<16x256xf32>
    %c0_78 = arith.constant 0 : index
    %c99 = arith.constant 99 : index
    %352 = vector.load %arg17[%c0_78, %c99] : memref<16x358xf32, #tpu.memory_space<vmem>>, vector<16x256xf32>
    %353 = vector.extract_strided_slice %29 {offsets = [45, 0], sizes = [1, 256], strides = [1, 1]} : vector<49x256xf32> to vector<1x256xf32>
    %354 = vector.extract_strided_slice %35 {offsets = [3, 0], sizes = [1, 256], strides = [1, 1]} : vector<7x256xf32> to vector<1x256xf32>
    %355 = arith.mulf %353, %354 : vector<1x256xf32>
    %356 = vector.broadcast %355 : vector<1x256xf32> to vector<16x256xf32>
    %357 = arith.mulf %356, %352 : vector<16x256xf32>
    %358 = arith.addf %351, %357 : vector<16x256xf32>
    %c0_79 = arith.constant 0 : index
    %c100 = arith.constant 100 : index
    %359 = vector.load %arg17[%c0_79, %c100] : memref<16x358xf32, #tpu.memory_space<vmem>>, vector<16x256xf32>
    %360 = vector.extract_strided_slice %29 {offsets = [46, 0], sizes = [1, 256], strides = [1, 1]} : vector<49x256xf32> to vector<1x256xf32>
    %361 = vector.extract_strided_slice %35 {offsets = [4, 0], sizes = [1, 256], strides = [1, 1]} : vector<7x256xf32> to vector<1x256xf32>
    %362 = arith.mulf %360, %361 : vector<1x256xf32>
    %363 = vector.broadcast %362 : vector<1x256xf32> to vector<16x256xf32>
    %364 = arith.mulf %363, %359 : vector<16x256xf32>
    %365 = arith.addf %358, %364 : vector<16x256xf32>
    %c0_80 = arith.constant 0 : index
    %c101 = arith.constant 101 : index
    %366 = vector.load %arg17[%c0_80, %c101] : memref<16x358xf32, #tpu.memory_space<vmem>>, vector<16x256xf32>
    %367 = vector.extract_strided_slice %29 {offsets = [47, 0], sizes = [1, 256], strides = [1, 1]} : vector<49x256xf32> to vector<1x256xf32>
    %368 = vector.extract_strided_slice %35 {offsets = [5, 0], sizes = [1, 256], strides = [1, 1]} : vector<7x256xf32> to vector<1x256xf32>
    %369 = arith.mulf %367, %368 : vector<1x256xf32>
    %370 = vector.broadcast %369 : vector<1x256xf32> to vector<16x256xf32>
    %371 = arith.mulf %370, %366 : vector<16x256xf32>
    %372 = arith.addf %365, %371 : vector<16x256xf32>
    %c0_81 = arith.constant 0 : index
    %c102 = arith.constant 102 : index
    %373 = vector.load %arg17[%c0_81, %c102] : memref<16x358xf32, #tpu.memory_space<vmem>>, vector<16x256xf32>
    %374 = vector.extract_strided_slice %29 {offsets = [48, 0], sizes = [1, 256], strides = [1, 1]} : vector<49x256xf32> to vector<1x256xf32>
    %375 = vector.extract_strided_slice %35 {offsets = [6, 0], sizes = [1, 256], strides = [1, 1]} : vector<7x256xf32> to vector<1x256xf32>
    %376 = arith.mulf %374, %375 : vector<1x256xf32>
    %377 = vector.broadcast %376 : vector<1x256xf32> to vector<16x256xf32>
    %378 = arith.mulf %377, %373 : vector<16x256xf32>
    %379 = arith.addf %372, %378 : vector<16x256xf32>
    %c0_82 = arith.constant 0 : index
    %c0_83 = arith.constant 0 : index
    %380 = vector.load %arg10[%c0_82, %c0_83] : memref<16x1xf32, #tpu.memory_space<vmem>>, vector<16x1xf32>
    %c0_84 = arith.constant 0 : index
    %c0_85 = arith.constant 0 : index
    %381 = vector.load %arg11[%c0_84, %c0_85] : memref<16x1xf32, #tpu.memory_space<vmem>>, vector<16x1xf32>
    %382 = vector.broadcast %380 : vector<16x1xf32> to vector<16x256xf32>
    %383 = arith.mulf %379, %382 : vector<16x256xf32>
    %384 = vector.broadcast %381 : vector<16x1xf32> to vector<16x256xf32>
    %385 = arith.addf %383, %384 : vector<16x256xf32>
    %cst_86 = arith.constant 0.000000e+00 : f32
    %386 = vector.broadcast %cst_86 : f32 to vector<16x256xf32>
    %387 = arith.maximumf %385, %386 : vector<16x256xf32>
    %c0_87 = arith.constant 0 : index
    %c0_88 = arith.constant 0 : index
    %388 = vector.load %arg18[%c0_87, %c0_88] : memref<16x256xf32, #tpu.memory_space<vmem>>, vector<16x256xf32>
    tpu.vector_store %arg18[%c0_87, %c0_88], %387 {strides = array<i32>} : memref<16x256xf32, #tpu.memory_space<vmem>>, vector<16x256xf32>,
    %c0_89 = arith.constant 0 : index
    %c0_90 = arith.constant 0 : index
    %389 = vector.load %arg12[%c0_89, %c0_90] : memref<64x16xbf16, #tpu.memory_space<vmem>>, vector<64x16xbf16>
    %c0_91 = arith.constant 0 : index
    %c0_92 = arith.constant 0 : index
    %390 = vector.load %arg18[%c0_91, %c0_92] : memref<16x256xf32, #tpu.memory_space<vmem>>, vector<16x256xf32>
    %391 = arith.truncf %390 : vector<16x256xf32> to vector<16x256xbf16>
    %cst_93 = arith.constant dense<0.000000e+00> : vector<64x256xf32>
    %392 = tpu.matmul %389, %391, %cst_93 {dimension_numbers = #tpu.dot_dimension_numbers<[1], [0], [0], [1], [0, 0, 1, 1], [], []>} : vector<64x16xbf16>, vector<16x256xbf16>, vector<64x256xf32> -> vector<64x256xf32>
    %c0_94 = arith.constant 0 : index
    %c0_95 = arith.constant 0 : index
    %393 = vector.load %arg13[%c0_94, %c0_95] : memref<64x1xf32, #tpu.memory_space<vmem>>, vector<64x1xf32>
    %394 = vector.broadcast %393 : vector<64x1xf32> to vector<64x256xf32>
    %395 = arith.mulf %392, %394 : vector<64x256xf32>
    %c0_96 = arith.constant 0 : index
    %c0_97 = arith.constant 0 : index
    %396 = vector.load %arg14[%c0_96, %c0_97] : memref<64x1xf32, #tpu.memory_space<vmem>>, vector<64x1xf32>
    %397 = vector.broadcast %396 : vector<64x1xf32> to vector<64x256xf32>
    %398 = arith.addf %395, %397 : vector<64x256xf32>
    %c0_98 = arith.constant 0 : index
    %c0_99 = arith.constant 0 : index
    %c0_100 = arith.constant 0 : index
    %399 = vector.load %arg1[%c0_98, %c0_99, %c0_100] : memref<1x64x256xf32, #tpu.memory_space<vmem>>, vector<1x64x256xf32>
    %400 = vector.shape_cast %399 : vector<1x64x256xf32> to vector<64x256xf32>
    %401 = arith.addf %398, %400 : vector<64x256xf32>
    %cst_101 = arith.constant 0.000000e+00 : f32
    %402 = vector.broadcast %cst_101 : f32 to vector<64x256xf32>
    %403 = arith.maximumf %401, %402 : vector<64x256xf32>
    %c0_102 = arith.constant 0 : index
    %c0_103 = arith.constant 0 : index
    %c0_104 = arith.constant 0 : index
    %404 = vector.load %arg16[%c0_102, %c0_103, %c0_104] : memref<1x64x256xf32, #tpu.memory_space<vmem>>, vector<1x64x256xf32>
    %405 = vector.shape_cast %404 : vector<1x64x256xf32> to vector<64x256xf32>
    %406 = vector.shape_cast %403 : vector<64x256xf32> to vector<1x64x256xf32>
    tpu.vector_store %arg16[%c0_102, %c0_103, %c0_104], %406 {strides = array<i32>} : memref<1x64x256xf32, #tpu.memory_space<vmem>>, vector<1x64x256xf32>,
    return
  }
  func.func @transform_0(%arg0: i32) -> (i32, i32, i32) {
    %c0_i32 = arith.constant 0 : i32
    %c0_i32_0 = arith.constant 0 : i32
    %c0_i32_1 = arith.constant 0 : i32
    return %arg0, %c0_i32, %c0_i32_0 : i32, i32, i32
  }
  func.func @transform_1(%arg0: i32) -> (i32, i32) {
    %c0_i32 = arith.constant 0 : i32
    %c0_i32_0 = arith.constant 0 : i32
    %c0_i32_1 = arith.constant 0 : i32
    return %c0_i32, %c0_i32_0 : i32, i32
  }
  func.func @transform_2(%arg0: i32) -> (i32, i32) {
    %c0_i32 = arith.constant 0 : i32
    %c0_i32_0 = arith.constant 0 : i32
    %c0_i32_1 = arith.constant 0 : i32
    return %c0_i32, %c0_i32_0 : i32, i32
  }
  func.func @transform_3(%arg0: i32) -> (i32, i32) {
    %c0_i32 = arith.constant 0 : i32
    %c0_i32_0 = arith.constant 0 : i32
    %c0_i32_1 = arith.constant 0 : i32
    return %c0_i32, %c0_i32_0 : i32, i32
  }
  func.func @transform_4(%arg0: i32) -> (i32, i32) {
    %c0_i32 = arith.constant 0 : i32
    %c0_i32_0 = arith.constant 0 : i32
    %c0_i32_1 = arith.constant 0 : i32
    return %c0_i32, %c0_i32_0 : i32, i32
  }
  func.func @transform_5(%arg0: i32) -> (i32, i32) {
    %c0_i32 = arith.constant 0 : i32
    %c0_i32_0 = arith.constant 0 : i32
    %c0_i32_1 = arith.constant 0 : i32
    return %c0_i32, %c0_i32_0 : i32, i32
  }
  func.func @transform_6(%arg0: i32) -> (i32, i32) {
    %c0_i32 = arith.constant 0 : i32
    %c0_i32_0 = arith.constant 0 : i32
    %c0_i32_1 = arith.constant 0 : i32
    return %c0_i32, %c0_i32_0 : i32, i32
  }
  func.func @transform_7(%arg0: i32) -> (i32, i32) {
    %c0_i32 = arith.constant 0 : i32
    %c0_i32_0 = arith.constant 0 : i32
    %c0_i32_1 = arith.constant 0 : i32
    return %c0_i32, %c0_i32_0 : i32, i32
  }
  func.func @transform_8(%arg0: i32) -> (i32, i32) {
    %c0_i32 = arith.constant 0 : i32
    %c0_i32_0 = arith.constant 0 : i32
    %c0_i32_1 = arith.constant 0 : i32
    return %c0_i32, %c0_i32_0 : i32, i32
  }
  func.func @transform_9(%arg0: i32) -> (i32, i32) {
    %c0_i32 = arith.constant 0 : i32
    %c0_i32_0 = arith.constant 0 : i32
    %c0_i32_1 = arith.constant 0 : i32
    return %c0_i32, %c0_i32_0 : i32, i32
  }
  func.func @transform_10(%arg0: i32) -> (i32, i32) {
    %c0_i32 = arith.constant 0 : i32
    %c0_i32_0 = arith.constant 0 : i32
    %c0_i32_1 = arith.constant 0 : i32
    return %c0_i32, %c0_i32_0 : i32, i32
  }
  func.func @transform_11(%arg0: i32) -> (i32, i32) {
    %c0_i32 = arith.constant 0 : i32
    %c0_i32_0 = arith.constant 0 : i32
    %c0_i32_1 = arith.constant 0 : i32
    return %c0_i32, %c0_i32_0 : i32, i32
  }
  func.func @transform_12(%arg0: i32) -> (i32, i32) {
    %c0_i32 = arith.constant 0 : i32
    %c0_i32_0 = arith.constant 0 : i32
    %c0_i32_1 = arith.constant 0 : i32
    return %c0_i32, %c0_i32_0 : i32, i32
  }
  func.func @transform_13(%arg0: i32) -> (i32, i32) {
    %c0_i32 = arith.constant 0 : i32
    %c0_i32_0 = arith.constant 0 : i32
    %c0_i32_1 = arith.constant 0 : i32
    return %c0_i32, %c0_i32_0 : i32, i32
  }
  func.func @transform_14(%arg0: i32) -> (i32, i32) {
    %c0_i32 = arith.constant 0 : i32
    %c0_i32_0 = arith.constant 0 : i32
    %c0_i32_1 = arith.constant 0 : i32
    return %c0_i32, %c0_i32_0 : i32, i32
  }
  func.func @transform_15(%arg0: i32) -> (i32, i32, i32) {
    %c0_i32 = arith.constant 0 : i32
    %c0_i32_0 = arith.constant 0 : i32
    %c0_i32_1 = arith.constant 0 : i32
    return %arg0, %c0_i32, %c0_i32_0 : i32, i32, i32
  }
}

</mosaic_0001>

<bundles_post_ra>
// kernel: tpu_custom_call.1
= control target key start
LH: loop header
LB: loop body
LE: loop exit
PB: predicated region body
PF: predicated region fallthrough
CT: control target
= control target key end

     0   :  { %s5790_s0 = inlined_call_operand.vmem [shape: f32[2,64,256], index: 0, kind: input, shape index: {}]   ;;  %s5791_s1 = inlined_call_operand.vmem [shape: bf16[16,64], index: 1, kind: input, shape index: {}]   ;;  %s5792_s2 = inlined_call_operand.vmem [shape: f32[16,1], index: 2, kind: input, shape index: {}]   ;;  %s5793_s3 = inlined_call_operand.vmem [shape: f32[16,1], index: 3, kind: input, shape index: {}]   ;;  %s5794_s4 = inlined_call_operand.vmem [shape: bf16[4,16], index: 4, kind: input, shape index: {}]   ;;  %s5795_s5 = inlined_call_operand.vmem [shape: f32[4,1], index: 5, kind: input, shape index: {}]   ;;  %s5796_s6 = inlined_call_operand.vmem [shape: f32[4,1], index: 6, kind: input, shape index: {}]   ;;  %s5797_s7 = inlined_call_operand.vmem [shape: bf16[49,4], index: 7, kind: input, shape index: {}]   ;;  %s5798_s8 = inlined_call_operand.vmem [shape: f32[49,1], index: 8, kind: input, shape index: {}]   ;;  %s5799_s9 = inlined_call_operand.vmem [shape: f32[16,1], index: 9, kind: input, shape index: {}]   ;;  %s5800_s10 = inlined_call_operand.vmem [shape: f32[16,1], index: 10, kind: input, shape index: {}]   ;;  %s5801_s11 = inlined_call_operand.vmem [shape: bf16[64,16], index: 11, kind: input, shape index: {}]   ;;  %s5802_s12 = inlined_call_operand.vmem [shape: f32[64,1], index: 12, kind: input, shape index: {}]   ;;  %s5803_s13 = inlined_call_operand.vmem [shape: f32[64,1], index: 13, kind: input, shape index: {}]   ;;  %s5804_s14 = inlined_call_operand.vmem [shape: f32[7,256], index: 14, kind: input, shape index: {}]   ;;  %s5805_s15 = inlined_call_operand.hbm [shape: f32[2,64,256], index: 15, kind: output, shape index: {}]  }
   0x1   :  { %5965 = sst [smem:[#allocation122_spill]] %s5790_s0 }
   0x2   :  { %5966 = sst [smem:[#allocation123_spill]] %s5791_s1 }
   0x3   :  { %5967 = sst [smem:[#allocation124_spill]] %s5792_s2 }
   0x4   :  { %5968 = sst [smem:[#allocation125_spill]] %s5793_s3 }
   0x5   :  { %5969 = sst [smem:[#allocation126_spill]] %s5794_s4 }
   0x6   :  { %5970 = sst [smem:[#allocation127_spill]] %s5795_s5 }
   0x7   :  { %5971 = sst [smem:[#allocation128_spill]] %s5796_s6 }
   0x8   :  { %5972 = sst [smem:[#allocation129_spill]] %s5797_s7 }
   0x9   :  { %5973 = sst [smem:[#allocation130_spill]] %s5798_s8 }
   0xa   :  { %5974 = sst [smem:[#allocation131_spill]] %s5800_s10 }
   0xb   :  { %5975 = sst [smem:[#allocation132_spill]] %s5801_s11 }
   0xc   :  { %5976 = sst [smem:[#allocation133_spill]] %s5802_s12 }
   0xd   :  { %5977 = sst [smem:[#allocation134_spill]] %s5803_s13 }
   0xe   :  { %5978 = sst [smem:[#allocation135_spill]] %s5805_s15 }
   0xf   :  { %20 = vsyncpa [#allocation5], 0 }
  0x10   :  { %22 = vsyncpa [#allocation5 + $0x1], 0  ;;  %s3499_s18 = smov 0   ;;  %s3501_s19 = smov 0  }
  0x11   :  { %s3503_s20 = smov 0   ;;  %s3505_s21 = smov 0  }
  0x12 LB: > { %5979 = sst [smem:[#allocation7_spill]] %s3351_s18  ;;  %s3520_s22 = sadd.s32 4294967295, %s3363_s21   ;;  %s3363_s21 = sphi %s3505_s21, %s6405_s21   ;;  %s3359_s20 = sphi %s3503_s20, %s6408_s20   ;;  %s3355_s19 = sphi %s3501_s19, %s6407_s19   ;;  %s3351_s18 = sphi %s3499_s18, %s6406_s18  }
  0x13   : > { %5980 = sst [smem:[#allocation8_spill]] %s3355_s19  ;;  %s3151_s23 = sadd.s32 4294967294, %s3363_s21  }
  0x14   : > { %5981 = sst [smem:[#allocation9_spill]] %s3359_s20  ;;  %s3524_s24 = sadd.s32 1, %s3363_s21  }
  0x15   : > { %5982 = sst [smem:[#allocation10_spill]] %s3363_s21  ;;  %s355_s25 = sadd.s32 1, %s3359_s20 }
  0x16   : > { %5983 = sst [smem:[#allocation11_spill]] %s3520_s22  ;;  %s352_s26 = ssub.s32 %s3363_s21, %s3524_s24 }
  0x17   : > { %5984 = sst [smem:[#allocation12_spill]] %s3524_s24  ;;  %p365_p0 = scmp.ne.s32.totalorder %s3359_s20, %s3355_s19 }
  0x18   : > { %p353_p1 = scmp.eq.s32.totalorder %s352_s26, 0  ;;  %p366_p2 = scmp.eq.s32.totalorder %s3520_s22, 1 }
  0x19   : > { %p371_p3 = scmp.ne.s32.totalorder %s3355_s19, %s3351_s18  ;;  %p372_p4 = scmp.eq.s32.totalorder %s3151_s23, 1 }
  0x1a   : > { %s3535_s27 = scalar_select %p353_p1, %s3359_s20, %s355_s25  }
  0x1b   : > { %p3537_p5 = por %p366_p2, %p365_p0  ;;  %p3541_p6 = por %p372_p4, %p371_p3 }
  0x1c   : > { %5985 = sst [smem:[#allocation13_spill]] %s3535_s27  ;;  %p3154_p7 = scmp.ge.s32.totalorder %s3363_s21, 1 }
  0x1d   : > { %s5986_s28 = scalar_select %p3537_p5, 1, 0 }
  0x1e   : > { %s5988_s29 = scalar_select %p3541_p6, 1, 0 }
  0x1f   : > { %5987 = sst [smem:[#allocation14_spill]] %s5986_s28  ;;  %p440_p8 = scmp.lt.s32.totalorder %s3363_s21, 3 }
  0x20   : > { %5989 = sst [smem:[#allocation15_spill]] %s5988_s29 }
  0x21   : > { %p441_p9 = pnand %p3154_p7, %p440_p8 }
  0x23   : > { %444 = sbr.rel (%p441_p9) target bundleno = 1405 (0x57d), region = 80 }
  0x2a   : > { %p488_p10 = scmp.lt.s32.totalorder %s3520_s22, 1  ;;  %v5879_v0 = vmov 0   ;;  %s5990_s2 = sld [smem:[#allocation124_spill]]  ;;  %vm5896_vm0 = vcmask 523264   ;;  %vm834_vm1 = vcmask 416768   ;;  %v3366_v39 = vmov 0.0  }
  0x2b   : > { %561 = vmatprep.mubr.bf16.mxu0 %v5879_v0  ;;  %3277 = vset.pattern.permute.xlu0 %v5879_v0  ;;  %s5991_s3 = sld [smem:[#allocation125_spill]]  ;;  %s5992_s0 = sld [smem:[#allocation122_spill]]  ;;  %835 = vst.msk [vmem:[#allocation2] sm:$0xff] %vm834_vm1, %v3366_v39  ;;  %836 = vst.msk [vmem:[#allocation2 + $0x18] sm:$0xff] %vm834_vm1, %v3366_v39  ;;  %vm837_vm2 = vcmask 834968   ;;  %vm5895_vm3 = vcmask 130048  }
  0x2c   : > { %s489_s17 = scalar_select %p488_p10, %s3520_s22, 1  ;;  %3278 = vset.pattern.permute.xlu1 %v5879_v0  ;;  %647 = vmatprep.mubr.bf16.mxu1 %v5879_v0  ;;  %838 = vst.msk [vmem:[#allocation2 + $0x10] sm:$0xff] %vm837_vm2, %v3366_v39  ;;  %839 = vst.msk [vmem:[#allocation2 + $0x28] sm:$0xff] %vm837_vm2, %v3366_v39  ;;  %vm860_vm4 = vcmask 1047960   ;;  %vm756_vm5 = vcmask 1041408   ;;  %vm743_vm6 = vcmask 31744  }
  0x2d   : > { %s5994_s5 = sld [smem:[#allocation127_spill]]  ;;  %s5995_s6 = sld [smem:[#allocation128_spill]]  ;;  %vm919_vm7 = vcmask 1039360   ;;  %vm956_vm8 = vcmask 1031168   ;;  %vm993_vm9 = vcmask 1022976   ;;  %vm5900_vm10 = vcmask 1014784  }
  0x2e   : > { %s3183_s20 = sshll.u32 %s489_s17, 7  ;;  %s5996_s8 = sld [smem:[#allocation130_spill]]  ;;  %vm5899_vm11 = vcmask 1006592   ;;  %vm5901_vm12 = vcmask 998400   ;;  %vm1149_vm13 = vcmask 916480   ;;  %vm1225_vm15 = vcmask 900096  }
  0x2f   : > { %s5997_s1 = sld [smem:[#allocation123_spill]]  ;;  %s3367_s26 = smov 51   ;;  %vm1299_vm2 = vcmask 883712   ;;  %vm6092_vm14 = vcmask 908288  }
  0x30   : > { %v572_v1 = vld [vmem:[%s5990_s2] sm:$0xff]  ;;  %v573_v3 = vld [vmem:[%s5990_s2 + $0x8] sm:$0xff]  ;;  %s5998_s4 = sld [smem:[#allocation126_spill]]  ;;  %s5816_s23 = smov 127  }
  0x31   : > { %576 = vperm.xlu0 %3277, %v572_v1   ;;  %v588_v2 = vld [vmem:[%s5991_s3] sm:$0xff]  ;;  %v589_v4 = vld [vmem:[%s5991_s3 + $0x8] sm:$0xff]  ;;  %s3568_s18 = scalar_lea.vmem %s5992_s0, %s3183_s20  ;;  %s5822_s20 = smov 76  }
  0x32   : > { %592 = vperm.xlu1 %3278, %v588_v2   ;;  %5993 = sst [smem:[#allocation16_spill]] %s3568_s18  ;;  %v497_v6 = vld [vmem:[%s3568_s18 + $0x8] sm:$0xff]  ;;  %v499_v7 = vld [vmem:[%s3568_s18 + $0x18] sm:$0xff]  ;;  %v496_v8 = vld [vmem:[%s3568_s18] sm:$0xff]  ;;  %s5820_s24 = smov 126  }
  0x33   : > { %v656_v5 = vld [vmem:[%s5994_s5] sm:$0xf]  ;;  %v513_v10 = vpack.c.bf16 %v499_v7, %v497_v6  ;;  %v498_v11 = vld [vmem:[%s3568_s18 + $0x10] sm:$0xff]  ;;  %v501_v12 = vld [vmem:[%s3568_s18 + $0x28] sm:$0xff]  ;;  %s5818_s21 = smov 75   ;;  %s5824_s27 = smov 125  }
  0x34   : > { %v664_v9 = vld [vmem:[%s5995_s6] sm:$0xf]  ;;  %v503_v13 = vld [vmem:[%s3568_s18 + $0x38] sm:$0xff]  ;;  %v512_v14 = vpack.c.bf16 %v498_v11, %v496_v8  ;;  %v502_v17 = vld [vmem:[%s3568_s18 + $0x30] sm:$0xff]  ;;  %s5814_s29 = smov 74   ;;  %s5828_s17 = smov 124  }
  0x35   : > { %581 = vperm.xlu0 %3277, %v573_v3   ;;  %v515_v15 = vpack.c.bf16 %v503_v13, %v501_v12  ;;  %v500_v16 = vld [vmem:[%s3568_s18 + $0x20] sm:$0xff]  ;;  %v505_v18 = vld [vmem:[%s3568_s18 + $0x48] sm:$0xff]  ;;  %529 = vmatprep.subr.bf16.mxu0 %v513_v10  ;;  %v507_v19 = vld [vmem:[%s3568_s18 + $0x58] sm:$0xff]  ;;  %s5812_s25 = smov 64   ;;  %s5862_s30 = smov 122  }
  0x36   : > { %597 = vperm.xlu1 %3278, %v589_v4   ;;  %v683_v20 = vld [vmem:[%s5996_s8] sm:$0xff]  ;;  %530 = vmatpush1.bf16.msra.mxu0 %v512_v14  ;;  %v514_v21 = vpack.c.bf16 %v502_v17, %v500_v16  ;;  %v506_v23 = vld [vmem:[%s3568_s18 + $0x50] sm:$0xff]  ;;  %v509_v24 = vld [vmem:[%s3568_s18 + $0x68] sm:$0xff]  ;;  %v517_v26 = vpack.c.bf16 %v507_v19, %v505_v18  ;;  %s5860_s16 = smov 112   ;;  %s6013_s7 = sld [smem:[#allocation129_spill]] }
  0x37   : > { %v504_v22 = vld [vmem:[%s3568_s18 + $0x40] sm:$0xff]  ;;  %v684_v25 = vld [vmem:[%s5996_s8 + $0x8] sm:$0xff]  ;;  %531 = vmatprep.subr.bf16.mxu0 %v515_v15  ;;  %v511_v27 = vld [vmem:[%s3568_s18 + $0x78] sm:$0xff]  ;;  %s6021_s0 = smov 96   ;;  %s6025_s2 = smov 123  }
  0x38   : > { %v508_v28 = vld [vmem:[%s3568_s18 + $0x60] sm:$0xff]  ;;  %v510_v29 = vld [vmem:[%s3568_s18 + $0x70] sm:$0xff]  ;;  %v516_v31 = vpack.c.bf16 %v506_v23, %v504_v22  ;;  %v519_v32 = vpack.c.bf16 %v511_v27, %v509_v24  ;;  %v686_v33 = vld [vmem:[%s5996_s8 + $0x18] sm:$0xff]  ;;  %s6026_s3 = smov 95   ;;  %s6029_s5 = smov 112  }
  0x39   : > { %659 = vperm.xlu0 %3277, %v656_v5   ;;  %v685_v30 = vld [vmem:[%s5996_s8 + $0x10] sm:$0xff]  ;;  %v518_v34 = vpack.c.bf16 %v510_v29, %v508_v28  ;;  %v687_v35 = vld [vmem:[%s5996_s8 + $0x20] sm:$0xff]  ;;  %v688_v36 = vld [vmem:[%s5996_s8 + $0x28] sm:$0xff]  ;;  %s6030_s6 = smov 94   ;;  %s6037_s15 = smov 92  }
  0x3a   : > { %667 = vperm.xlu1 %3278, %v664_v9   ;;  %532 = vmatpush1.bf16.msra.mxu0 %v514_v21  ;;  %v3279_v37 = vld [vmem:[%s5997_s1] sm:$0xff]   ;;  %v689_v38 = vld [vmem:[%s5996_s8 + $0x30] sm:$0x1]  ;;  %s6023_s1 = smov 124   ;;  %s6035_s8 = smov 109  }
  0x3b   : > { %533 = vmatprep.subr.bf16.mxu0 %v517_v26  ;;  %v608_v62 = vld [vmem:[%s5998_s4] sm:$0x3]  ;;  %s6027_s4 = smov 122   ;;  %s6038_s28 = smov 107  }
  0x3c   : > { %v3282_v39 = vld [vmem:[%s6013_s7 + $0x10] sm:$0xff]   ;;  %s6040_s22 = smov 91   ;;  %s6042_s18 = smov 90  }
  0x3d   : > { %692 = vperm.xlu0 %3277, %v683_v20   ;;  %s6044_s19 = smov 80   ;;  %s6046_s11 = smov 79  }
  0x3e   : > { %697 = vperm.xlu1 %3278, %v684_v25   ;;  %534 = vmatpush1.bf16.msra.mxu0 %v516_v31  ;;  %v3280_v31 = vld [vmem:[%s6013_s7] sm:$0xff]   ;;  %s6048_s13 = smov 78   ;;  %s6052_s12 = smov 77  }
  0x3f   : > { %535 = vmatprep.subr.bf16.mxu0 %v519_v32  ;;  %s3396_s10 = smov 63  }
  0x41   : > { %702 = vperm.xlu0 %3277, %v685_v30  }
  0x42   : > { %707 = vperm.xlu1 %3278, %v686_v33   ;;  %536 = vmatpush1.bf16.msra.mxu0 %v518_v34  ;;  %v3281_v34 = vld [vmem:[%s6013_s7 + $0x8] sm:$0xff]  }
  0x45   : > { %712 = vperm.xlu0 %3277, %v687_v35   ;;  %3159 = vmatmul.mubr.msk.bf16.vlgmr.msra.gmra.mrb[0].mxu0 %vm5896_vm0, %v3279_v37  ;;  %vm1683_vm0 = vcmask 654336  }
  0x46   : > { %717 = vperm.xlu1 %3278, %v688_v36   ;;  %2842 = vmatprep.mubr.bf16.mxu0 %v5879_v0 }
  0x49   : > { %722 = vperm.xlu0 %3277, %v689_v38  }
  0xb0   : > { %v577_v40 = vpop.permute.xlu0 %576 }
  0xb1   : > { %v593_v41 = vpop.permute.xlu1 %592 }
  0xb4   : > { %v582_v45 = vpop.permute.xlu0 %581 }
  0xb5   : > { %v598_v51 = vpop.permute.xlu1 %597 }
  0xb8   : > { %v3625_v63 = vpop.permute.xlu0 %659 }
  0xb9   : > { %v3627_v1 = vpop.permute.xlu1 %667 }
  0xbc   : > { %v3629_v2 = vpop.permute.xlu0 %692 }
  0xbd   : > { %v3631_v3 = vpop.permute.xlu1 %697 }
  0xbe   : > { %5999 = vst [vmem:[#allocation17_spill] sm:$0xff] %v3631_v3 }
  0xc0   : > { %v3633_v4 = vpop.permute.xlu0 %702 }
  0xc1   : > { %6000 = vst [vmem:[#allocation18_spill] sm:$0xff] %v3633_v4  ;;  %v3635_v5 = vpop.permute.xlu1 %707 }
  0xc2   : > { %6001 = vst [vmem:[#allocation19_spill] sm:$0xff] %v3635_v5 }
  0xc4   : > { %v3637_v6 = vpop.permute.xlu0 %712 }
  0xc5   : > { %6002 = vst [vmem:[#allocation20_spill] sm:$0xff] %v3637_v6  ;;  %v3639_v7 = vpop.permute.xlu1 %717 }
  0xc6   : > { %6003 = vst [vmem:[#allocation21_spill] sm:$0xff] %v3639_v7 }
  0xc8   : > { %v3641_v8 = vpop.permute.xlu0 %722 }
  0xc9   : > { %6004 = vst [vmem:[#allocation22_spill] sm:$0xff] %v3641_v8 }
 0x118   : > { %v563_v42 = vpop.f32.mrb[0].mxu0 }
 0x119   : > { %v584_v43 = vmul.f32 %v577_v40, %v563_v42  ;;  %v565_v44 = vpop.f32.mrb[1].mxu0 }
 0x11a   : > { %v585_v46 = vmul.f32 %v577_v40, %v565_v44  ;;  %v567_v47 = vpop.f32.mrb[2].mxu0  ;;  %v3283_v44 = vld [vmem:[%s6013_s7 + $0x18] ss:$0 sps:$4 sm:$0x11]   ;;  %s6034_s7 = smov 93  }
 0x11b   : > { %v600_v48 = vadd.f32 %v593_v41, %v584_v43  ;;  %v586_v49 = vmul.f32 %v582_v45, %v567_v47  ;;  %v569_v50 = vpop.f32.mrb[3].mxu0 }
 0x11c   : > { %v601_v52 = vadd.f32 %v593_v41, %v585_v46  ;;  %v587_v53 = vmul.f32 %v582_v45, %v569_v50 }
 0x11d   : > { %v604_v54 = vmax.f32 %v600_v48, 0.0  ;;  %v602_v55 = vadd.f32 %v598_v51, %v586_v49 }
 0x11e   : > { %v605_v56 = vmax.f32 %v601_v52, 0.0  ;;  %v603_v57 = vadd.f32 %v598_v51, %v587_v53 }
 0x11f   : > { %v606_v58 = vmax.f32 %v602_v55, 0.0  ;;  %844 = vrot.lane.b32.xlu1 %v604_v54, %s3367_s26 }
 0x120   : > { %v607_v59 = vmax.f32 %v603_v57, 0.0  ;;  %846 = vrot.lane.b32.xlu0 %v605_v56, %s3367_s26 }
 0x121   : > { %v609_v60 = vpack.c.bf16 %v606_v58, %v604_v54 }
 0x122   : > { %v610_v61 = vpack.c.bf16 %v607_v59, %v605_v56 }
 0x123   : > { %848 = vrot.lane.b32.xlu1 %v606_v58, %s3367_s26 }
 0x124   : > { %850 = vrot.lane.b32.xlu0 %v607_v59, %s3367_s26  ;;  %615 = vmatprep.subr.bf16.mxu1 %v610_v61  ;;  %s5832_s26 = smov 123  }
 0x125   : > { %616 = vmatpush1.bf16.msra.mxu1 %v609_v60 }
 0x128   : > { %3160 = vmatmul.mubr.msk.bf16.vlgmr.msra.gmra.mrb[0].mxu1 %vm5895_vm3, %v608_v62  ;;  %vm5902_vm3 = vcmask 777216  }
 0x129   : > { %795 = vmatprep.mubr.bf16.mxu1 %v5879_v0 }
 0x191   : > { %v845_v9 = vpop.permute.xlu1 %844 }
 0x192   : > { %861 = vst.msk [vmem:[#allocation2] sm:$0xff] %vm860_vm4, %v845_v9  ;;  %v847_v10 = vpop.permute.xlu0 %846 }
 0x193   : > { %v3644_v11 = vsel %vm834_vm1, %v845_v9, %v847_v10  ;;  %863 = vst.msk [vmem:[#allocation2 + $0x10] sm:$0xff] %vm834_vm1, %v847_v10 }
 0x194   : > { %6005 = vst [vmem:[#allocation23_spill] sm:$0xff] %v3644_v11  ;;  %862 = vst [vmem:[#allocation2 + $0x8] sm:$0xff] %v3644_v11 }
 0x195   : > { %v849_v12 = vpop.permute.xlu1 %848 }
 0x196   : > { %864 = vst.msk [vmem:[#allocation2 + $0x18] sm:$0xff] %vm860_vm4, %v849_v12  ;;  %v851_v13 = vpop.permute.xlu0 %850  ;;  %vm1336_vm4 = vcmask 875520  }
 0x197   : > { %v3649_v14 = vsel %vm834_vm1, %v849_v12, %v851_v13  ;;  %866 = vst.msk [vmem:[#allocation2 + $0x28] sm:$0xff] %vm834_vm1, %v851_v13  ;;  %vm1262_vm1 = vcmask 891904  }
 0x198   : > { %865 = vst [vmem:[#allocation2 + $0x20] sm:$0xff] %v3649_v14 }
 0x199   : > { %v3653_v15 = vld [vmem:[#allocation2] sm:$0xff] }
 0x19a   : > { %6006 = vst [vmem:[#allocation24_spill] sm:$0xff] %v3653_v15  ;;  %v3655_v16 = vld [vmem:[#allocation2 + $0x10] sm:$0xff]  ;;  %907 = vrot.lane.b32.xlu1 %v3653_v15, %s5816_s23 }
 0x19b   : > { %6007 = vst [vmem:[#allocation25_spill] sm:$0xff] %v3655_v16  ;;  %1825 = vrot.lane.b32.xlu0 %v3655_v16, %s5822_s20  ;;  %s5830_s20 = smov 106  }
 0x19d   : > { %v3677_v17 = vld [vmem:[#allocation2 + $0x18] sm:$0xff] }
 0x19e   : > { %944 = vrot.lane.b32.xlu1 %v3653_v15, %s5820_s24  ;;  %6008 = vst [vmem:[#allocation26_spill] sm:$0xff] %v3677_v17 }
 0x19f   : > { %1862 = vrot.lane.b32.xlu0 %v3655_v16, %s5818_s21  ;;  %s5826_s21 = smov 108  }
 0x1a2   : > { %981 = vrot.lane.b32.xlu1 %v3653_v15, %s5824_s27 }
 0x1a3   : > { %1899 = vrot.lane.b32.xlu0 %v3655_v16, %s5814_s29  ;;  %s5856_s29 = smov 110  }
 0x1a6   : > { %1018 = vrot.lane.b32.xlu1 %v3653_v15, %s5828_s17 }
 0x1a7   : > { %1942 = vrot.lane.b32.xlu0 %v3655_v16, %s5812_s25  ;;  %s5858_s25 = smov 111  }
 0x1aa   : > { %1055 = vrot.lane.b32.xlu1 %v3653_v15, %s5832_s26 }
 0x1ab   : > { %909 = vrot.lane.b32.xlu0 %v3644_v11, %s5816_s23 }
 0x1ae   : > { %1092 = vrot.lane.b32.xlu1 %v3653_v15, %s5862_s30 }
 0x1af   : > { %913 = vrot.lane.b32.xlu0 %v3677_v17, %s5816_s23  ;;  %s5854_s23 = smov 109  }
 0x1b2   : > { %1137 = vrot.lane.b32.xlu1 %v3653_v15, %s5860_s16 }
 0x1b3   : > { %946 = vrot.lane.b32.xlu0 %v3644_v11, %s5820_s24 }
 0x1b6   : > { %1176 = vrot.lane.b32.xlu1 %v3653_v15, %s5858_s25 }
 0x1b7   : > { %950 = vrot.lane.b32.xlu0 %v3677_v17, %s5820_s24  ;;  %s5866_s24 = smov 107  }
 0x1ba   : > { %1213 = vrot.lane.b32.xlu1 %v3653_v15, %s5856_s29 }
 0x1bb   : > { %983 = vrot.lane.b32.xlu0 %v3644_v11, %s5824_s27 }
 0x1be   : > { %1250 = vrot.lane.b32.xlu1 %v3653_v15, %s5854_s23 }
 0x1bf   : > { %987 = vrot.lane.b32.xlu0 %v3677_v17, %s5824_s27  ;;  %s5864_s27 = smov 96  }
 0x1c2   : > { %1287 = vrot.lane.b32.xlu1 %v3653_v15, %s5826_s21  ;;  %s5834_s21 = smov 95  }
 0x1c3   : > { %1020 = vrot.lane.b32.xlu0 %v3644_v11, %s5828_s17 }
 0x1c6   : > { %1324 = vrot.lane.b32.xlu1 %v3653_v15, %s5866_s24 }
 0x1c7   : > { %1024 = vrot.lane.b32.xlu0 %v3677_v17, %s5828_s17  ;;  %s5836_s17 = smov 94  }
 0x1ca   : > { %1361 = vrot.lane.b32.xlu1 %v3653_v15, %s5830_s20  ;;  %s5838_s20 = smov 93  }
 0x1cb   : > { %1057 = vrot.lane.b32.xlu0 %v3644_v11, %s5832_s26 }
 0x1ce   : > { %1404 = vrot.lane.b32.xlu1 %v3653_v15, %s5864_s27  ;;  %s6018_s27 = smov 126  }
 0x1cf   : > { %1061 = vrot.lane.b32.xlu0 %v3677_v17, %s5832_s26  ;;  %s5840_s26 = smov 92  }
 0x1d2   : > { %1441 = vrot.lane.b32.xlu1 %v3653_v15, %s5834_s21  ;;  %s5842_s21 = smov 91  }
 0x1d3   : > { %1094 = vrot.lane.b32.xlu0 %v3644_v11, %s5862_s30 }
 0x1d6   : > { %1480 = vrot.lane.b32.xlu1 %v3653_v15, %s5836_s17  ;;  %s5844_s17 = smov 90  }
 0x1d7   : > { %1098 = vrot.lane.b32.xlu0 %v3677_v17, %s5862_s30  ;;  %s6016_s30 = smov 106  }
 0x1da   : > { %1517 = vrot.lane.b32.xlu1 %v3653_v15, %s5838_s20  ;;  %s5846_s20 = smov 80  }
 0x1db   : > { %1139 = vrot.lane.b32.xlu0 %v3644_v11, %s5860_s16 }
 0x1de   : > { %1554 = vrot.lane.b32.xlu1 %v3653_v15, %s5840_s26  ;;  %s5848_s26 = smov 79  }
 0x1df   : > { %1143 = vrot.lane.b32.xlu0 %v3677_v17, %s5860_s16  ;;  %s6015_s16 = smov 127  }
 0x1e2   : > { %1591 = vrot.lane.b32.xlu1 %v3653_v15, %s5842_s21  ;;  %s5850_s21 = smov 78  }
 0x1e3   : > { %1178 = vrot.lane.b32.xlu0 %v3644_v11, %s5858_s25 }
 0x1e6   : > { %1628 = vrot.lane.b32.xlu1 %v3653_v15, %s5844_s17  ;;  %s5852_s17 = smov 77  }
 0x1e7   : > { %1182 = vrot.lane.b32.xlu0 %v3677_v17, %s5858_s25  ;;  %s6014_s25 = smov 64  }
 0x1ea   : > { %1671 = vrot.lane.b32.xlu1 %v3653_v15, %s5846_s20  ;;  %s6009_s20 = smov 76  }
 0x1eb   : > { %1215 = vrot.lane.b32.xlu0 %v3644_v11, %s5856_s29 }
 0x1ee   : > { %1708 = vrot.lane.b32.xlu1 %v3653_v15, %s5848_s26  ;;  %s6010_s26 = smov 108  }
 0x1ef   : > { %1219 = vrot.lane.b32.xlu0 %v3677_v17, %s5856_s29  ;;  %s6033_s29 = smov 110  }
 0x1f2   : > { %1745 = vrot.lane.b32.xlu1 %v3653_v15, %s5850_s21  ;;  %s6011_s21 = smov 75  }
 0x1f3   : > { %1252 = vrot.lane.b32.xlu0 %v3644_v11, %s5854_s23 }
 0x1f6   : > { %1784 = vrot.lane.b32.xlu1 %v3653_v15, %s5852_s17  ;;  %s6012_s17 = smov 74  }
 0x1f7   : > { %1256 = vrot.lane.b32.xlu0 %v3677_v17, %s5854_s23  ;;  %s6031_s23 = smov 111  }
 0x1fa   : > { %1821 = vrot.lane.b32.xlu1 %v3653_v15, %s6009_s20 }
 0x1fb   : > { %1289 = vrot.lane.b32.xlu0 %v3644_v11, %s6010_s26  ;;  %v649_v18 = vpop.f32.mrb[0].mxu1 }
 0x1fc   : > { %v662_v19 = vmul.f32 %v3625_v63, %v649_v18  ;;  %v651_v20 = vpop.f32.mrb[1].mxu1 }
 0x1fd   : > { %v663_v21 = vmul.f32 %v3625_v63, %v651_v20  ;;  %v653_v22 = vpop.f32.mrb[2].mxu1 }
 0x1fe   : > { %v670_v23 = vadd.f32 %v3627_v1, %v662_v19  ;;  %1858 = vrot.lane.b32.xlu1 %v3653_v15, %s6011_s21  ;;  %v654_v24 = vpop.f32.mrb[3].mxu1 }
 0x1ff   : > { %v671_v25 = vadd.f32 %v3627_v1, %v663_v21  ;;  %1293 = vrot.lane.b32.xlu0 %v3677_v17, %s6010_s26 }
 0x200   : > { %v672_v26 = vmax.f32 %v670_v23, 0.0 }
 0x201   : > { %v673_v27 = vmax.f32 %v671_v25, 0.0 }
 0x202   : > { %v681_v28 = vpack.c.bf16 %v672_v26, %v672_v26  ;;  %1895 = vrot.lane.b32.xlu1 %v3653_v15, %s6012_s17 }
 0x203   : > { %v682_v29 = vpack.c.bf16 %v673_v27, %v673_v27  ;;  %1326 = vrot.lane.b32.xlu0 %v3644_v11, %s5866_s24 }
 0x204   : > { %v758_v30 = vsel %vm756_vm5, %v681_v28, 0 }
 0x205   : > { %3165 = vmatprep.subr.msk.bf16.mxu1 %vm756_vm5, %v682_v29  ;;  %vm1373_vm5 = vcmask 867328  }
 0x206   : > { %1938 = vrot.lane.b32.xlu1 %v3653_v15, %s6014_s25  ;;  %764 = vmatpush1.bf16.msra.mxu1 %v758_v30 }
 0x207   : > { %1330 = vrot.lane.b32.xlu0 %v3677_v17, %s5866_s24  ;;  %s6020_s24 = smov 125  }
 0x209   : > { %3166 = vmatmul.mubr.msk.bf16.vlgmr.msra.gmra.mrb[4].mxu1 %vm743_vm6, %v3280_v31 }
 0x20a   : > { %911 = vrot.lane.b32.xlu1 %v3655_v16, %s6015_s16  ;;  %805 = vmatprep.mubr.bf16.mxu1 %v5879_v0 }
 0x20b   : > { %1363 = vrot.lane.b32.xlu0 %v3644_v11, %s6016_s30 }
 0x20c   : > { %v3784_v32 = vpop.permute.xlu1 %907 }
 0x20d   : > { %v3786_v33 = vpop.permute.xlu0 %1825 }
 0x20e   : > { %6017 = vst [vmem:[#allocation27_spill] sm:$0xff] %v3786_v33  ;;  %948 = vrot.lane.b32.xlu1 %v3655_v16, %s6018_s27 }
 0x20f   : > { %1367 = vrot.lane.b32.xlu0 %v3677_v17, %s6016_s30 }
 0x210   : > { %v3795_v35 = vpop.permute.xlu1 %944 }
 0x211   : > { %v3797_v36 = vpop.permute.xlu0 %1862  ;;  %3167 = vmatmul.mubr.msk.bf16.gmra.mrb[8].mxu1 %vm743_vm6, %v3281_v34 }
 0x212   : > { %6019 = vst [vmem:[#allocation28_spill] sm:$0xff] %v3797_v36  ;;  %985 = vrot.lane.b32.xlu1 %v3655_v16, %s6020_s24  ;;  %815 = vmatprep.mubr.bf16.mxu1 %v5879_v0 }
 0x213   : > { %1406 = vrot.lane.b32.xlu0 %v3644_v11, %s6021_s0 }
 0x214   : > { %v3805_v37 = vpop.permute.xlu1 %981 }
 0x215   : > { %v3807_v38 = vpop.permute.xlu0 %1899 }
 0x216   : > { %6022 = vst [vmem:[#allocation29_spill] sm:$0xff] %v3807_v38  ;;  %1022 = vrot.lane.b32.xlu1 %v3655_v16, %s6023_s1 }
 0x217   : > { %1410 = vrot.lane.b32.xlu0 %v3677_v17, %s6021_s0 }
 0x218   : > { %v3816_v40 = vpop.permute.xlu1 %1018 }
 0x219   : > { %v3818_v41 = vpop.permute.xlu0 %1942  ;;  %3168 = vmatmul.mubr.msk.bf16.gmra.mrb[12].mxu1 %vm743_vm6, %v3282_v39 }
 0x21a   : > { %6024 = vst [vmem:[#allocation30_spill] sm:$0xff] %v3818_v41  ;;  %1059 = vrot.lane.b32.xlu1 %v3655_v16, %s6025_s2  ;;  %825 = vmatprep.mubr.bf16.mxu1 %v5879_v0 }
 0x21b   : > { %1443 = vrot.lane.b32.xlu0 %v3644_v11, %s6026_s3 }
 0x21c   : > { %v3826_v42 = vpop.permute.xlu1 %1055 }
 0x21d   : > { %v3828_v43 = vpop.permute.xlu0 %909 }
 0x21e   : > { %1096 = vrot.lane.b32.xlu1 %v3655_v16, %s6027_s4 }
 0x21f   : > { %1447 = vrot.lane.b32.xlu0 %v3677_v17, %s6026_s3 }
 0x220   : > { %v3837_v45 = vpop.permute.xlu1 %1092 }
 0x221   : > { %v3839_v46 = vpop.permute.xlu0 %913  ;;  %3169 = vmatmul.mubr.msk.bf16.gmra.mrb[16].mxu1 %vm743_vm6, %v3283_v44  ;;  %vm1416_vm6 = vcmask 785408  }
 0x222   : > { %6028 = vst [vmem:[#allocation31_spill] sm:$0xff] %v3839_v46  ;;  %1141 = vrot.lane.b32.xlu1 %v3655_v16, %s6029_s5 }
 0x223   : > { %1482 = vrot.lane.b32.xlu0 %v3644_v11, %s6030_s6 }
 0x224   : > { %v3846_v47 = vpop.permute.xlu1 %1137 }
 0x225   : > { %v3848_v48 = vpop.permute.xlu0 %946 }
 0x226   : > { %1180 = vrot.lane.b32.xlu1 %v3655_v16, %s6031_s23 }
 0x227   : > { %1486 = vrot.lane.b32.xlu0 %v3677_v17, %s6030_s6 }
 0x228   : > { %v3854_v49 = vpop.permute.xlu1 %1176 }
 0x229   : > { %v3856_v50 = vpop.permute.xlu0 %950 }
 0x22a   : > { %6032 = vst [vmem:[#allocation32_spill] sm:$0xff] %v3856_v50  ;;  %1217 = vrot.lane.b32.xlu1 %v3655_v16, %s6033_s29 }
 0x22b   : > { %1519 = vrot.lane.b32.xlu0 %v3644_v11, %s6034_s7 }
 0x22c   : > { %v3862_v51 = vpop.permute.xlu1 %1213 }
 0x22d   : > { %v3864_v52 = vpop.permute.xlu0 %983 }
 0x22e   : > { %1254 = vrot.lane.b32.xlu1 %v3655_v16, %s6035_s8 }
 0x22f   : > { %1523 = vrot.lane.b32.xlu0 %v3677_v17, %s6034_s7 }
 0x230   : > { %v3870_v53 = vpop.permute.xlu1 %1250 }
 0x231   : > { %v3872_v54 = vpop.permute.xlu0 %987 }
 0x232   : > { %6036 = vst [vmem:[#allocation33_spill] sm:$0xff] %v3872_v54  ;;  %1291 = vrot.lane.b32.xlu1 %v3655_v16, %s6010_s26 }
 0x233   : > { %1556 = vrot.lane.b32.xlu0 %v3644_v11, %s6037_s15 }
 0x234   : > { %v3878_v55 = vpop.permute.xlu1 %1287 }
 0x235   : > { %v3880_v56 = vpop.permute.xlu0 %1020 }
 0x236   : > { %1328 = vrot.lane.b32.xlu1 %v3655_v16, %s6038_s28 }
 0x237   : > { %1560 = vrot.lane.b32.xlu0 %v3677_v17, %s6037_s15 }
 0x238   : > { %v3886_v57 = vpop.permute.xlu1 %1324 }
 0x239   : > { %v3888_v58 = vpop.permute.xlu0 %1024 }
 0x23a   : > { %6039 = vst [vmem:[#allocation34_spill] sm:$0xff] %v3888_v58  ;;  %1365 = vrot.lane.b32.xlu1 %v3655_v16, %s6016_s30 }
 0x23b   : > { %1593 = vrot.lane.b32.xlu0 %v3644_v11, %s6040_s22 }
 0x23c   : > { %v3894_v59 = vpop.permute.xlu1 %1361 }
 0x23d   : > { %v3896_v60 = vpop.permute.xlu0 %1057 }
 0x23e   : > { %1408 = vrot.lane.b32.xlu1 %v3655_v16, %s6021_s0 }
 0x23f   : > { %1597 = vrot.lane.b32.xlu0 %v3677_v17, %s6040_s22 }
 0x240   : > { %v3902_v61 = vpop.permute.xlu1 %1404 }
 0x241   : > { %v3904_v62 = vpop.permute.xlu0 %1061 }
 0x242   : > { %6041 = vst [vmem:[#allocation35_spill] sm:$0xff] %v3904_v62  ;;  %1445 = vrot.lane.b32.xlu1 %v3655_v16, %s6026_s3 }
 0x243   : > { %1630 = vrot.lane.b32.xlu0 %v3644_v11, %s6042_s18 }
 0x244   : > { %v3910_v63 = vpop.permute.xlu1 %1441 }
 0x245   : > { %v3912_v1 = vpop.permute.xlu0 %1094 }
 0x246   : > { %1484 = vrot.lane.b32.xlu1 %v3655_v16, %s6030_s6 }
 0x247   : > { %1634 = vrot.lane.b32.xlu0 %v3677_v17, %s6042_s18 }
 0x248   : > { %v3918_v9 = vpop.permute.xlu1 %1480 }
 0x249   : > { %v3920_v10 = vpop.permute.xlu0 %1098 }
 0x24a   : > { %6043 = vst [vmem:[#allocation36_spill] sm:$0xff] %v3920_v10  ;;  %1521 = vrot.lane.b32.xlu1 %v3655_v16, %s6034_s7 }
 0x24b   : > { %1673 = vrot.lane.b32.xlu0 %v3644_v11, %s6044_s19 }
 0x24c   : > { %v3926_v12 = vpop.permute.xlu1 %1517 }
 0x24d   : > { %v3928_v13 = vpop.permute.xlu0 %1139 }
 0x24e   : > { %1558 = vrot.lane.b32.xlu1 %v3655_v16, %s6037_s15 }
 0x24f   : > { %1677 = vrot.lane.b32.xlu0 %v3677_v17, %s6044_s19 }
 0x250   : > { %v3934_v18 = vpop.permute.xlu1 %1554 }
 0x251   : > { %v3936_v19 = vpop.permute.xlu0 %1143 }
 0x252   : > { %6045 = vst [vmem:[#allocation37_spill] sm:$0xff] %v3936_v19  ;;  %1595 = vrot.lane.b32.xlu1 %v3655_v16, %s6040_s22 }
 0x253   : > { %1710 = vrot.lane.b32.xlu0 %v3644_v11, %s6046_s11 }
 0x254   : > { %v3942_v20 = vpop.permute.xlu1 %1591 }
 0x255   : > { %v3944_v21 = vpop.permute.xlu0 %1178 }
 0x256   : > { %1632 = vrot.lane.b32.xlu1 %v3655_v16, %s6042_s18 }
 0x257   : > { %1714 = vrot.lane.b32.xlu0 %v3677_v17, %s6046_s11 }
 0x258   : > { %v3950_v22 = vpop.permute.xlu1 %1628 }
 0x259   : > { %v3952_v23 = vpop.permute.xlu0 %1182 }
 0x25a   : > { %6047 = vst [vmem:[#allocation38_spill] sm:$0xff] %v3952_v23  ;;  %1675 = vrot.lane.b32.xlu1 %v3655_v16, %s6044_s19 }
 0x25b   : > { %1747 = vrot.lane.b32.xlu0 %v3644_v11, %s6048_s13 }
 0x25c   : > { %v3958_v24 = vpop.permute.xlu1 %1671 }
 0x25d   : > { %6049 = vst [vmem:[#allocation39_spill] sm:$0xff] %v3958_v24  ;;  %v3960_v25 = vpop.permute.xlu0 %1215 }
 0x25e   : > { %1712 = vrot.lane.b32.xlu1 %v3655_v16, %s6046_s11 }
 0x25f   : > { %1751 = vrot.lane.b32.xlu0 %v3677_v17, %s6048_s13 }
 0x260   : > { %v3966_v26 = vpop.permute.xlu1 %1708 }
 0x261   : > { %6050 = vst [vmem:[#allocation40_spill] sm:$0xff] %v3966_v26  ;;  %v3968_v27 = vpop.permute.xlu0 %1219 }
 0x262   : > { %6051 = vst [vmem:[#allocation41_spill] sm:$0xff] %v3968_v27  ;;  %1749 = vrot.lane.b32.xlu1 %v3655_v16, %s6048_s13 }
 0x263   : > { %1786 = vrot.lane.b32.xlu0 %v3644_v11, %s6052_s12 }
 0x264   : > { %v3974_v28 = vpop.permute.xlu1 %1745 }
 0x265   : > { %6053 = vst [vmem:[#allocation42_spill] sm:$0xff] %v3974_v28  ;;  %v3976_v29 = vpop.permute.xlu0 %1252 }
 0x266   : > { %1788 = vrot.lane.b32.xlu1 %v3655_v16, %s6052_s12 }
 0x267   : > { %1790 = vrot.lane.b32.xlu0 %v3677_v17, %s6052_s12 }
 0x268   : > { %v3982_v30 = vpop.permute.xlu1 %1784 }
 0x269   : > { %6054 = vst [vmem:[#allocation43_spill] sm:$0xff] %v3982_v30  ;;  %v3984_v31 = vpop.permute.xlu0 %1256 }
 0x26a   : > { %6055 = vst [vmem:[#allocation44_spill] sm:$0xff] %v3984_v31  ;;  %1823 = vrot.lane.b32.xlu1 %v3644_v11, %s6009_s20 }
 0x26b   : > { %1827 = vrot.lane.b32.xlu0 %v3677_v17, %s6009_s20 }
 0x26c   : > { %v3990_v34 = vpop.permute.xlu1 %1821 }
 0x26d   : > { %6056 = vst [vmem:[#allocation45_spill] sm:$0xff] %v3990_v34  ;;  %v3992_v39 = vpop.permute.xlu0 %1289 }
 0x26e   : > { %1860 = vrot.lane.b32.xlu1 %v3644_v11, %s6011_s21 }
 0x26f   : > { %1864 = vrot.lane.b32.xlu0 %v3677_v17, %s6011_s21 }
 0x270   : > { %v3998_v44 = vpop.permute.xlu1 %1858 }
 0x271   : > { %6057 = vst [vmem:[#allocation46_spill] sm:$0xff] %v3998_v44  ;;  %v4000_v0 = vpop.permute.xlu0 %1293 }
 0x272   : > { %6058 = vst [vmem:[#allocation47_spill] sm:$0xff] %v4000_v0  ;;  %1897 = vrot.lane.b32.xlu1 %v3644_v11, %s6012_s17  ;;  %v4018_v0 = vld [vmem:[#allocation2 + $0x28] sm:$0xff] }
 0x273   : > { %1901 = vrot.lane.b32.xlu0 %v3677_v17, %s6012_s17 }
 0x274   : > { %v4006_v8 = vpop.permute.xlu1 %1895 }
 0x275   : > { %6059 = vst [vmem:[#allocation48_spill] sm:$0xff] %v4006_v8  ;;  %v4008_v7 = vpop.permute.xlu0 %1326 }
 0x276   : > { %1940 = vrot.lane.b32.xlu1 %v3644_v11, %s6014_s25 }
 0x277   : > { %1944 = vrot.lane.b32.xlu0 %v3677_v17, %s6014_s25 }
 0x278   : > { %v4014_v6 = vpop.permute.xlu1 %1938 }
 0x279   : > { %6060 = vst [vmem:[#allocation49_spill] sm:$0xff] %v4014_v6  ;;  %v4016_v31 = vpop.permute.xlu0 %1330 }
 0x27a   : > { %6061 = vst [vmem:[#allocation50_spill] sm:$0xff] %v4016_v31  ;;  %1976 = vrot.lane.b32.xlu1 %v3644_v11, %s3396_s10 }
 0x27b   : > { %917 = vrot.lane.b32.xlu0 %v4018_v0, %s6015_s16 }
 0x27c   : > { %v4024_v27 = vpop.permute.xlu1 %911 }
 0x27d   : > { %v4026_v23 = vpop.permute.xlu0 %1363 }
 0x27e   : > { %915 = vrot.lane.b32.xlu1 %v3649_v14, %s6015_s16  ;;  %s6387_s16 = sld [smem:[#allocation134_spill]] }
 0x27f   : > { %954 = vrot.lane.b32.xlu0 %v4018_v0, %s6018_s27 }
 0x280   : > { %v4032_v31 = vpop.permute.xlu1 %948 }
 0x281   : > { %v4034_v19 = vpop.permute.xlu0 %1367 }
 0x282   : > { %6062 = vst [vmem:[#allocation51_spill] sm:$0xff] %v4034_v19  ;;  %952 = vrot.lane.b32.xlu1 %v3649_v14, %s6018_s27 }
 0x283   : > { %991 = vrot.lane.b32.xlu0 %v4018_v0, %s6020_s24 }
 0x284   : > { %v4040_v10 = vpop.permute.xlu1 %985 }
 0x285   : > { %v4042_v62 = vpop.permute.xlu0 %1406 }
 0x286   : > { %989 = vrot.lane.b32.xlu1 %v3649_v14, %s6020_s24  ;;  %s6395_s24 = sld [smem:[#allocation8_spill]] }
 0x287   : > { %1028 = vrot.lane.b32.xlu0 %v4018_v0, %s6023_s1 }
 0x288   : > { %v4048_v58 = vpop.permute.xlu1 %1022 }
 0x289   : > { %v4050_v54 = vpop.permute.xlu0 %1410 }
 0x28a   : > { %6063 = vst [vmem:[#allocation52_spill] sm:$0xff] %v4050_v54  ;;  %1026 = vrot.lane.b32.xlu1 %v3649_v14, %s6023_s1  ;;  %s3415_s1 = smov 26  }
 0x28b   : > { %1065 = vrot.lane.b32.xlu0 %v4018_v0, %s6025_s2 }
 0x28c   : > { %v4056_v19 = vpop.permute.xlu1 %1059 }
 0x28d   : > { %v4058_v50 = vpop.permute.xlu0 %1443 }
 0x28e   : > { %1063 = vrot.lane.b32.xlu1 %v3649_v14, %s6025_s2 }
 0x28f   : > { %1102 = vrot.lane.b32.xlu0 %v4018_v0, %s6027_s4 }
 0x290   : > { %v4064_v46 = vpop.permute.xlu1 %1096 }
 0x291   : > { %v4066_v41 = vpop.permute.xlu0 %1447 }
 0x292   : > { %6064 = vst [vmem:[#allocation53_spill] sm:$0xff] %v4066_v41  ;;  %1100 = vrot.lane.b32.xlu1 %v3649_v14, %s6027_s4  ;;  %s3397_s4 = smov 62  }
 0x293   : > { %1147 = vrot.lane.b32.xlu0 %v4018_v0, %s6029_s5 }
 0x294   : > { %v4072_v54 = vpop.permute.xlu1 %1141 }
 0x295   : > { %v4074_v6 = vpop.permute.xlu0 %1482 }
 0x296   : > { %1145 = vrot.lane.b32.xlu1 %v3649_v14, %s6029_s5  ;;  %s3398_s5 = smov 61  }
 0x297   : > { %1186 = vrot.lane.b32.xlu0 %v4018_v0, %s6031_s23 }
 0x298   : > { %v4080_v5 = vpop.permute.xlu1 %1180 }
 0x299   : > { %v4082_v38 = vpop.permute.xlu0 %1486 }
 0x29a   : > { %6065 = vst [vmem:[#allocation54_spill] sm:$0xff] %v4082_v38  ;;  %1184 = vrot.lane.b32.xlu1 %v3649_v14, %s6031_s23 }
 0x29b   : > { %1223 = vrot.lane.b32.xlu0 %v4018_v0, %s6033_s29 }
 0x29c   : > { %v4088_v41 = vpop.permute.xlu1 %1217 }
 0x29d   : > { %v4090_v8 = vpop.permute.xlu0 %1519 }
 0x29e   : > { %1221 = vrot.lane.b32.xlu1 %v3649_v14, %s6033_s29 }
 0x29f   : > { %1260 = vrot.lane.b32.xlu0 %v4018_v0, %s6035_s8 }
 0x2a0   : > { %v4096_v36 = vpop.permute.xlu1 %1254 }
 0x2a1   : > { %v4098_v44 = vpop.permute.xlu0 %1523 }
 0x2a2   : > { %6066 = vst [vmem:[#allocation55_spill] sm:$0xff] %v4098_v44  ;;  %1258 = vrot.lane.b32.xlu1 %v3649_v14, %s6035_s8  ;;  %s3401_s8 = smov 58  }
 0x2a3   : > { %1297 = vrot.lane.b32.xlu0 %v4018_v0, %s6010_s26 }
 0x2a4   : > { %v4104_v38 = vpop.permute.xlu1 %1291 }
 0x2a5   : > { %v4106_v4 = vpop.permute.xlu0 %1556 }
 0x2a6   : > { %1295 = vrot.lane.b32.xlu1 %v3649_v14, %s6010_s26  ;;  %s3413_s26 = smov 28  }
 0x2a7   : > { %1334 = vrot.lane.b32.xlu0 %v4018_v0, %s6038_s28 }
 0x2a8   : > { %v4112_v33 = vpop.permute.xlu1 %1328 }
 0x2a9   : > { %v4114_v34 = vpop.permute.xlu0 %1560 }
 0x2aa   : > { %6067 = vst [vmem:[#allocation56_spill] sm:$0xff] %v4114_v34  ;;  %1332 = vrot.lane.b32.xlu1 %v3649_v14, %s6038_s28  ;;  %s3410_s28 = smov 31  }
 0x2ab   : > { %1371 = vrot.lane.b32.xlu0 %v4018_v0, %s6016_s30 }
 0x2ac   : > { %v4120_v44 = vpop.permute.xlu1 %1365 }
 0x2ad   : > { %v4122_v17 = vpop.permute.xlu0 %1593 }
 0x2ae   : > { %1369 = vrot.lane.b32.xlu1 %v3649_v14, %s6016_s30  ;;  %s3414_s30 = smov 27  }
 0x2af   : > { %1414 = vrot.lane.b32.xlu0 %v4018_v0, %s6021_s0 }
 0x2b0   : > { %v4128_v30 = vpop.permute.xlu1 %1408 }
 0x2b1   : > { %v4130_v28 = vpop.permute.xlu0 %1597 }
 0x2b2   : > { %6068 = vst [vmem:[#allocation57_spill] sm:$0xff] %v4130_v28  ;;  %1412 = vrot.lane.b32.xlu1 %v3649_v14, %s6021_s0  ;;  %s6399_s0 = sld [smem:[#allocation11_spill]] }
 0x2b3   : > { %1451 = vrot.lane.b32.xlu0 %v4018_v0, %s6026_s3 }
 0x2b4   : > { %v4136_v34 = vpop.permute.xlu1 %1445 }
 0x2b5   : > { %v4138_v16 = vpop.permute.xlu0 %1630 }
 0x2b6   : > { %1449 = vrot.lane.b32.xlu1 %v3649_v14, %s6026_s3 }
 0x2b7   : > { %1490 = vrot.lane.b32.xlu0 %v4018_v0, %s6030_s6 }
 0x2b8   : > { %v4144_v26 = vpop.permute.xlu1 %1484 }
 0x2b9   : > { %6069 = vst [vmem:[#allocation58_spill] sm:$0xff] %v4144_v26  ;;  %v4146_v11 = vpop.permute.xlu0 %1634  ;;  %v4230_v26 = vsel %vm5899_vm11, %v3826_v42, %v3896_v60  ;;  %v4252_v42 = vld [vmem:[%s5804_s14 + $0x8] sm:$0x7f] }
 0x2ba   : > { %6070 = vst [vmem:[#allocation59_spill] sm:$0xff] %v4146_v11  ;;  %1488 = vrot.lane.b32.xlu1 %v3649_v14, %s6030_s6  ;;  %6089 = vst [vmem:[#allocation78_spill] sm:$0xff] %v4230_v26  ;;  %s3399_s6 = smov 60  }
 0x2bb   : > { %1527 = vrot.lane.b32.xlu0 %v4018_v0, %s6034_s7  ;;  %6095 = vst [vmem:[#allocation83_spill] sm:$0xff] %v4252_v42 }
 0x2bc   : > { %v4152_v28 = vpop.permute.xlu1 %1521 }
 0x2bd   : > { %6071 = vst [vmem:[#allocation60_spill] sm:$0xff] %v4152_v28  ;;  %v4154_v3 = vpop.permute.xlu0 %1673 }
 0x2be   : > { %6072 = vst [vmem:[#allocation61_spill] sm:$0xff] %v4154_v3  ;;  %1525 = vrot.lane.b32.xlu1 %v3649_v14, %s6034_s7  ;;  %s3400_s7 = smov 59  }
 0x2bf   : > { %1564 = vrot.lane.b32.xlu0 %v4018_v0, %s6037_s15 }
 0x2c0   : > { %v4160_v15 = vpop.permute.xlu1 %1558 }
 0x2c1   : > { %6073 = vst [vmem:[#allocation62_spill] sm:$0xff] %v4160_v15  ;;  %v4162_v24 = vpop.permute.xlu0 %1677 }
 0x2c2   : > { %6074 = vst [vmem:[#allocation63_spill] sm:$0xff] %v4162_v24  ;;  %1562 = vrot.lane.b32.xlu1 %v3649_v14, %s6037_s15  ;;  %s3406_s15 = smov 44  }
 0x2c3   : > { %1601 = vrot.lane.b32.xlu0 %v4018_v0, %s6040_s22 }
 0x2c4   : > { %v4168_v11 = vpop.permute.xlu1 %1595 }
 0x2c5   : > { %6075 = vst [vmem:[#allocation64_spill] sm:$0xff] %v4168_v11  ;;  %v4170_v28 = vpop.permute.xlu0 %1710 }
 0x2c6   : > { %6076 = vst [vmem:[#allocation65_spill] sm:$0xff] %v4170_v28  ;;  %1599 = vrot.lane.b32.xlu1 %v3649_v14, %s6040_s22  ;;  %v875_v28 = vlaneseq  ;;  %s3409_s22 = smov 32  }
 0x2c7   : > { %1638 = vrot.lane.b32.xlu0 %v4018_v0, %s6042_s18 }
 0x2c8   : > { %v4176_v3 = vpop.permute.xlu1 %1632 }
 0x2c9   : > { %6077 = vst [vmem:[#allocation66_spill] sm:$0xff] %v4176_v3  ;;  %v4178_v15 = vpop.permute.xlu0 %1714  ;;  %v4201_v3 = vsel %vm919_vm7, %v3784_v32, %v3828_v43  ;;  %v4218_v32 = vsel %vm993_vm9, %v3805_v37, %v3864_v52  ;;  %v4240_v37 = vsel %vm1149_vm13, %v3846_v47, %v3928_v13 }
 0x2ca   : > { %6078 = vst [vmem:[#allocation67_spill] sm:$0xff] %v4178_v15  ;;  %1636 = vrot.lane.b32.xlu1 %v3649_v14, %s6042_s18  ;;  %6083 = vst [vmem:[#allocation72_spill] sm:$0xff] %v4201_v3  ;;  %s3407_s18 = smov 43  }
 0x2cb   : > { %1681 = vrot.lane.b32.xlu0 %v4018_v0, %s6044_s19  ;;  %6086 = vst [vmem:[#allocation75_spill] sm:$0xff] %v4218_v32  ;;  %6091 = vst [vmem:[#allocation80_spill] sm:$0xff] %v4240_v37  ;;  %v6128_v32 = vld [vmem:[#allocation60_spill] sm:$0xff] }
 0x2cc   : > { %v4184_v24 = vpop.permute.xlu1 %1675 }
 0x2cd   : > { %6079 = vst [vmem:[#allocation68_spill] sm:$0xff] %v4184_v24  ;;  %v4186_v11 = vpop.permute.xlu0 %1747  ;;  %v876_v24 = vshrl.u32 %v875_v28, 7  ;;  %v4213_v28 = vsel %vm956_vm8, %v3795_v35, %v3848_v48  ;;  %v4235_v35 = vsel %vm5901_vm12, %v3837_v45, %v3912_v1  ;;  %v4257_v45 = vsel %vm1225_vm15, %v3862_v51, %v3960_v25 }
 0x2ce   : > { %6080 = vst [vmem:[#allocation69_spill] sm:$0xff] %v4186_v11  ;;  %1679 = vrot.lane.b32.xlu1 %v3649_v14, %s6044_s19  ;;  %6085 = vst [vmem:[#allocation74_spill] sm:$0xff] %v4213_v28  ;;  %v4291_v28 = vsel %vm1299_vm2, %v3878_v55, %v3992_v39  ;;  %v4310_v55 = vsel %vm1373_vm5, %v3894_v59, %v4026_v23  ;;  %v4329_v59 = vsel %vm1416_vm6, %v3902_v61, %v4042_v62  ;;  %s3408_s19 = smov 42  }
 0x2cf   : > { %1718 = vrot.lane.b32.xlu0 %v4018_v0, %s6046_s11  ;;  %6090 = vst [vmem:[#allocation79_spill] sm:$0xff] %v4235_v35  ;;  %6096 = vst [vmem:[#allocation84_spill] sm:$0xff] %v4257_v45  ;;  %v4261_v47 = vsub.s32 0, %v876_v24  ;;  %v4270_v37 = vsub.s32 3, %v876_v24  ;;  %v4272_v35 = vsub.s32 4, %v876_v24  ;;  %v4274_v51 = vsub.s32 5, %v876_v24 }
 0x2d0   : > { %v4192_v15 = vpop.permute.xlu1 %1712  ;;  %v4279_v45 = vsel %vm1262_vm1, %v3870_v53, %v3976_v29  ;;  %v4347_v61 = vsel %vm5902_vm3, %v3910_v63, %v4058_v50 }
 0x2d1   : > { %6081 = vst [vmem:[#allocation70_spill] sm:$0xff] %v4192_v15  ;;  %v4194_v11 = vpop.permute.xlu0 %1751  ;;  %v4223_v15 = vsel %vm5900_vm10, %v3816_v40, %v3880_v56  ;;  %v4245_v40 = vsel %vm6092_vm14, %v3854_v49, %v3944_v21  ;;  %6097 = vst [vmem:[#allocation85_spill] sm:$0xff] %v4261_v47  ;;  %v4263_v49 = vsub.s32 1, %v876_v24  ;;  %vm1640_vm14 = vcmask 736256  }
 0x2d2   : > { %6082 = vst [vmem:[#allocation71_spill] sm:$0xff] %v4194_v11  ;;  %1716 = vrot.lane.b32.xlu1 %v3649_v14, %s6046_s11  ;;  %v4208_v11 = vld [vmem:[%s5804_s14] sm:$0x7f]  ;;  %6087 = vst [vmem:[#allocation76_spill] sm:$0xff] %v4223_v15  ;;  %v4285_v15 = vsub.s32 7, %v876_v24  ;;  %s3403_s11 = smov 47  }
 0x2d3   : > { %1755 = vrot.lane.b32.xlu0 %v4018_v0, %s6048_s13  ;;  %6084 = vst [vmem:[#allocation73_spill] sm:$0xff] %v4208_v11  ;;  %6093 = vst [vmem:[#allocation81_spill] sm:$0xff] %v4245_v40  ;;  %v4283_v40 = vsub.s32 6, %v876_v24 }
 0x2d4   : > { %v4225_v3 = vpop.permute.xlu1 %1749  ;;  %6098 = vst [vmem:[#allocation86_spill] sm:$0xff] %v4263_v49  ;;  %6100 = vst [vmem:[#allocation88_spill] sm:$0xff] %v4270_v37 }
 0x2d5   : > { %6088 = vst [vmem:[#allocation77_spill] sm:$0xff] %v4225_v3  ;;  %v4247_v3 = vpop.permute.xlu0 %1786  ;;  %6101 = vst [vmem:[#allocation89_spill] sm:$0xff] %v4274_v51  ;;  %v4296_v51 = vsel %vm1336_vm4, %v3886_v57, %v4008_v7  ;;  %v6132_v57 = vld [vmem:[#allocation39_spill] sm:$0xff] }
 0x2d6   : > { %6094 = vst [vmem:[#allocation82_spill] sm:$0xff] %v4247_v3  ;;  %1753 = vrot.lane.b32.xlu1 %v3649_v14, %s6048_s13  ;;  %v4268_v3 = vsub.s32 2, %v876_v24  ;;  %6102 = vst [vmem:[#allocation90_spill] sm:$0xff] %v4279_v45  ;;  %v4305_v24 = vsel %vm919_vm7, %v3828_v43, %v4024_v27  ;;  %v4324_v43 = vsel %vm993_vm9, %v3864_v52, %v4040_v10  ;;  %v6134_v45 = vld [vmem:[#allocation24_spill] sm:$0xff]  ;;  %s3405_s13 = smov 45  }
 0x2d7   : > { %1794 = vrot.lane.b32.xlu0 %v4018_v0, %s6052_s12  ;;  %6104 = vst [vmem:[#allocation92_spill] sm:$0xff] %v4283_v40  ;;  %6105 = vst [vmem:[#allocation93_spill] sm:$0xff] %v4285_v15  ;;  %v4342_v52 = vsel %vm5899_vm11, %v3896_v60, %v4056_v19  ;;  %vm6107_vm11 = vcmask 769024  }
 0x2d8   : > { %6099 = vst [vmem:[#allocation87_spill] sm:$0xff] %v4268_v3  ;;  %v4281_v26 = vpop.permute.xlu1 %1788  ;;  %v4365_v60 = vsel %vm6107_vm11, %v3918_v9, %v4074_v6  ;;  %vm6111_vm11 = vcmask 760832  }
 0x2d9   : > { %6103 = vst [vmem:[#allocation91_spill] sm:$0xff] %v4281_v26  ;;  %v4298_v53 = vpop.permute.xlu0 %1790  ;;  %v4319_v26 = vsel %vm956_vm8, %v3848_v48, %v4032_v31  ;;  %v4337_v48 = vsel %vm5900_vm10, %v3880_v56, %v4048_v58  ;;  %v4355_v56 = vsel %vm5901_vm12, %v3912_v1, %v4064_v46  ;;  %v4360_v58 = vsel %vm1149_vm13, %v3928_v13, %v4072_v54 }
 0x2da   : > { %6106 = vst [vmem:[#allocation94_spill] sm:$0xff] %v4298_v53  ;;  %1792 = vrot.lane.b32.xlu1 %v3649_v14, %s6052_s12  ;;  %6108 = vst [vmem:[#allocation95_spill] sm:$0xff] %v4365_v60  ;;  %vm1720_vm10 = vcmask 646144   ;;  %vm6110_vm12 = vcmask 908288   ;;  %v4378_v54 = vsel %vm1225_vm15, %v3960_v25, %v4088_v41  ;;  %v4383_v1 = vsel %vm6111_vm11, %v3926_v12, %v4090_v8  ;;  %v6158_v60 = vld [vmem:[#allocation40_spill] sm:$0xff]  ;;  %s3404_s12 = smov 46  }
 0x2db   : > { %1831 = vrot.lane.b32.xlu0 %v4018_v0, %s6009_s20  ;;  %v4373_v46 = vsel %vm6110_vm12, %v3944_v21, %v4080_v5  ;;  %6112 = vst [vmem:[#allocation97_spill] sm:$0xff] %v4383_v1  ;;  %v4393_v5 = vsel %vm1262_vm1, %v3976_v29, %v4096_v36  ;;  %v4398_v41 = vsel %vm1299_vm2, %v3992_v39, %v4104_v38  ;;  %vm6113_vm12 = vcmask 752640   ;;  %v6157_v1 = vld [vmem:[#allocation65_spill] sm:$0xff] }
 0x2dc   : > { %v4349_v10 = vpop.permute.xlu1 %1823  ;;  %v797_v31 = vpop.f32.mrb[4].mxu1  ;;  %v4403_v12 = vsel %vm6113_vm12, %v3934_v18, %v4106_v4  ;;  %v4411_v36 = vsel %vm1336_vm4, %v4008_v7, %v4112_v33  ;;  %v4416_v38 = vsel %vm1373_vm5, %v4026_v23, %v4120_v44  ;;  %vm6116_vm11 = vcmask 744448   ;;  %v6124_v44 = vld [vmem:[#allocation58_spill] sm:$0xff] }
 0x2dd   : > { %v798_v63 = vadd.f32 %v797_v31, %v3629_v2  ;;  %v4368_v19 = vpop.permute.xlu0 %1827  ;;  %v799_v27 = vpop.f32.mrb[5].mxu1  ;;  %6114 = vst [vmem:[#allocation98_spill] sm:$0xff] %v4403_v12  ;;  %6115 = vst [vmem:[#allocation99_spill] sm:$0xff] %v4416_v38  ;;  %v4421_v18 = vsel %vm6116_vm11, %v3942_v20, %v4122_v17  ;;  %v4426_v25 = vsel %vm1416_vm6, %v4042_v62, %v4128_v30  ;;  %vm6125_vm12 = vcmask 769024  }
 0x2de   : > { %6109 = vst [vmem:[#allocation96_spill] sm:$0xff] %v4368_v19  ;;  %v4386_v9 = vadd.f32 %v799_v27, %v3629_v2  ;;  %1829 = vrot.lane.b32.xlu1 %v3649_v14, %s6009_s20  ;;  %v801_v13 = vpop.f32.mrb[6].mxu1  ;;  %6117 = vst [vmem:[#allocation100_spill] sm:$0xff] %v4421_v18  ;;  %v4446_v62 = vsel %vm5902_vm3, %v4058_v50, %v4136_v34  ;;  %v4451_v30 = vsel %vm1640_vm14, %v3950_v22, %v4138_v16  ;;  %vm6129_vm11 = vcmask 760832   ;;  %v6131_v34 = vld [vmem:[#allocation61_spill] sm:$0xff]  ;;  %v6136_v19 = vld [vmem:[#allocation62_spill] sm:$0xff] }
 0x2df   : > { %v873_v2 = vmul.f32 %v4208_v11, %v798_v63  ;;  %1868 = vrot.lane.b32.xlu0 %v4018_v0, %s6011_s21  ;;  %v803_v21 = vpop.f32.mrb[7].mxu1  ;;  %6118 = vst [vmem:[#allocation101_spill] sm:$0xff] %v4426_v25  ;;  %6122 = vst [vmem:[#allocation105_spill] sm:$0xff] %v4446_v62  ;;  %v4456_v27 = vsel %vm6125_vm12, %v4074_v6, %v6124_v44  ;;  %v4466_v50 = vsel %vm6129_vm11, %v4090_v8, %v6128_v32  ;;  %vm5920_vm3 = vcmask 637952   ;;  %v6135_v44 = vld [vmem:[#allocation72_spill] sm:$0xff] }
 0x2e0   : > { %v4428_v29 = vpop.permute.xlu1 %1860  ;;  %v874_v20 = vmul.f32 %v4252_v42, %v4386_v9  ;;  %6123 = vst [vmem:[#allocation106_spill] sm:$0xff] %v4451_v30  ;;  %6126 = vst [vmem:[#allocation58_spill] sm:$0xff] %v4456_v27  ;;  %v4471_v22 = vsel %vm1683_vm0, %v6132_v57, %v6131_v34  ;;  %vm6137_vm12 = vcmask 752640   ;;  %v6139_v32 = vld [vmem:[#allocation64_spill] sm:$0xff]  ;;  %vm6140_vm11 = vcmask 744448   ;;  %v6154_v27 = vld [vmem:[#allocation23_spill] sm:$0xff] }
 0x2e1   : > { %v4431_v7 = vrot.slane %v873_v2, %v4261_v47  ;;  %v4434_v33 = vrot.slane %v873_v2, %v4263_v49  ;;  %v4437_v23 = vrot.slane %v873_v2, %v4268_v3  ;;  %v4441_v39 = vpop.permute.xlu0 %1864  ;;  %v4459_v31 = vrot.slane %v873_v2, %v4270_v37  ;;  %6130 = vst [vmem:[#allocation60_spill] sm:$0xff] %v4466_v50  ;;  %v6145_v50 = vld [vmem:[#allocation74_spill] sm:$0xff] }
 0x2e2   : > { %6121 = vst [vmem:[#allocation104_spill] sm:$0xff] %v4441_v39  ;;  %1866 = vrot.lane.b32.xlu1 %v3649_v14, %s6011_s21  ;;  %6133 = vst [vmem:[#allocation61_spill] sm:$0xff] %v4471_v22  ;;  %v4482_v8 = vsel %vm6137_vm12, %v4106_v4, %v6136_v19  ;;  %v4487_v57 = vsel %vm6140_vm11, %v4122_v17, %v6139_v32  ;;  %v4490_v53 = vrot.slane %v873_v2, %v4272_v35  ;;  %vm5915_vm12 = vcmask 629760   ;;  %s3411_s21 = smov 30  }
 0x2e3   : > { %6119 = vst [vmem:[#allocation102_spill] sm:$0xff] %v4434_v33  ;;  %6120 = vst [vmem:[#allocation103_spill] sm:$0xff] %v4437_v23  ;;  %v883_v6 = vmul.f32 %v4431_v7, %v6134_v45  ;;  %v928_v39 = vmul.f32 %v6135_v44, %v4434_v33  ;;  %1905 = vrot.lane.b32.xlu0 %v4018_v0, %s6012_s17  ;;  %v6143_v45 = vrot.slane %v4208_v11, 1  ;;  %vm1833_vm11 = vcmask 621568  }
 0x2e4   : > { %6127 = vst [vmem:[#allocation107_spill] sm:$0xff] %v4459_v31  ;;  %6138 = vst [vmem:[#allocation39_spill] sm:$0xff] %v4482_v8  ;;  %v4494_v44 = vpop.permute.xlu1 %1897  ;;  %v4496_v33 = vpop.f32.mrb[8].mxu1  ;;  %v965_v4 = vmul.f32 %v6145_v50, %v4437_v23  ;;  %v4501_v19 = vrot.slane %v874_v20, %v4261_v47  ;;  %v4504_v17 = vrot.slane %v874_v20, %v4263_v49  ;;  %v6149_v8 = vld [vmem:[#allocation89_spill] sm:$0xff] }
 0x2e5   : > { %6141 = vst [vmem:[#allocation24_spill] sm:$0xff] %v4487_v57  ;;  %6142 = vst [vmem:[#allocation72_spill] sm:$0xff] %v4490_v53  ;;  %v1127_v22 = vmul.f32 %v6143_v45, %v798_v63  ;;  %v932_v30 = vadd.f32 %v928_v39, %v883_v6  ;;  %v4506_v32 = vpop.permute.xlu0 %1901  ;;  %v4508_v57 = vpop.f32.mrb[9].mxu1  ;;  %v6148_v63 = vld [vmem:[#allocation75_spill] sm:$0xff]  ;;  %v4513_v18 = vrot.slane %v873_v2, %v6149_v8  ;;  %v6152_v50 = vld [vmem:[#allocation17_spill] sm:$0xff] }
 0x2e6   : > { %6144 = vst [vmem:[#allocation62_spill] sm:$0xff] %v4494_v44  ;;  %6146 = vst [vmem:[#allocation64_spill] sm:$0xff] %v4504_v17  ;;  %v1002_v45 = vmul.f32 %v6148_v63, %v4459_v31  ;;  %v4516_v39 = vrot.slane %v874_v20, %v4268_v3  ;;  %v4519_v6 = vadd.f32 %v801_v13, %v6152_v50  ;;  %1903 = vrot.lane.b32.xlu1 %v3649_v14, %s6012_s17  ;;  %v4523_v23 = vpop.f32.mrb[10].mxu1 }
 0x2e7   : > { %6147 = vst [vmem:[#allocation74_spill] sm:$0xff] %v4506_v32  ;;  %6150 = vst [vmem:[#allocation75_spill] sm:$0xff] %v4513_v18  ;;  %v969_v32 = vadd.f32 %v965_v4, %v932_v30  ;;  %v884_v12 = vmul.f32 %v4501_v19, %v6154_v27  ;;  %v929_v63 = vmul.f32 %v4305_v24, %v4504_v17  ;;  %1948 = vrot.lane.b32.xlu0 %v4018_v0, %s6014_s25  ;;  %v4534_v13 = vpop.f32.mrb[11].mxu1 }
 0x2e8   : > { %6151 = vst [vmem:[#allocation108_spill] sm:$0xff] %v4516_v39  ;;  %6153 = vst [vmem:[#allocation17_spill] sm:$0xff] %v4523_v23  ;;  %v4530_v31 = vrot.slane %v874_v20, %v4270_v37  ;;  %v4539_v23 = vsel %vm1720_vm10, %v6158_v60, %v6157_v1  ;;  %v4542_v30 = vrot.slane %v873_v2, %v4283_v40  ;;  %v4550_v4 = vpop.permute.xlu1 %1940  ;;  %v6164_v2 = vld [vmem:[#allocation78_spill] sm:$0xff] }
 0x2e9   : > { %6156 = vst [vmem:[#allocation109_spill] sm:$0xff] %v4534_v13  ;;  %6159 = vst [vmem:[#allocation65_spill] sm:$0xff] %v4539_v23  ;;  %v4545_v27 = vrot.slane %v874_v20, %v4272_v35  ;;  %v4548_v24 = vadd.f32 %v803_v21, %v6152_v50  ;;  %v1006_v17 = vadd.f32 %v1002_v45, %v969_v32  ;;  %v6162_v13 = vld [vmem:[#allocation76_spill] sm:$0xff]  ;;  %v4556_v23 = vpop.permute.xlu0 %1944  ;;  %v6166_v21 = vrot.slane %v4252_v42, 1 }
 0x2ea   : > { %6155 = vst [vmem:[#allocation23_spill] sm:$0xff] %v4530_v31  ;;  %6160 = vst [vmem:[#allocation40_spill] sm:$0xff] %v4542_v30  ;;  %v1039_v44 = vmul.f32 %v6162_v13, %v4490_v53  ;;  %v933_v62 = vadd.f32 %v929_v63, %v884_v12  ;;  %v966_v60 = vmul.f32 %v4319_v26, %v4516_v39  ;;  %v6167_v32 = vrot.slane %v4208_v11, 1  ;;  %v6169_v13 = vld [vmem:[#allocation25_spill] sm:$0xff]  ;;  %v6205_v39 = vld [vmem:[#allocation27_spill] sm:$0xff] }
 0x2eb   : > { %6161 = vst [vmem:[#allocation110_spill] sm:$0xff] %v4545_v27  ;;  %6163 = vst [vmem:[#allocation76_spill] sm:$0xff] %v4556_v23  ;;  %v1076_v25 = vmul.f32 %v6164_v2, %v4513_v18  ;;  %v4561_v38 = vrot.slane %v1127_v22, %v4285_v15  ;;  %v1128_v50 = vmul.f32 %v6166_v21, %v4386_v9  ;;  %1946 = vrot.lane.b32.xlu1 %v3649_v14, %s6014_s25  ;;  %v6170_v9 = vld [vmem:[#allocation66_spill] sm:$0xff]  ;;  %v6171_v21 = vld [vmem:[#allocation79_spill] sm:$0xff]  ;;  %s3412_s25 = smov 29  }
 0x2ec   : > { %v4569_v45 = vmul.f32 %v6167_v32, %v4519_v6  ;;  %v1043_v26 = vadd.f32 %v1039_v44, %v1006_v17  ;;  %v970_v12 = vadd.f32 %v966_v60, %v933_v62  ;;  %v1003_v63 = vmul.f32 %v4324_v43, %v4530_v31  ;;  %1978 = vrot.lane.b32.xlu0 %v6169_v13, %s3396_s10  ;;  %v4592_v43 = vpop.permute.xlu1 %1976  ;;  %v4594_v17 = vpop.f32.mrb[12].mxu1 }
 0x2ed   : > { %6165 = vst [vmem:[#allocation78_spill] sm:$0xff] %v4561_v38  ;;  %v4576_v22 = vrot.slane %v874_v20, %v6149_v8  ;;  %v4583_v2 = vsel %vm1640_vm14, %v4138_v16, %v6170_v9  ;;  %v1113_v32 = vmul.f32 %v6171_v21, %v4542_v30  ;;  %v1040_v62 = vmul.f32 %v4337_v48, %v4545_v27  ;;  %v4605_v21 = vpop.permute.xlu0 %917  ;;  %v4607_v48 = vpop.f32.mrb[13].mxu1  ;;  %v6199_v27 = vld [vmem:[#allocation90_spill] sm:$0xff] }
 0x2ee   : > { %v4590_v44 = vrot.slane %v874_v20, %v4283_v40  ;;  %6173 = vst [vmem:[#allocation66_spill] sm:$0xff] %v4592_v43  ;;  %6174 = vst [vmem:[#allocation79_spill] sm:$0xff] %v4594_v17  ;;  %v1080_v60 = vadd.f32 %v1076_v25, %v1043_v26  ;;  %v1007_v13 = vadd.f32 %v1003_v63, %v970_v12  ;;  %v6176_v16 = vrot.slane %v4252_v42, 1  ;;  %v6178_v20 = vld [vmem:[#allocation68_spill] sm:$0xff]  ;;  %v6179_v25 = vld [vmem:[#allocation69_spill] sm:$0xff] }
 0x2ef   : > { %6168 = vst [vmem:[#allocation111_spill] sm:$0xff] %v4576_v22  ;;  %v4598_v23 = vrot.slane %v4569_v45, %v4261_v47  ;;  %6177 = vst [vmem:[#allocation113_spill] sm:$0xff] %v4607_v48  ;;  %v4612_v43 = vsel %vm1683_vm0, %v6131_v34, %v6178_v20  ;;  %v6180_v26 = vld [vmem:[#allocation42_spill] sm:$0xff]  ;;  %v6181_v63 = vld [vmem:[#allocation80_spill] sm:$0xff]  ;;  %1982 = vrot.lane.b32.xlu1 %v3649_v14, %s3396_s10  ;;  %v4626_v48 = vpop.f32.mrb[14].mxu1  ;;  %v1077_v34 = vmul.f32 %v4342_v52, %v4576_v22 }
 0x2f0   : > { %6172 = vst [vmem:[#allocation25_spill] sm:$0xff] %v4590_v44  ;;  %v4603_v9 = vmul.f32 %v6176_v16, %v4548_v24  ;;  %v4617_v12 = vsel %vm5920_vm3, %v6180_v26, %v6179_v25  ;;  %v1158_v17 = vmul.f32 %v6181_v63, %v4561_v38  ;;  %v4622_v16 = vrot.slane %v1128_v50, %v4285_v15  ;;  %v4636_v26 = vpop.f32.mrb[15].mxu1  ;;  %v6186_v50 = vld [vmem:[#allocation70_spill] sm:$0xff]  ;;  %v6187_v63 = vld [vmem:[#allocation77_spill] sm:$0xff]  ;;  %v6192_v38 = vld [vmem:[#allocation43_spill] sm:$0xff] }
 0x2f1   : > { %6175 = vst [vmem:[#allocation112_spill] sm:$0xff] %v4598_v23  ;;  %6183 = vst [vmem:[#allocation69_spill] sm:$0xff] %v4626_v48  ;;  %v1117_v30 = vadd.f32 %v1113_v32, %v1080_v60  ;;  %v1044_v18 = vadd.f32 %v1040_v62, %v1007_v13  ;;  %v4632_v20 = vrot.slane %v4569_v45, %v4263_v49  ;;  %1984 = vrot.lane.b32.xlu0 %v4018_v0, %s3396_s10  ;;  %v4654_v60 = vpop.permute.xlu1 %915 }
 0x2f2   : > { %6182 = vst [vmem:[#allocation68_spill] sm:$0xff] %v4622_v16  ;;  %6185 = vst [vmem:[#allocation80_spill] sm:$0xff] %v4636_v26  ;;  %v4641_v14 = vsel %vm1720_vm10, %v6157_v1, %v6186_v50  ;;  %v4646_v32 = vsel %vm5920_vm3, %v6179_v25, %v6187_v63  ;;  %v1114_v52 = vmul.f32 %v4355_v56, %v4590_v44  ;;  %v6189_v26 = vld [vmem:[#allocation81_spill] sm:$0xff]  ;;  %v4662_v25 = vpop.permute.xlu0 %954  ;;  %v6191_v63 = vld [vmem:[#allocation82_spill] sm:$0xff]  ;;  %vm5939_vm3 = vcmask 605184  }
 0x2f3   : > { %6184 = vst [vmem:[#allocation42_spill] sm:$0xff] %v4632_v20  ;;  %v4652_v62 = vrot.slane %v4569_v45, %v4268_v3  ;;  %v1162_v13 = vadd.f32 %v1158_v17, %v1117_v30  ;;  %v1081_v48 = vadd.f32 %v1077_v34, %v1044_v18  ;;  %v1197_v1 = vmul.f32 %v6189_v26, %v4598_v23  ;;  %v6193_v44 = vld [vmem:[#allocation91_spill] sm:$0xff]  ;;  %v6195_v26 = vld [vmem:[#allocation84_spill] sm:$0xff] }
 0x2f4   : > { %v4660_v50 = vrot.slane %v4603_v9, %v4261_v47  ;;  %v4667_v56 = vsel %vm5915_vm12, %v6192_v38, %v6191_v63  ;;  %v4672_v22 = vsel %vm5915_vm12, %v6191_v63, %v6193_v44  ;;  %v1159_v18 = vmul.f32 %v4360_v58, %v4622_v16  ;;  %v4680_v17 = vld [vmem:[#allocation2] sm:$0xff]  ;;  %v6197_v58 = vld [vmem:[#allocation26_spill] sm:$0xff]  ;;  %v6198_v63 = vld [vmem:[#allocation45_spill] sm:$0xff] }
 0x2f5   : > { %6188 = vst [vmem:[#allocation70_spill] sm:$0xff] %v4652_v62  ;;  %v4678_v30 = vrot.slane %v4569_v45, %v4270_v37  ;;  %1974 = vrot.lane.b32.xlu1 %v4680_v17, %s3396_s10  ;;  %v1118_v34 = vadd.f32 %v1114_v52, %v1081_v48  ;;  %v1201_v38 = vadd.f32 %v1197_v1, %v1162_v13  ;;  %vm1870_vm12 = vcmask 613376  }
 0x2f6   : > { %6190 = vst [vmem:[#allocation77_spill] sm:$0xff] %v4660_v50  ;;  %v1234_v23 = vmul.f32 %v6195_v26, %v4632_v20  ;;  %v4688_v44 = vrot.slane %v4603_v9, %v4263_v49  ;;  %1980 = vrot.lane.b32.xlu0 %v6197_v58, %s3396_s10  ;;  %v4695_v16 = vsel %vm1833_vm11, %v6198_v63, %v4349_v10  ;;  %v6201_v13 = vrot.slane %v4208_v11, 2  ;;  %v4706_v26 = vpop.permute.xlu1 %952  ;;  %v4708_v20 = vpop.f32.mrb[16].mxu1  ;;  %s3402_s10 = smov 48  }
 0x2f7   : > { %6194 = vst [vmem:[#allocation81_spill] sm:$0xff] %v4678_v30  ;;  %v1271_v48 = vmul.f32 %v6199_v27, %v4652_v62  ;;  %v4701_v52 = vrot.slane %v4569_v45, %v4272_v35  ;;  %6202 = vst [vmem:[#allocation91_spill] sm:$0xff] %v4708_v20  ;;  %v1163_v58 = vadd.f32 %v1159_v18, %v1118_v34  ;;  %v4716_v62 = vpop.permute.xlu0 %991  ;;  %v4718_v31 = vpop.f32.mrb[17].mxu1  ;;  %v6207_v18 = vrot.slane %v4252_v42, 2  ;;  %v4744_v20 = vld [vmem:[#allocation2 + $0x10] sm:$0xff] }
 0x2f8   : > { %6196 = vst [vmem:[#allocation82_spill] sm:$0xff] %v4688_v44  ;;  %v1394_v1 = vmul.f32 %v6201_v13, %v4519_v6  ;;  %v1238_v53 = vadd.f32 %v1234_v23, %v1201_v38  ;;  %v1198_v63 = vmul.f32 %v4373_v46, %v4660_v50  ;;  %v4714_v27 = vrot.slane %v4603_v9, %v4268_v3  ;;  %v4734_v38 = vld [vmem:[#allocation2 + $0x8] sm:$0xff]  ;;  %v831_v13 = vpop.f32.mrb[18].mxu1 }
 0x2f9   : > { %6200 = vst [vmem:[#allocation43_spill] sm:$0xff] %v4701_v52  ;;  %6204 = vst [vmem:[#allocation26_spill] sm:$0xff] %v4718_v31  ;;  %v4723_v6 = vsel %vm1833_vm11, %v4349_v10, %v6205_v39  ;;  %v1308_v23 = vmul.f32 %v4291_v28, %v4678_v30  ;;  %v4729_v46 = vrot.slane %v4569_v45, %v6149_v8  ;;  %2013 = vrot.lane.b32.xlu1 %v4734_v38, %s3397_s4  ;;  %v4769_v30 = vld [vmem:[#allocation2 + $0x18] sm:$0xff] }
 0x2fa   : > { %6203 = vst [vmem:[#allocation84_spill] sm:$0xff] %v4714_v27  ;;  %v1395_v34 = vmul.f32 %v6207_v18, %v4548_v24  ;;  %v1275_v10 = vadd.f32 %v1271_v48, %v1238_v53  ;;  %v1202_v39 = vadd.f32 %v1198_v63, %v1163_v58  ;;  %v1235_v28 = vmul.f32 %v4378_v54, %v4688_v44  ;;  %v832_v24 = vpop.f32.mrb[19].mxu1  ;;  %v6211_v54 = vld [vmem:[#allocation18_spill] sm:$0xff]  ;;  %v4759_v58 = vpop.permute.xlu1 %989 }
 0x2fb   : > { %6206 = vst [vmem:[#allocation45_spill] sm:$0xff] %v4729_v46  ;;  %v4742_v45 = vrot.slane %v4603_v9, %v4270_v37  ;;  %2015 = vrot.lane.b32.xlu0 %v4744_v20, %s3397_s4  ;;  %v1345_v18 = vmul.f32 %v4296_v51, %v4701_v52  ;;  %v4751_v13 = vrot.slane %v1394_v1, %v4283_v40  ;;  %v4767_v52 = vpop.permute.xlu0 %1028 }
 0x2fc   : > { %v4755_v53 = vrot.slane %v4603_v9, %v4272_v35  ;;  %v808_v48 = vadd.f32 %v4496_v33, %v6211_v54  ;;  %v1312_v63 = vadd.f32 %v1308_v23, %v1275_v10  ;;  %v1239_v31 = vadd.f32 %v1235_v28, %v1202_v39  ;;  %6212 = vst [vmem:[#allocation18_spill] sm:$0xff] %v4767_v52  ;;  %v4782_v39 = vld [vmem:[#allocation2 + $0x20] sm:$0xff] }
 0x2fd   : > { %6208 = vst [vmem:[#allocation90_spill] sm:$0xff] %v4742_v45  ;;  %6209 = vst [vmem:[#allocation27_spill] sm:$0xff] %v4751_v13  ;;  %v1272_v24 = vmul.f32 %v4393_v5, %v4714_v27  ;;  %v4765_v51 = vadd.f32 %v4508_v57, %v6211_v54  ;;  %v4773_v44 = vmul.f32 %v4769_v30, %v4431_v7  ;;  %v6214_v5 = vrot.slane %v4208_v11, 2  ;;  %v6229_v27 = vld [vmem:[#allocation48_spill] sm:$0xff] }
 0x2fe   : > { %6210 = vst [vmem:[#allocation114_spill] sm:$0xff] %v4755_v53  ;;  %v1382_v33 = vmul.f32 %v4310_v55, %v4729_v46  ;;  %v4778_v23 = vrot.slane %v1394_v1, %v4285_v15  ;;  %2019 = vrot.lane.b32.xlu1 %v4782_v39, %s3397_s4  ;;  %v1349_v57 = vadd.f32 %v1345_v18, %v1312_v63  ;;  %v6222_v46 = vld [vmem:[#allocation46_spill] sm:$0xff] }
 0x2ff   : > { %v1470_v10 = vmul.f32 %v6214_v5, %v808_v48  ;;  %v1276_v28 = vadd.f32 %v1272_v24, %v1239_v31  ;;  %v1309_v7 = vmul.f32 %v4398_v41, %v4742_v45  ;;  %v4790_v54 = vrot.slane %v4603_v9, %v6149_v8  ;;  %2021 = vrot.lane.b32.xlu0 %v4018_v0, %s3397_s4  ;;  %v4804_v41 = vpop.permute.xlu1 %1026  ;;  %v6228_v45 = vld [vmem:[#allocation62_spill] sm:$0xff] }
 0x300   : > { %6213 = vst [vmem:[#allocation115_spill] sm:$0xff] %v4778_v23  ;;  %v1425_v55 = vmul.f32 %v4329_v59, %v4751_v13  ;;  %v1346_v1 = vmul.f32 %v4411_v36, %v4755_v53  ;;  %v4799_v5 = vrot.slane %v1395_v34, %v4283_v40  ;;  %v4802_v31 = vrot.slane %v1395_v34, %v4285_v15  ;;  %v4812_v13 = vpop.permute.xlu0 %1065 }
 0x301   : > { %6215 = vst [vmem:[#allocation116_spill] sm:$0xff] %v4790_v54  ;;  %6218 = vst [vmem:[#allocation119_spill] sm:$0xff] %v4804_v41  ;;  %v1386_v18 = vadd.f32 %v1382_v33, %v1349_v57  ;;  %v1313_v9 = vadd.f32 %v1309_v7, %v1276_v28  ;;  %v4807_v63 = vrot.slane %v1470_v10, %v4261_v47  ;;  %v6220_v24 = vrot.slane %v4252_v42, 2  ;;  %v6223_v57 = vld [vmem:[#allocation28_spill] sm:$0xff] }
 0x302   : > { %6216 = vst [vmem:[#allocation117_spill] sm:$0xff] %v4799_v5  ;;  %6217 = vst [vmem:[#allocation118_spill] sm:$0xff] %v4802_v31  ;;  %v4816_v36 = vmul.f32 %v4782_v39, %v4501_v19  ;;  %v1462_v34 = vmul.f32 %v4347_v61, %v4778_v23  ;;  %v4823_v33 = vsel %vm1870_vm12, %v6222_v46, %v4428_v29  ;;  %2011 = vrot.lane.b32.xlu1 %v4680_v17, %s3397_s4  ;;  %v6224_v19 = vld [vmem:[#allocation99_spill] sm:$0xff]  ;;  %v6226_v46 = vld [vmem:[#allocation101_spill] sm:$0xff] }
 0x303   : > { %6219 = vst [vmem:[#allocation120_spill] sm:$0xff] %v4807_v63  ;;  %v1471_v59 = vmul.f32 %v6220_v24, %v4765_v51  ;;  %6221 = vst [vmem:[#allocation121_spill] sm:$0xff] %v4812_v13  ;;  %v4828_v28 = vsel %vm1870_vm12, %v4428_v29, %v6223_v57  ;;  %v1429_v7 = vadd.f32 %v1425_v55, %v1386_v18  ;;  %2017 = vrot.lane.b32.xlu0 %v4769_v30, %s3397_s4  ;;  %v6227_v29 = vld [vmem:[#allocation105_spill] sm:$0xff]  ;;  %v4851_v18 = vpop.permute.xlu1 %1063  ;;  %s6382_s4 = sld [smem:[#allocation131_spill]] }
 0x304   : > { %v1350_v24 = vadd.f32 %v1346_v1, %v1313_v9  ;;  %v1383_v53 = vmul.f32 %v6224_v19, %v4790_v54  ;;  %v4835_v61 = vrot.slane %v1470_v10, %v4263_v49  ;;  %v1426_v23 = vmul.f32 %v6226_v46, %v4799_v5  ;;  %6231 = vst [vmem:[#allocation99_spill] sm:$0xff] %v4851_v18  ;;  %v6232_v54 = vld [vmem:[#allocation95_spill] sm:$0xff]  ;;  %v4858_v5 = vpop.permute.xlu0 %1102 }
 0x305   : > { %v1463_v57 = vmul.f32 %v6227_v29, %v4802_v31  ;;  %v4846_v55 = vsel %vm5939_vm3, %v6229_v27, %v6228_v45  ;;  %v4849_v1 = vrot.slane %v1470_v10, %v4268_v3  ;;  %v1466_v9 = vadd.f32 %v1462_v34, %v1429_v7  ;;  %6234 = vst [vmem:[#allocation105_spill] sm:$0xff] %v4858_v5  ;;  %v6235_v29 = vld [vmem:[#allocation29_spill] sm:$0xff] }
 0x306   : > { %6225 = vst [vmem:[#allocation46_spill] sm:$0xff] %v4835_v61  ;;  %v1387_v19 = vadd.f32 %v1383_v53, %v1350_v24  ;;  %v1501_v50 = vmul.f32 %v6232_v54, %v4807_v63  ;;  %v4856_v46 = vrot.slane %v1471_v59, %v4261_v47  ;;  %v4863_v27 = vsel %vm5939_vm3, %v6228_v45, %v6235_v29  ;;  %v6238_v53 = vld [vmem:[#allocation19_spill] sm:$0xff]  ;;  %v6239_v7 = vld [vmem:[#allocation17_spill] sm:$0xff] }
 0x307   : > { %6230 = vst [vmem:[#allocation28_spill] sm:$0xff] %v4849_v1  ;;  %v4866_v31 = vrot.slane %v1470_v10, %v4270_v37  ;;  %v6237_v13 = vrot.slane %v4208_v11, 3  ;;  %v812_v24 = vadd.f32 %v6239_v7, %v6238_v53  ;;  %2050 = vrot.lane.b32.xlu1 %v4734_v38, %s3398_s5  ;;  %v6240_v5 = vld [vmem:[#allocation97_spill] sm:$0xff]  ;;  %v4877_v45 = vrot.slane %v1471_v59, %v4263_v49 }
 0x308   : > { %6233 = vst [vmem:[#allocation101_spill] sm:$0xff] %v4856_v46  ;;  %v1430_v54 = vadd.f32 %v1426_v23, %v1387_v19  ;;  %v1505_v63 = vadd.f32 %v1501_v50, %v1466_v9  ;;  %v1538_v18 = vmul.f32 %v6240_v5, %v4835_v61  ;;  %2052 = vrot.lane.b32.xlu0 %v4744_v20, %s3398_s5  ;;  %v6244_v7 = vld [vmem:[#allocation109_spill] sm:$0xff]  ;;  %vm6246_vm3 = vcmask 523264   ;;  %v4893_v5 = vpop.permute.xlu1 %1100  ;;  %v6248_v61 = vld [vmem:[#allocation58_spill] sm:$0xff] }
 0x309   : > { %6236 = vst [vmem:[#allocation62_spill] sm:$0xff] %v4866_v31  ;;  %v1661_v34 = vmul.f32 %v6237_v13, %v808_v48  ;;  %6241 = vst [vmem:[#allocation48_spill] sm:$0xff] %v4877_v45  ;;  %v6242_v13 = vld [vmem:[#allocation98_spill] sm:$0xff]  ;;  %v4884_v29 = vrot.slane %v1470_v10, %v4272_v35  ;;  %v814_v52 = vadd.f32 %v6244_v7, %v6238_v53  ;;  %v6245_v50 = vld [vmem:[#allocation49_spill] sm:$0xff]  ;;  %v4900_v10 = vpop.permute.xlu0 %1147 }
 0x30a   : > { %v1575_v48 = vmul.f32 %v6242_v13, %v4849_v1  ;;  %v4891_v23 = vsel %vm6246_vm3, %v6245_v50, %v4550_v4  ;;  %6247 = vst [vmem:[#allocation29_spill] sm:$0xff] %v4893_v5  ;;  %v1467_v9 = vadd.f32 %v1463_v57, %v1430_v54  ;;  %v1542_v19 = vadd.f32 %v1538_v18, %v1505_v63  ;;  %v6250_v1 = vld [vmem:[#allocation100_spill] sm:$0xff]  ;;  %v6253_v57 = vld [vmem:[#allocation30_spill] sm:$0xff] }
 0x30b   : > { %6243 = vst [vmem:[#allocation95_spill] sm:$0xff] %v4884_v29  ;;  %v1502_v41 = vmul.f32 %v6248_v61, %v4856_v46  ;;  %v4898_v13 = vrot.slane %v1471_v59, %v4268_v3  ;;  %6249 = vst [vmem:[#allocation19_spill] sm:$0xff] %v4900_v10  ;;  %v1612_v53 = vmul.f32 %v6250_v1, %v4866_v31  ;;  %v6252_v50 = vrot.slane %v4252_v42, 3  ;;  %v6255_v54 = vld [vmem:[#allocation60_spill] sm:$0xff] }
 0x30c   : > { %v4905_v7 = vrot.slane %v1661_v34, %v6149_v8  ;;  %v4913_v63 = vsel %vm6246_vm3, %v4550_v4, %v6253_v57  ;;  %2056 = vrot.lane.b32.xlu1 %v4782_v39, %s3398_s5  ;;  %v1579_v61 = vadd.f32 %v1575_v48, %v1542_v19  ;;  %v1539_v1 = vmul.f32 %v6255_v54, %v4877_v45  ;;  %v6259_v45 = vld [vmem:[#allocation39_spill] sm:$0xff] }
 0x30d   : > { %v1662_v5 = vmul.f32 %v6252_v50, %v4765_v51  ;;  %6254 = vst [vmem:[#allocation97_spill] sm:$0xff] %v4913_v63  ;;  %v1506_v18 = vadd.f32 %v1502_v41, %v1467_v9  ;;  %v4920_v31 = vrot.slane %v1471_v59, %v4270_v37  ;;  %2058 = vrot.lane.b32.xlu0 %v4018_v0, %s3398_s5  ;;  %v6256_v51 = vld [vmem:[#allocation106_spill] sm:$0xff]  ;;  %v6258_v41 = vrot.slane %v4208_v11, 3  ;;  %v4934_v9 = vpop.permute.xlu1 %1145 }
 0x30e   : > { %6251 = vst [vmem:[#allocation17_spill] sm:$0xff] %v4905_v7  ;;  %v1649_v50 = vmul.f32 %v6256_v51, %v4884_v29  ;;  %v4927_v4 = vrot.slane %v1661_v34, %v4283_v40  ;;  %v4930_v57 = vrot.slane %v1661_v34, %v4285_v15  ;;  %v1616_v19 = vadd.f32 %v1612_v53, %v1579_v61  ;;  %v4941_v51 = vpop.permute.xlu0 %1186  ;;  %v6260_v29 = vld [vmem:[#allocation61_spill] sm:$0xff]  ;;  %v6261_v61 = vld [vmem:[#allocation24_spill] sm:$0xff] }
 0x30f   : > { %v1774_v48 = vmul.f32 %v6258_v41, %v812_v24  ;;  %v1543_v54 = vadd.f32 %v1539_v1, %v1506_v18  ;;  %v1576_v46 = vmul.f32 %v6259_v45, %v4898_v13  ;;  %v4939_v10 = vrot.slane %v1471_v59, %v4272_v35 }
 0x310   : > { %6257 = vst [vmem:[#allocation98_spill] sm:$0xff] %v4927_v4  ;;  %v1692_v63 = vmul.f32 %v6260_v29, %v4905_v7  ;;  %v4946_v34 = vrot.slane %v1662_v5, %v6149_v8  ;;  %v4949_v41 = vrot.slane %v1662_v5, %v4283_v40  ;;  %v4952_v53 = vrot.slane %v1662_v5, %v4285_v15  ;;  %v6263_v40 = vld [vmem:[#allocation65_spill] sm:$0xff] }
 0x311   : > { %2048 = vrot.lane.b32.xlu1 %v4680_v17, %s3398_s5  ;;  %v1653_v45 = vadd.f32 %v1649_v50, %v1616_v19  ;;  %v1580_v59 = vadd.f32 %v1576_v46, %v1543_v54  ;;  %v1613_v18 = vmul.f32 %v6261_v61, %v4920_v31  ;;  %v6262_v1 = vrot.slane %v4252_v42, 3  ;;  %2054 = vrot.lane.b32.xlu0 %v4769_v30, %s3398_s5  ;;  %v4974_v19 = vpop.permute.xlu1 %1184 }
 0x312   : > { %v1729_v8 = vmul.f32 %v6263_v40, %v4927_v4  ;;  %v4965_v5 = vrot.slane %v1774_v48, %v4261_v47  ;;  %v4968_v15 = vrot.slane %v1774_v48, %v4263_v49  ;;  %v6264_v46 = vrot.slane %v4208_v11, 4  ;;  %v4980_v4 = vpop.permute.xlu0 %1223 }
 0x313   : > { %v1775_v29 = vmul.f32 %v6262_v1, %v814_v52  ;;  %v1696_v54 = vadd.f32 %v1692_v63, %v1653_v45  ;;  %v1766_v61 = vmul.f32 %v4617_v12, %v4930_v57  ;;  %v1617_v1 = vadd.f32 %v1613_v18, %v1580_v59 }
 0x314   : > { %v4972_v50 = vmul.f32 %v6264_v46, %v812_v24  ;;  %v1650_v40 = vmul.f32 %v4583_v2, %v4939_v10  ;;  %v1693_v7 = vmul.f32 %v4612_v43, %v4946_v34  ;;  %v1730_v11 = vmul.f32 %v4641_v14, %v4949_v41 }
 0x315   : > { %v1767_v24 = vmul.f32 %v4646_v32, %v4952_v53  ;;  %v4989_v63 = vrot.slane %v1774_v48, %v4268_v3  ;;  %2089 = vrot.lane.b32.xlu1 %v4734_v38, %s3399_s6  ;;  %v1733_v12 = vadd.f32 %v1729_v8, %v1696_v54  ;;  %v4994_v45 = vrot.slane %v1774_v48, %v4270_v37  ;;  %v5013_v48 = vpop.permute.xlu1 %1221 }
 0x316   : > { %v1654_v2 = vadd.f32 %v1650_v40, %v1617_v1  ;;  %v4997_v43 = vrot.slane %v1775_v29, %v4261_v47  ;;  %2091 = vrot.lane.b32.xlu0 %v4744_v20, %s3399_s6  ;;  %v1805_v14 = vmul.f32 %v4667_v56, %v4965_v5  ;;  %v1842_v32 = vmul.f32 %v4695_v16, %v4968_v15  ;;  %v5021_v40 = vpop.permute.xlu0 %1260 }
 0x317   : > { %v6265_v59 = vrot.slane %v4252_v42, 4  ;;  %v5011_v8 = vrot.slane %v4972_v50, %v4272_v35  ;;  %v1770_v46 = vadd.f32 %v1766_v61, %v1733_v12  ;;  %v5016_v1 = vrot.slane %v1775_v29, %v4263_v49  ;;  %v6271_v49 = vld [vmem:[#allocation108_spill] sm:$0xff] }
 0x318   : > { %v1697_v54 = vadd.f32 %v1693_v7, %v1654_v2  ;;  %v5019_v56 = vrot.slane %v1775_v29, %v4268_v3  ;;  %v5024_v16 = vrot.slane %v1775_v29, %v4270_v37  ;;  %v923_v7 = vsel %vm919_vm7, %v4654_v60, %v4605_v21  ;;  %v6268_v37 = vld [vmem:[#allocation64_spill] sm:$0xff] }
 0x319   : > { %v5007_v18 = vmul.f32 %v6265_v59, %v814_v52  ;;  %v1879_v52 = vmul.f32 %v4823_v33, %v4989_v63  ;;  %v6266_v59 = vld [vmem:[#allocation31_spill] sm:$0xff]  ;;  %2095 = vrot.lane.b32.xlu1 %v4782_v39, %s3399_s6  ;;  %v1806_v12 = vmul.f32 %v4672_v22, %v4997_v43  ;;  %v1809_v29 = vadd.f32 %v1805_v14, %v1770_v46  ;;  %v6267_v33 = vld [vmem:[#allocation102_spill] sm:$0xff]  ;;  %v6269_v21 = vld [vmem:[#allocation32_spill] sm:$0xff]  ;;  %v5050_v22 = vpop.permute.xlu1 %1258 }
 0x31a   : > { %v922_v47 = vsel %vm919_vm7, %v6266_v59, %v4654_v60  ;;  %v1734_v61 = vadd.f32 %v1730_v11, %v1697_v54  ;;  %v1916_v2 = vmul.f32 %v4846_v55, %v4994_v45  ;;  %2097 = vrot.lane.b32.xlu0 %v4018_v0, %s3399_s6  ;;  %v931_v3 = vmul.f32 %v923_v7, %v6268_v37  ;;  %v6270_v55 = vld [vmem:[#allocation103_spill] sm:$0xff]  ;;  %v5054_v42 = vpop.permute.xlu0 %1297 }
 0x31b   : > { %v930_v59 = vmul.f32 %v922_v47, %v6267_v33  ;;  %v959_v60 = vsel %vm956_vm8, %v6269_v21, %v4706_v26  ;;  %v960_v11 = vsel %vm956_vm8, %v4706_v26, %v4662_v25  ;;  %v1846_v46 = vadd.f32 %v1842_v32, %v1809_v29  ;;  %v6273_v33 = vld [vmem:[#allocation107_spill] sm:$0xff] }
 0x31c   : > { %v1771_v14 = vadd.f32 %v1767_v24, %v1734_v61  ;;  %v967_v54 = vmul.f32 %v959_v60, %v6270_v55  ;;  %v968_v0 = vmul.f32 %v960_v11, %v6271_v49  ;;  %v1843_v37 = vmul.f32 %v4723_v6, %v5016_v1  ;;  %v6272_v49 = vld [vmem:[#allocation33_spill] sm:$0xff]  ;;  %v6274_v21 = vld [vmem:[#allocation23_spill] sm:$0xff]  ;;  %v6279_v55 = vld [vmem:[#allocation18_spill] sm:$0xff] }
 0x31d   : > { %v5060_v47 = vrot.slane %v5007_v18, %v4272_v35  ;;  %v934_v7 = vadd.f32 %v930_v59, %v4773_v44  ;;  %v935_v25 = vadd.f32 %v931_v3, %v4816_v36  ;;  %2087 = vrot.lane.b32.xlu1 %v4680_v17, %s3399_s6  ;;  %v1883_v24 = vadd.f32 %v1879_v52, %v1846_v46  ;;  %v5078_v52 = vpop.permute.xlu1 %1295 }
 0x31e   : > { %v1810_v26 = vadd.f32 %v1806_v12, %v1771_v14  ;;  %v996_v32 = vsel %vm993_vm9, %v6272_v49, %v4759_v58  ;;  %v997_v6 = vsel %vm993_vm9, %v4759_v58, %v4716_v62  ;;  %2093 = vrot.lane.b32.xlu0 %v4769_v30, %s3399_s6  ;;  %v1880_v44 = vmul.f32 %v4828_v28, %v5019_v56  ;;  %v5082_v62 = vpop.permute.xlu0 %1334  ;;  %v6275_v28 = vld [vmem:[#allocation97_spill] sm:$0xff]  ;;  %v6276_v14 = vld [vmem:[#allocation119_spill] sm:$0xff] }
 0x31f   : > { %v1958_v3 = vmul.f32 %v4891_v23, %v5011_v8  ;;  %v971_v36 = vadd.f32 %v967_v54, %v934_v7  ;;  %v972_v61 = vadd.f32 %v968_v0, %v935_v25  ;;  %v1920_v29 = vadd.f32 %v1916_v2, %v1883_v24  ;;  %v6277_v23 = vld [vmem:[#allocation34_spill] sm:$0xff]  ;;  %v6281_v7 = vld [vmem:[#allocation72_spill] sm:$0xff]  ;;  %v6283_v49 = vld [vmem:[#allocation99_spill] sm:$0xff] }
 0x320   : > { %v1847_v12 = vadd.f32 %v1843_v37, %v1810_v26  ;;  %v1004_v59 = vmul.f32 %v996_v32, %v6273_v33  ;;  %v1005_v60 = vmul.f32 %v997_v6, %v6274_v21  ;;  %v1917_v58 = vmul.f32 %v4863_v27, %v5024_v16  ;;  %v6282_v26 = vld [vmem:[#allocation110_spill] sm:$0xff]  ;;  %v6284_v32 = vld [vmem:[#allocation35_spill] sm:$0xff]  ;;  %v6286_v33 = vld [vmem:[#allocation121_spill] sm:$0xff] }
 0x321   : > { %v1959_v11 = vmul.f32 %v6275_v28, %v5060_v47  ;;  %vm6278_vm7 = vcmask 1014784   ;;  %2126 = vrot.lane.b32.xlu1 %v4734_v38, %s3400_s7  ;;  %v5096_v0 = vadd.f32 %v1958_v3, %v1920_v29  ;;  %vm6285_vm9 = vcmask 1006592  }
 0x322   : > { %v1033_v46 = vsel %vm6278_vm7, %v6277_v23, %v6276_v14  ;;  %vm6280_vm8 = vmmov %vm6278_vm7  ;;  %v1884_v54 = vadd.f32 %v1880_v44, %v1847_v12  ;;  %v1008_v37 = vadd.f32 %v1004_v59, %v971_v36  ;;  %v1009_v27 = vadd.f32 %v1005_v60, %v972_v61  ;;  %2128 = vrot.lane.b32.xlu0 %v4744_v20, %s3400_s7  ;;  %v1333_v44 = vpop.permute.xlu1 %1332  ;;  %v6288_v12 = vld [vmem:[#allocation75_spill] sm:$0xff]  ;;  %v6290_v59 = vld [vmem:[#allocation29_spill] sm:$0xff] }
 0x323   : > { %v1034_v2 = vsel %vm6280_vm8, %v6276_v14, %v6279_v55  ;;  %v1041_v25 = vmul.f32 %v1033_v46, %v6281_v7  ;;  %v1070_v6 = vsel %vm6285_vm9, %v6284_v32, %v6283_v49  ;;  %vm6287_vm3 = vmmov %vm6285_vm9  ;;  %v6289_v61 = vld [vmem:[#allocation111_spill] sm:$0xff]  ;;  %v6291_v60 = vld [vmem:[#allocation36_spill] sm:$0xff]  ;;  %vm6292_vm7 = vcmask 998400   ;;  %v1372_v14 = vpop.permute.xlu0 %1371 }
 0x324   : > { %v1042_v24 = vmul.f32 %v1034_v2, %v6282_v26  ;;  %v1071_v21 = vsel %vm6287_vm3, %v6283_v49, %v6286_v33  ;;  %v1921_v3 = vadd.f32 %v1917_v58, %v1884_v54  ;;  %v1078_v36 = vmul.f32 %v1070_v6, %v6288_v12  ;;  %v6293_v55 = vld [vmem:[#allocation105_spill] sm:$0xff]  ;;  %vm6294_vm8 = vmmov %vm6292_vm7  ;;  %v6295_v7 = vld [vmem:[#allocation40_spill] sm:$0xff] }
 0x325   : > { %v1079_v29 = vmul.f32 %v1071_v21, %v6289_v61  ;;  %v1107_v28 = vsel %vm6292_vm7, %v6291_v60, %v6290_v59  ;;  %v1045_v23 = vadd.f32 %v1041_v25, %v1008_v37  ;;  %v1108_v2 = vsel %vm6294_vm8, %v6290_v59, %v6293_v55  ;;  %2132 = vrot.lane.b32.xlu1 %v4782_v39, %s3400_s7  ;;  %v6296_v54 = vld [vmem:[#allocation25_spill] sm:$0xff]  ;;  %v6298_v33 = vld [vmem:[#allocation19_spill] sm:$0xff]  ;;  %v6299_v21 = vld [vmem:[#allocation78_spill] sm:$0xff] }
 0x326   : > { %v1046_v46 = vadd.f32 %v1042_v24, %v1009_v27  ;;  %v1115_v26 = vmul.f32 %v1107_v28, %v6295_v7  ;;  %v5119_v58 = vadd.f32 %v1959_v11, %v1921_v3  ;;  %v1116_v49 = vmul.f32 %v1108_v2, %v6296_v54  ;;  %v6297_v32 = vld [vmem:[#allocation37_spill] sm:$0xff]  ;;  %v5128_v27 = vld [vmem:[#allocation2 + $0x28] sm:$0xff]  ;;  %v1370_v61 = vpop.permute.xlu1 %1369  ;;  %v6301_v59 = vld [vmem:[#allocation38_spill] sm:$0xff] }
 0x327   : > { %v1152_v6 = vsel %vm1149_vm13, %v6297_v32, %v4934_v9  ;;  %v1153_v37 = vsel %vm1149_vm13, %v4934_v9, %v6298_v33  ;;  %2134 = vrot.lane.b32.xlu0 %v5128_v27, %s3400_s7  ;;  %v1082_v25 = vadd.f32 %v1078_v36, %v1045_v23  ;;  %v6300_v3 = vld [vmem:[#allocation68_spill] sm:$0xff]  ;;  %vm6302_vm9 = vcmask 908288   ;;  %v6304_v28 = vld [vmem:[#allocation41_spill] sm:$0xff]  ;;  %v6309_v33 = vld [vmem:[#allocation82_spill] sm:$0xff] }
 0x328   : > { %v1083_v24 = vadd.f32 %v1079_v29, %v1046_v46  ;;  %v1160_v11 = vmul.f32 %v1152_v6, %v6299_v21  ;;  %v1161_v12 = vmul.f32 %v1153_v37, %v6300_v3  ;;  %v1191_v60 = vsel %vm6302_vm9, %v6301_v59, %v4974_v19  ;;  %vm6303_vm3 = vmmov %vm6302_vm9  ;;  %v1415_v29 = vpop.permute.xlu0 %1414  ;;  %v6305_v2 = vld [vmem:[#allocation112_spill] sm:$0xff]  ;;  %v6306_v54 = vld [vmem:[#allocation77_spill] sm:$0xff] }
 0x329   : > { %v1192_v9 = vsel %vm6303_vm3, %v4974_v19, %v4941_v51  ;;  %v1228_v55 = vsel %vm1225_vm15, %v6304_v28, %v5013_v48  ;;  %v1229_v36 = vsel %vm1225_vm15, %v5013_v48, %v4980_v4  ;;  %v1119_v23 = vadd.f32 %v1115_v26, %v1082_v25  ;;  %2124 = vrot.lane.b32.xlu1 %v4680_v17, %s3400_s7  ;;  %v6307_v51 = vld [vmem:[#allocation44_spill] sm:$0xff]  ;;  %v6308_v26 = vld [vmem:[#allocation42_spill] sm:$0xff] }
 0x32a   : > { %v1120_v46 = vadd.f32 %v1116_v49, %v1083_v24  ;;  %v1199_v7 = vmul.f32 %v1191_v60, %v6305_v2  ;;  %v1200_v32 = vmul.f32 %v1192_v9, %v6306_v54  ;;  %v1265_v19 = vsel %vm1262_vm1, %v6307_v51, %v5050_v22  ;;  %v1413_v25 = vpop.permute.xlu1 %1412  ;;  %v6310_v24 = vld [vmem:[#allocation47_spill] sm:$0xff]  ;;  %v6311_v60 = vld [vmem:[#allocation70_spill] sm:$0xff] }
 0x32b   : > { %v1266_v6 = vsel %vm1262_vm1, %v5050_v22, %v5021_v40  ;;  %2130 = vrot.lane.b32.xlu0 %v4769_v30, %s3400_s7  ;;  %v1164_v4 = vadd.f32 %v1160_v11, %v1119_v23  ;;  %v1236_v49 = vmul.f32 %v1228_v55, %v6308_v26  ;;  %v1237_v37 = vmul.f32 %v1229_v36, %v6309_v33  ;;  %v6312_v11 = vld [vmem:[#allocation84_spill] sm:$0xff]  ;;  %v6313_v28 = vld [vmem:[#allocation50_spill] sm:$0xff]  ;;  %v6314_v23 = vld [vmem:[#allocation81_spill] sm:$0xff]  ;;  %s6401_s7 = sld [smem:[#allocation135_spill]] }
 0x32c   : > { %v1165_v48 = vadd.f32 %v1161_v12, %v1120_v46  ;;  %v1302_v21 = vsel %vm1299_vm2, %v6310_v24, %v5078_v52  ;;  %v1303_v3 = vsel %vm1299_vm2, %v5078_v52, %v5054_v42  ;;  %v1452_v59 = vpop.permute.xlu0 %1451  ;;  %v1273_v9 = vmul.f32 %v1265_v19, %v6311_v60  ;;  %v6315_v2 = vld [vmem:[#allocation90_spill] sm:$0xff]  ;;  %v6317_v26 = vld [vmem:[#allocation43_spill] sm:$0xff] }
 0x32d   : > { %v1203_v40 = vadd.f32 %v1199_v7, %v1164_v4  ;;  %v1274_v12 = vmul.f32 %v1266_v6, %v6312_v11  ;;  %2163 = vrot.lane.b32.xlu1 %v4734_v38, %s3401_s8  ;;  %v1339_v55 = vsel %vm1336_vm4, %v6313_v28, %v1333_v44  ;;  %v1340_v36 = vsel %vm1336_vm4, %v1333_v44, %v5082_v62  ;;  %v6318_v44 = vld [vmem:[#allocation114_spill] sm:$0xff] }
 0x32e   : > { %v1204_v22 = vadd.f32 %v1200_v32, %v1165_v48  ;;  %v1310_v46 = vmul.f32 %v1302_v21, %v6314_v23  ;;  %v1311_v7 = vmul.f32 %v1303_v3, %v6315_v2  ;;  %v1450_v54 = vpop.permute.xlu1 %1449  ;;  %v6316_v32 = vld [vmem:[#allocation51_spill] sm:$0xff]  ;;  %v1377_v19 = vsel %vm1373_vm5, %v1370_v61, %v1372_v14  ;;  %v6327_v23 = vld [vmem:[#allocation54_spill] sm:$0xff] }
 0x32f   : > { %2165 = vrot.lane.b32.xlu0 %v4744_v20, %s3401_s8  ;;  %v1240_v42 = vadd.f32 %v1236_v49, %v1203_v40  ;;  %v1376_v51 = vsel %vm1373_vm5, %v6316_v32, %v1370_v61  ;;  %v1347_v62 = vmul.f32 %v1339_v55, %v6317_v26  ;;  %v1348_v33 = vmul.f32 %v1340_v36, %v6318_v44  ;;  %v6319_v49 = vld [vmem:[#allocation52_spill] sm:$0xff]  ;;  %v6320_v61 = vld [vmem:[#allocation45_spill] sm:$0xff] }
 0x330   : > { %v1241_v52 = vadd.f32 %v1237_v37, %v1204_v22  ;;  %v1491_v6 = vpop.permute.xlu0 %1490  ;;  %v1419_v37 = vsel %vm1416_vm6, %v6319_v49, %v1413_v25  ;;  %v1420_v24 = vsel %vm1416_vm6, %v1413_v25, %v1415_v29  ;;  %v1384_v3 = vmul.f32 %v1376_v51, %v6320_v61  ;;  %v6321_v40 = vld [vmem:[#allocation116_spill] sm:$0xff]  ;;  %v6326_v25 = vld [vmem:[#allocation117_spill] sm:$0xff]  ;;  %v6331_v51 = vld [vmem:[#allocation118_spill] sm:$0xff] }
 0x331   : > { %v1277_v4 = vadd.f32 %v1273_v9, %v1240_v42  ;;  %2169 = vrot.lane.b32.xlu1 %v4782_v39, %s3401_s8  ;;  %v1385_v22 = vmul.f32 %v1377_v19, %v6321_v40  ;;  %v6322_v9 = vld [vmem:[#allocation53_spill] sm:$0xff]  ;;  %vm6323_vm13 = vcmask 777216   ;;  %v6325_v42 = vld [vmem:[#allocation27_spill] sm:$0xff]  ;;  %vm6328_vm1 = vcmask 769024  }
 0x332   : > { %v1278_v48 = vadd.f32 %v1274_v12, %v1241_v52  ;;  %v1489_v60 = vpop.permute.xlu1 %1488  ;;  %v1456_v11 = vsel %vm6323_vm13, %v6322_v9, %v1450_v54  ;;  %vm6324_vm15 = vmmov %vm6323_vm13  ;;  %v1427_v29 = vmul.f32 %v1419_v37, %v6325_v42  ;;  %v1428_v52 = vmul.f32 %v1420_v24, %v6326_v25  ;;  %v6335_v37 = vld [vmem:[#allocation120_spill] sm:$0xff]  ;;  %v6336_v24 = vld [vmem:[#allocation101_spill] sm:$0xff] }
 0x333   : > { %2171 = vrot.lane.b32.xlu0 %v5128_v27, %s3401_s8  ;;  %v1314_v21 = vadd.f32 %v1310_v46, %v1277_v4  ;;  %v1457_v12 = vsel %vm6324_vm15, %v1450_v54, %v1452_v59  ;;  %v1495_v46 = vsel %vm6328_vm1, %v6327_v23, %v1489_v60  ;;  %vm6329_vm2 = vmmov %vm6328_vm1  ;;  %v6330_v54 = vld [vmem:[#allocation115_spill] sm:$0xff]  ;;  %vm6333_vm4 = vcmask 760832  }
 0x334   : > { %v1315_v14 = vadd.f32 %v1311_v7, %v1278_v48  ;;  %v1528_v28 = vpop.permute.xlu0 %1527  ;;  %v1496_v2 = vsel %vm6329_vm2, %v1489_v60, %v1491_v6  ;;  %v1464_v32 = vmul.f32 %v1456_v11, %v6330_v54  ;;  %v1465_v19 = vmul.f32 %v1457_v12, %v6331_v51  ;;  %v6332_v48 = vld [vmem:[#allocation55_spill] sm:$0xff]  ;;  %vm6334_vm5 = vmmov %vm6333_vm4  ;;  %v6339_v11 = vld [vmem:[#allocation56_spill] sm:$0xff] }
 0x335   : > { %v1351_v55 = vadd.f32 %v1347_v62, %v1314_v21  ;;  %2161 = vrot.lane.b32.xlu1 %v4680_v17, %s3401_s8  ;;  %v1503_v6 = vmul.f32 %v1495_v46, %v6335_v37  ;;  %v1504_v21 = vmul.f32 %v1496_v2, %v6336_v24  ;;  %vm6340_vm6 = vcmask 752640   ;;  %v6348_v24 = vld [vmem:[#allocation95_spill] sm:$0xff] }
 0x336   : > { %v1352_v36 = vadd.f32 %v1348_v33, %v1315_v14  ;;  %v1526_v4 = vpop.permute.xlu1 %1525  ;;  %vm6341_vm7 = vmmov %vm6340_vm6  ;;  %vm6344_vm8 = vcmask 744448   ;;  %vm6365_vm15 = vcmask 523264   ;;  %vm2023_vm2 = vcmask 506880  }
 0x337   : > { %2167 = vrot.lane.b32.xlu0 %v4769_v30, %s3401_s8  ;;  %v1388_v7 = vadd.f32 %v1384_v3, %v1351_v55  ;;  %v1532_v26 = vsel %vm6333_vm4, %v6332_v48, %v1526_v4  ;;  %v1533_v62 = vsel %vm6334_vm5, %v1526_v4, %v1528_v28  ;;  %v6337_v3 = vld [vmem:[#allocation46_spill] sm:$0xff]  ;;  %vm6345_vm9 = vmmov %vm6344_vm8  ;;  %vm2060_vm4 = vcmask 498688  }
 0x338   : > { %v1389_v59 = vadd.f32 %v1385_v22, %v1352_v36  ;;  %v1565_v44 = vpop.permute.xlu0 %1564  ;;  %v1540_v40 = vmul.f32 %v1532_v26, %v6337_v3  ;;  %v6338_v22 = vld [vmem:[#allocation48_spill] sm:$0xff]  ;;  %v6346_v4 = vld [vmem:[#allocation62_spill] sm:$0xff]  ;;  %vm6366_vm1 = vmmov %vm6365_vm15  ;;  %vm2099_vm5 = vcmask 490496  }
 0x339   : > { %v1431_v33 = vadd.f32 %v1427_v29, %v1388_v7  ;;  %2206 = vrot.lane.b32.xlu1 %v4734_v38, %s3402_s10  ;;  %v1541_v60 = vmul.f32 %v1533_v62, %v6338_v22  ;;  %v6342_v29 = vld [vmem:[#allocation28_spill] sm:$0xff]  ;;  %v6343_v7 = vld [vmem:[#allocation57_spill] sm:$0xff] }
 0x33a   : > { %v1432_v49 = vadd.f32 %v1428_v52, %v1389_v59  ;;  %v1563_v9 = vpop.permute.xlu1 %1562 }
 0x33b   : > { %2208 = vrot.lane.b32.xlu0 %v4744_v20, %s3402_s10  ;;  %v1468_v14 = vadd.f32 %v1464_v32, %v1431_v33  ;;  %v1569_v12 = vsel %vm6340_vm6, %v6339_v11, %v1563_v9  ;;  %v1570_v28 = vsel %vm6341_vm7, %v1563_v9, %v1565_v44  ;;  %v6347_v33 = vld [vmem:[#allocation59_spill] sm:$0xff]  ;;  %v6350_v11 = vld [vmem:[#allocation17_spill] sm:$0xff]  ;;  %vm2136_vm6 = vcmask 482304  }
 0x33c   : > { %v1469_v61 = vadd.f32 %v1465_v19, %v1432_v49  ;;  %v1602_v55 = vpop.permute.xlu0 %1601  ;;  %v1577_v25 = vmul.f32 %v1569_v12, %v6342_v29  ;;  %v1578_v52 = vmul.f32 %v1570_v28, %v4898_v13  ;;  %vm2173_vm7 = vcmask 474112  }
 0x33d   : > { %v1507_v36 = vadd.f32 %v1503_v6, %v1468_v14  ;;  %2212 = vrot.lane.b32.xlu1 %v4782_v39, %s3402_s10 }
 0x33e   : > { %v1508_v42 = vadd.f32 %v1504_v21, %v1469_v61  ;;  %v1600_v2 = vpop.permute.xlu1 %1599 }
 0x33f   : > { %2214 = vrot.lane.b32.xlu0 %v5128_v27, %s3402_s10  ;;  %v1544_v23 = vadd.f32 %v1540_v40, %v1507_v36  ;;  %v1606_v59 = vsel %vm6344_vm8, %v6343_v7, %v1600_v2  ;;  %v1607_v54 = vsel %vm6345_vm9, %v1600_v2, %v1602_v55  ;;  %v6349_v40 = vld [vmem:[#allocation63_spill] sm:$0xff]  ;;  %vm2216_vm8 = vcmask 392192  }
 0x340   : > { %v1545_v46 = vadd.f32 %v1541_v60, %v1508_v42  ;;  %v1639_v32 = vpop.permute.xlu0 %1638  ;;  %v1614_v48 = vmul.f32 %v1606_v59, %v6346_v4  ;;  %v1615_v26 = vmul.f32 %v1607_v54, %v4920_v31  ;;  %v6351_v42 = vld [vmem:[#allocation67_spill] sm:$0xff]  ;;  %vm2253_vm9 = vcmask 384000  }
 0x341   : > { %v1581_v51 = vadd.f32 %v1577_v25, %v1544_v23  ;;  %2204 = vrot.lane.b32.xlu1 %v4680_v17, %s3402_s10  ;;  %v6352_v23 = vld [vmem:[#allocation98_spill] sm:$0xff]  ;;  %v6353_v54 = vld [vmem:[#allocation71_spill] sm:$0xff] }
 0x342   : > { %v1582_v19 = vadd.f32 %v1578_v52, %v1545_v46  ;;  %v1637_v44 = vpop.permute.xlu1 %1636 }
 0x343   : > { %2210 = vrot.lane.b32.xlu0 %v4769_v30, %s3402_s10  ;;  %v1618_v13 = vadd.f32 %v1614_v48, %v1581_v51  ;;  %v1643_v49 = vsel %vm1640_vm14, %v6347_v33, %v1637_v44  ;;  %v1644_v37 = vsel %vm1640_vm14, %v1637_v44, %v1639_v32  ;;  %s6385_s10 = sld [smem:[#allocation133_spill]] }
 0x344   : > { %v1619_v62 = vadd.f32 %v1615_v26, %v1582_v19  ;;  %v1682_v6 = vpop.permute.xlu0 %1681  ;;  %v1651_v21 = vmul.f32 %v1643_v49, %v6348_v24  ;;  %v1652_v14 = vmul.f32 %v1644_v37, %v4939_v10 }
 0x345   : > { %2243 = vrot.lane.b32.xlu1 %v4734_v38, %s3403_s11 }
 0x346   : > { %v1655_v31 = vadd.f32 %v1651_v21, %v1618_v13  ;;  %v1656_v61 = vadd.f32 %v1652_v14, %v1619_v62  ;;  %v1680_v3 = vpop.permute.xlu1 %1679  ;;  %v6356_v62 = vld [vmem:[#allocation94_spill] sm:$0xff]  ;;  %v6359_v21 = vld [vmem:[#allocation96_spill] sm:$0xff] }
 0x347   : > { %2245 = vrot.lane.b32.xlu0 %v4744_v20, %s3403_s11  ;;  %v1686_v22 = vsel %vm1683_vm0, %v6349_v40, %v1680_v3  ;;  %v1687_v60 = vsel %vm1683_vm0, %v1680_v3, %v1682_v6  ;;  %vm6354_vm0 = vcmask 637952  }
 0x348   : > { %v1719_v9 = vpop.permute.xlu0 %1718  ;;  %v1694_v12 = vmul.f32 %v1686_v22, %v6350_v11  ;;  %v1695_v28 = vmul.f32 %v1687_v60, %v4946_v34  ;;  %vm6355_vm14 = vmmov %vm6354_vm0  ;;  %v6360_v60 = vld [vmem:[#allocation104_spill] sm:$0xff] }
 0x349   : > { %2249 = vrot.lane.b32.xlu1 %v4782_v39, %s3403_s11 }
 0x34a   : > { %v1698_v10 = vadd.f32 %v1694_v12, %v1655_v31  ;;  %v1699_v55 = vadd.f32 %v1695_v28, %v1656_v61  ;;  %v1717_v36 = vpop.permute.xlu1 %1716 }
 0x34b   : > { %2251 = vrot.lane.b32.xlu0 %v5128_v27, %s3403_s11  ;;  %v1723_v29 = vsel %vm1720_vm10, %v6351_v42, %v1717_v36  ;;  %v1724_v25 = vsel %vm1720_vm10, %v1717_v36, %v1719_v9  ;;  %vm6357_vm10 = vcmask 629760   ;;  %v6361_v36 = vld [vmem:[#allocation74_spill] sm:$0xff] }
 0x34c   : > { %v1756_v52 = vpop.permute.xlu0 %1755  ;;  %v1731_v46 = vmul.f32 %v1723_v29, %v6352_v23  ;;  %v1732_v2 = vmul.f32 %v1724_v25, %v4949_v41  ;;  %vm6358_vm3 = vmmov %vm6357_vm10 }
 0x34d   : > { %2241 = vrot.lane.b32.xlu1 %v4680_v17, %s3403_s11 }
 0x34e   : > { %v1735_v34 = vadd.f32 %v1731_v46, %v1698_v10  ;;  %v1736_v7 = vadd.f32 %v1732_v2, %v1699_v55  ;;  %v1754_v59 = vpop.permute.xlu1 %1753  ;;  %v6364_v2 = vld [vmem:[#allocation76_spill] sm:$0xff] }
 0x34f   : > { %2247 = vrot.lane.b32.xlu0 %v4769_v30, %s3403_s11  ;;  %v1760_v32 = vsel %vm6354_vm0, %v6353_v54, %v1754_v59  ;;  %v1761_v51 = vsel %vm6355_vm14, %v1754_v59, %v1756_v52  ;;  %v6367_v54 = vld [vmem:[#allocation89_spill] sm:$0xff]  ;;  %vm2290_vm0 = vcmask 375808   ;;  %vm2327_vm14 = vcmask 367616  }
 0x350   : > { %v1795_v19 = vpop.permute.xlu0 %1794  ;;  %v1768_v4 = vmul.f32 %v1760_v32, %v4930_v57  ;;  %v1769_v48 = vmul.f32 %v1761_v51, %v4952_v53  ;;  %v1973_v32 = vrot.slane %v5007_v18, %v6367_v54  ;;  %v6368_v51 = vld [vmem:[#allocation66_spill] sm:$0xff] }
 0x351   : > { %2280 = vrot.lane.b32.xlu1 %v4734_v38, %s3404_s12 }
 0x352   : > { %v1772_v41 = vadd.f32 %v1768_v4, %v1735_v34  ;;  %v1773_v26 = vadd.f32 %v1769_v48, %v1736_v7  ;;  %v1793_v13 = vpop.permute.xlu1 %1792 }
 0x353   : > { %2282 = vrot.lane.b32.xlu0 %v4744_v20, %s3404_s12  ;;  %v1799_v44 = vsel %vm6357_vm10, %v6356_v62, %v1793_v13  ;;  %v1800_v33 = vsel %vm6358_vm3, %v1793_v13, %v1795_v19  ;;  %vm2364_vm10 = vcmask 359424   ;;  %vm2403_vm3 = vcmask 351232  }
 0x354   : > { %v1832_v49 = vpop.permute.xlu0 %1831  ;;  %v1807_v37 = vmul.f32 %v1799_v44, %v4965_v5  ;;  %v1808_v57 = vmul.f32 %v1800_v33, %v4997_v43  ;;  %v1969_v33 = vrot.slane %v4972_v50, %v6367_v54 }
 0x355   : > { %2286 = vrot.lane.b32.xlu1 %v4782_v39, %s3404_s12 }
 0x356   : > { %v1811_v53 = vadd.f32 %v1807_v37, %v1772_v41  ;;  %v1812_v6 = vadd.f32 %v1808_v57, %v1773_v26  ;;  %v1830_v24 = vpop.permute.xlu1 %1829 }
 0x357   : > { %2288 = vrot.lane.b32.xlu0 %v5128_v27, %s3404_s12  ;;  %v1836_v14 = vsel %vm1833_vm11, %v6359_v21, %v1830_v24  ;;  %v1837_v31 = vsel %vm1833_vm11, %v1830_v24, %v1832_v49  ;;  %vm6362_vm11 = vcmask 605184  }
 0x358   : > { %v1869_v61 = vpop.permute.xlu0 %1868  ;;  %v1844_v3 = vmul.f32 %v1836_v14, %v4968_v15  ;;  %v1845_v40 = vmul.f32 %v1837_v31, %v5016_v1  ;;  %vm6363_vm13 = vmmov %vm6362_vm11 }
 0x359   : > { %2278 = vrot.lane.b32.xlu1 %v4680_v17, %s3404_s12 }
 0x35a   : > { %v1848_v5 = vadd.f32 %v1844_v3, %v1811_v53  ;;  %v1849_v43 = vadd.f32 %v1845_v40, %v1812_v6  ;;  %v1867_v22 = vpop.permute.xlu1 %1866 }
 0x35b   : > { %2284 = vrot.lane.b32.xlu0 %v4769_v30, %s3404_s12  ;;  %v1873_v9 = vsel %vm1870_vm12, %v6360_v60, %v1867_v22  ;;  %v1874_v11 = vsel %vm1870_vm12, %v1867_v22, %v1869_v61  ;;  %vm1986_vm12 = vcmask 515072   ;;  %v6369_v61 = vld [vmem:[#allocation92_spill] sm:$0xff] }
 0x35c   : > { %v1906_v12 = vpop.permute.xlu0 %1905  ;;  %v1881_v28 = vmul.f32 %v1873_v9, %v4989_v63  ;;  %v1882_v10 = vmul.f32 %v1874_v11, %v5019_v56  ;;  %v2010_v3 = vrot.slane %v5007_v18, %v6369_v61 }
 0x35d   : > { %2317 = vrot.lane.b32.xlu1 %v4734_v38, %s3405_s13 }
 0x35e   : > { %v1885_v15 = vadd.f32 %v1881_v28, %v1848_v5  ;;  %v1886_v1 = vadd.f32 %v1882_v10, %v1849_v43  ;;  %v1904_v55 = vpop.permute.xlu1 %1903 }
 0x35f   : > { %2319 = vrot.lane.b32.xlu0 %v4744_v20, %s3405_s13  ;;  %v1910_v42 = vsel %vm6362_vm11, %v6361_v36, %v1904_v55  ;;  %v1911_v29 = vsel %vm6363_vm13, %v1904_v55, %v1906_v12  ;;  %v2006_v12 = vrot.slane %v4972_v50, %v6369_v61  ;;  %vm2440_vm11 = vcmask 343040  }
 0x360   : > { %v1949_v25 = vpop.permute.xlu0 %1948  ;;  %v1918_v52 = vmul.f32 %v1910_v42, %v4994_v45  ;;  %v1919_v63 = vmul.f32 %v1911_v29, %v5024_v16  ;;  %vm2483_vm13 = vcmask 261120  }
 0x361   : > { %2323 = vrot.lane.b32.xlu1 %v4782_v39, %s3405_s13 }
 0x362   : > { %v1922_v56 = vadd.f32 %v1918_v52, %v1885_v15  ;;  %v1923_v23 = vadd.f32 %v1919_v63, %v1886_v1  ;;  %v1947_v46 = vpop.permute.xlu1 %1946  ;;  %v6370_v63 = vld [vmem:[#allocation93_spill] sm:$0xff] }
 0x363   : > { %2325 = vrot.lane.b32.xlu0 %v5128_v27, %s3405_s13  ;;  %v1952_v34 = vsel %vm6365_vm15, %v6364_v2, %v1947_v46  ;;  %v1953_v7 = vsel %vm6366_vm1, %v1947_v46, %v1949_v25  ;;  %vm2557_vm15 = vcmask 244736   ;;  %vm2594_vm1 = vcmask 236544  }
 0x364   : > { %v1979_v59 = vpop.permute.xlu0 %1978  ;;  %v1960_v45 = vmul.f32 %v1952_v34, %v5011_v8  ;;  %v1961_v16 = vmul.f32 %v1953_v7, %v5060_v47  ;;  %v6371_v34 = vld [vmem:[#allocation20_spill] sm:$0xff]  ;;  %v6372_v7 = vld [vmem:[#allocation113_spill] sm:$0xff] }
 0x365   : > { %v1988_v19 = vsel %vm1986_vm12, %v6368_v51, %v1979_v59  ;;  %2315 = vrot.lane.b32.xlu1 %v4680_v17, %s3405_s13  ;;  %v5329_v59 = vadd.f32 %v6372_v7, %v6371_v34  ;;  %v5381_v7 = vld [vmem:[#allocation2 + $0x10] sm:$0xff] }
 0x366   : > { %v1996_v4 = vmul.f32 %v1988_v19, %v1973_v32  ;;  %v1964_v48 = vadd.f32 %v1960_v45, %v1922_v56  ;;  %v1965_v41 = vadd.f32 %v1961_v16, %v1923_v23  ;;  %v1983_v26 = vpop.permute.xlu1 %1982  ;;  %v2047_v56 = vrot.slane %v5007_v18, %v6370_v63  ;;  %v6373_v19 = vld [vmem:[#allocation83_spill] sm:$0xff] }
 0x367   : > { %2321 = vrot.lane.b32.xlu0 %v4769_v30, %s3405_s13  ;;  %s3416_s13 = smov [#allocation4]  }
 0x368   : > { %v2000_v13 = vadd.f32 %v1996_v4, %v5119_v58  ;;  %v1985_v62 = vpop.permute.xlu0 %1984  ;;  %v6374_v4 = vrot.slane %v6373_v19, 4 }
 0x369   : > { %v1990_v44 = vsel %vm1986_vm12, %v1983_v26, %v1985_v62  ;;  %2354 = vrot.lane.b32.xlu1 %v4734_v38, %s3406_s15 }
 0x36a   : > { %v1998_v8 = vmul.f32 %v1990_v44, %v1973_v32  ;;  %v1975_v47 = vpop.permute.xlu1 %1974 }
 0x36b   : > { %2356 = vrot.lane.b32.xlu0 %v4744_v20, %s3406_s15  ;;  %v1987_v37 = vsel %vm1986_vm12, %v1975_v47, %v6368_v51 }
 0x36c   : > { %v2002_v49 = vadd.f32 %v1998_v8, %v1965_v41  ;;  %v1981_v57 = vpop.permute.xlu0 %1980  ;;  %v1995_v53 = vmul.f32 %v1987_v37, %v1969_v33 }
 0x36d   : > { %v1989_v58 = vsel %vm1986_vm12, %v1981_v57, %v1983_v26  ;;  %2360 = vrot.lane.b32.xlu1 %v4782_v39, %s3406_s15  ;;  %vm2520_vm12 = vcmask 252928  }
 0x36e   : > { %v1997_v6 = vmul.f32 %v1989_v58, %v1969_v33  ;;  %v1999_v24 = vadd.f32 %v1995_v53, %v5096_v0  ;;  %v2014_v21 = vpop.permute.xlu1 %2013  ;;  %v6376_v53 = vld [vmem:[#allocation85_spill] sm:$0xff] }
 0x36f   : > { %2362 = vrot.lane.b32.xlu0 %v5128_v27, %s3406_s15 }
 0x370   : > { %v2001_v14 = vadd.f32 %v1997_v6, %v1964_v48  ;;  %v2016_v31 = vpop.permute.xlu0 %2015  ;;  %v5339_v48 = vmul.f32 %v6374_v4, %v5329_v59  ;;  %v5388_v4 = vld [vmem:[#allocation2 + $0x20] sm:$0xff] }
 0x371   : > { %v2025_v40 = vsel %vm2023_vm2, %v2014_v21, %v2016_v31  ;;  %2352 = vrot.lane.b32.xlu1 %v4680_v17, %s3406_s15 }
 0x372   : > { %v2033_v5 = vmul.f32 %v2025_v40, %v2010_v3  ;;  %v2020_v43 = vpop.permute.xlu1 %2019  ;;  %v2086_v58 = vrot.slane %v5339_v48, %v6376_v53 }
 0x373   : > { %2358 = vrot.lane.b32.xlu0 %v4769_v30, %s3406_s15  ;;  %s3305_s15 = sshll.u32 %s3416_s13, 4  ;;  %s3306_s15 = int_to_ptr.vmem [resolvable:$false] %s3305_s15 }
 0x374   : > { %v2037_v22 = vadd.f32 %v2033_v5, %v2000_v13  ;;  %v2022_v60 = vpop.permute.xlu0 %2021 }
 0x375   : > { %v2027_v9 = vsel %vm2023_vm2, %v2020_v43, %v2022_v60  ;;  %2393 = vrot.lane.b32.xlu1 %v4734_v38, %s3407_s18 }
 0x376   : > { %v2035_v0 = vmul.f32 %v2027_v9, %v2010_v3  ;;  %v2012_v11 = vpop.permute.xlu1 %2011 }
 0x377   : > { %2395 = vrot.lane.b32.xlu0 %v4744_v20, %s3407_s18  ;;  %v2024_v10 = vsel %vm2023_vm2, %v2012_v11, %v2014_v21 }
 0x378   : > { %v2039_v28 = vadd.f32 %v2035_v0, %v2002_v49  ;;  %v2018_v15 = vpop.permute.xlu0 %2017  ;;  %v2032_v1 = vmul.f32 %v2024_v10, %v2006_v12 }
 0x379   : > { %v2026_v55 = vsel %vm2023_vm2, %v2018_v15, %v2020_v43  ;;  %2399 = vrot.lane.b32.xlu1 %v4782_v39, %s3407_s18  ;;  %vm2631_vm2 = vcmask 228352  }
 0x37a   : > { %v2034_v36 = vmul.f32 %v2026_v55, %v2006_v12  ;;  %v2036_v42 = vadd.f32 %v2032_v1, %v1999_v24  ;;  %v2051_v29 = vpop.permute.xlu1 %2050  ;;  %v5352_v24 = vld [vmem:[#allocation2] sm:$0xff] }
 0x37b   : > { %2401 = vrot.lane.b32.xlu0 %v5128_v27, %s3407_s18 }
 0x37c   : > { %v2038_v25 = vadd.f32 %v2034_v36, %v2001_v14  ;;  %v2053_v52 = vpop.permute.xlu0 %2052  ;;  %v6377_v14 = vld [vmem:[#allocation73_spill] sm:$0xff]  ;;  %v6379_v36 = vld [vmem:[#allocation86_spill] sm:$0xff] }
 0x37d   : > { %v2062_v23 = vsel %vm2060_vm4, %v2051_v29, %v2053_v52  ;;  %2391 = vrot.lane.b32.xlu1 %v4680_v17, %s3407_s18  ;;  %v2043_v17 = vrot.slane %v4972_v50, %v6370_v63  ;;  %v6375_v50 = vld [vmem:[#allocation79_spill] sm:$0xff]  ;;  %v6378_v31 = vrot.slane %v6377_v14, 4  ;;  %v5374_v52 = vld [vmem:[#allocation2 + $0x18] sm:$0xff] }
 0x37e   : > { %v2070_v46 = vmul.f32 %v2062_v23, %v2047_v56  ;;  %v2057_v2 = vpop.permute.xlu1 %2056  ;;  %v5347_v47 = vadd.f32 %v6375_v50, %v6371_v34 }
 0x37f   : > { %2397 = vrot.lane.b32.xlu0 %v4769_v30, %s3407_s18  ;;  %s3307_s18 = scalar_lea.vmem %s3306_s15, 4096 }
 0x380   : > { %v2074_v32 = vadd.f32 %v2070_v46, %v2037_v22  ;;  %v2059_v45 = vpop.permute.xlu0 %2058  ;;  %v5359_v3 = vmul.f32 %v6378_v31, %v5347_v47 }
 0x381   : > { %v2064_v16 = vsel %vm2060_vm4, %v2057_v2, %v2059_v45  ;;  %2430 = vrot.lane.b32.xlu1 %v4734_v38, %s3408_s19 }
 0x382   : > { %v2072_v18 = vmul.f32 %v2064_v16, %v2047_v56  ;;  %v2119_v45 = vrot.slane %v5359_v3, %v6379_v36 }
 0x383   : > { %2432 = vrot.lane.b32.xlu0 %v4744_v20, %s3408_s19  ;;  %v2049_v51 = vpop.permute.xlu1 %2048 }
 0x384   : > { %v2076_v41 = vadd.f32 %v2072_v18, %v2039_v28  ;;  %v2061_v26 = vsel %vm2060_vm4, %v2049_v51, %v2051_v29  ;;  %v2055_v13 = vpop.permute.xlu0 %2054 }
 0x385   : > { %v2069_v62 = vmul.f32 %v2061_v26, %v2043_v17  ;;  %v2063_v44 = vsel %vm2060_vm4, %v2055_v13, %v2057_v2  ;;  %2436 = vrot.lane.b32.xlu1 %v4782_v39, %s3408_s19  ;;  %v5378_v2 = vld [vmem:[#allocation2 + $0x8] sm:$0xff]  ;;  %vm2668_vm4 = vcmask 220160  }
 0x386   : > { %v2071_v8 = vmul.f32 %v2063_v44, %v2043_v17 }
 0x387   : > { %2438 = vrot.lane.b32.xlu0 %v5128_v27, %s3408_s19  ;;  %v2073_v33 = vadd.f32 %v2069_v62, %v2036_v42  ;;  %v2090_v49 = vpop.permute.xlu1 %2089  ;;  %v2123_v42 = vrot.slane %v5339_v48, %v6379_v36 }
 0x388   : > { %v2075_v37 = vadd.f32 %v2071_v8, %v2038_v25  ;;  %v2092_v57 = vpop.permute.xlu0 %2091  ;;  %v6380_v8 = vld [vmem:[#allocation87_spill] sm:$0xff] }
 0x389   : > { %v2101_v6 = vsel %vm2099_vm5, %v2090_v49, %v2092_v57  ;;  %2428 = vrot.lane.b32.xlu1 %v5352_v24, %s3408_s19  ;;  %v2160_v50 = vrot.slane %v5339_v48, %v6380_v8  ;;  %v5400_v57 = vld [vmem:[%s5804_s14 + $0x8] sm:$0x7f] }
 0x38a   : > { %v2109_v21 = vmul.f32 %v2101_v6, %v2086_v58 }
 0x38b   : > { %2434 = vrot.lane.b32.xlu0 %v4769_v30, %s3408_s19  ;;  %v2096_v40 = vpop.permute.xlu1 %2095  ;;  %v2082_v30 = vrot.slane %v5359_v3, %v6376_v53 }
 0x38c   : > { %v2113_v5 = vadd.f32 %v2109_v21, %v2074_v32  ;;  %v2098_v43 = vpop.permute.xlu0 %2097 }
 0x38d   : > { %v2103_v22 = vsel %vm2099_vm5, %v2096_v40, %v2098_v43  ;;  %2473 = vrot.lane.b32.xlu1 %v4734_v38, %s3409_s22 }
 0x38e   : > { %v2111_v60 = vmul.f32 %v2103_v22, %v2086_v58  ;;  %v2191_v58 = vrot.slane %v5400_v57, 5 }
 0x38f   : > { %2475 = vrot.lane.b32.xlu0 %v4744_v20, %s3409_s22  ;;  %v2088_v9 = vpop.permute.xlu1 %2087 }
 0x390   : > { %v2115_v0 = vadd.f32 %v2111_v60, %v2076_v41  ;;  %v2100_v11 = vsel %vm2099_vm5, %v2088_v9, %v2090_v49  ;;  %v2094_v12 = vpop.permute.xlu0 %2093 }
 0x391   : > { %v2108_v28 = vmul.f32 %v2100_v11, %v2082_v30  ;;  %v2102_v10 = vsel %vm2099_vm5, %v2094_v12, %v2096_v40  ;;  %2479 = vrot.lane.b32.xlu1 %v4782_v39, %s3409_s22  ;;  %v2156_v40 = vrot.slane %v5359_v3, %v6380_v8  ;;  %v5420_v3 = vld [vmem:[%s5804_s14] sm:$0x7f]  ;;  %vm2707_vm5 = vcmask 211968  }
 0x392   : > { %v2110_v15 = vmul.f32 %v2102_v10, %v2082_v30 }
 0x393   : > { %2481 = vrot.lane.b32.xlu0 %v5128_v27, %s3409_s22  ;;  %v2112_v38 = vadd.f32 %v2108_v28, %v2073_v33  ;;  %v2127_v1 = vpop.permute.xlu1 %2126 }
 0x394   : > { %v2114_v20 = vadd.f32 %v2110_v15, %v2075_v37  ;;  %v2129_v55 = vpop.permute.xlu0 %2128  ;;  %v6381_v15 = vld [vmem:[#allocation88_spill] sm:$0xff] }
 0x395   : > { %v2138_v29 = vsel %vm2136_vm6, %v2127_v1, %v2129_v55  ;;  %2471 = vrot.lane.b32.xlu1 %v5352_v24, %s3409_s22 }
 0x396   : > { %v2146_v25 = vmul.f32 %v2138_v29, %v2123_v42 }
 0x397   : > { %2477 = vrot.lane.b32.xlu0 %v5374_v52, %s3409_s22  ;;  %v2133_v39 = vpop.permute.xlu1 %2132  ;;  %s6391_s22 = sld [smem:[#allocation132_spill]] }
 0x398   : > { %v2150_v56 = vadd.f32 %v2146_v25, %v2113_v5  ;;  %v5411_v5 = vmul.f32 %v2191_v58, %v5329_v59  ;;  %v2190_v59 = vrot.slane %v5420_v3, 5 }
 0x399   : > { %v2135_v23 = vpop.permute.xlu0 %2134  ;;  %2510 = vrot.lane.b32.xlu1 %v5378_v2, %s3410_s28 }
 0x39a   : > { %v2140_v46 = vsel %vm2136_vm6, %v2133_v39, %v2135_v23  ;;  %v5431_v55 = vmul.f32 %v2190_v59, %v5347_v47 }
 0x39b   : > { %v2148_v34 = vmul.f32 %v2140_v46, %v2123_v42  ;;  %2512 = vrot.lane.b32.xlu0 %v5381_v7, %s3410_s28  ;;  %v2125_v32 = vpop.permute.xlu1 %2124 }
 0x39c   : > { %v2137_v18 = vsel %vm2136_vm6, %v2125_v32, %v2127_v1  ;;  %v2199_v46 = vrot.slane %v5431_v55, %v6381_v15 }
 0x39d   : > { %v2152_v16 = vadd.f32 %v2148_v34, %v2115_v0  ;;  %v2131_v51 = vpop.permute.xlu0 %2130  ;;  %v2145_v17 = vmul.f32 %v2137_v18, %v2119_v45  ;;  %2516 = vrot.lane.b32.xlu1 %v5388_v4, %s3410_s28 }
 0x39e   : > { %v2139_v19 = vsel %vm2136_vm6, %v2131_v51, %v2133_v39  ;;  %vm6392_vm6 = vcmask 130048  }
 0x39f   : > { %v2147_v41 = vmul.f32 %v2139_v19, %v2119_v45  ;;  %2518 = vrot.lane.b32.xlu0 %v5128_v27, %s3410_s28  ;;  %v2149_v26 = vadd.f32 %v2145_v17, %v2112_v38  ;;  %v2164_v13 = vpop.permute.xlu1 %2163  ;;  %v2203_v38 = vrot.slane %v5411_v5, %v6381_v15 }
 0x3a1   : > { %v2151_v62 = vadd.f32 %v2147_v41, %v2114_v20  ;;  %v2166_v44 = vpop.permute.xlu0 %2165  ;;  %2508 = vrot.lane.b32.xlu1 %v5352_v24, %s3410_s28 }
 0x3a2   : > { %v2175_v33 = vsel %vm2173_vm7, %v2164_v13, %v2166_v44 }
 0x3a3   : > { %v2183_v49 = vmul.f32 %v2175_v33, %v2160_v50  ;;  %2514 = vrot.lane.b32.xlu0 %v5374_v52, %s3410_s28  ;;  %v2170_v37 = vpop.permute.xlu1 %2169 }
 0x3a5   : > { %v2187_v6 = vadd.f32 %v2183_v49, %v2150_v56  ;;  %v2172_v21 = vpop.permute.xlu0 %2171  ;;  %2547 = vrot.lane.b32.xlu1 %v5378_v2, %s3411_s21 }
 0x3a6   : > { %v2177_v14 = vsel %vm2173_vm7, %v2170_v37, %v2172_v21  ;;  %v2236_v21 = vrot.slane %v5431_v55, %v4272_v35 }
 0x3a7   : > { %v2185_v48 = vmul.f32 %v2177_v14, %v2160_v50  ;;  %2549 = vrot.lane.b32.xlu0 %v5381_v7, %s3411_s21  ;;  %v2162_v31 = vpop.permute.xlu1 %2161 }
 0x3a8   : > { %v2174_v22 = vsel %vm2173_vm7, %v2162_v31, %v2164_v13 }
 0x3a9   : > { %v2189_v43 = vadd.f32 %v2185_v48, %v2152_v16  ;;  %v2168_v60 = vpop.permute.xlu0 %2167  ;;  %v2182_v9 = vmul.f32 %v2174_v22, %v2156_v40  ;;  %2553 = vrot.lane.b32.xlu1 %v5388_v4, %s3411_s21 }
 0x3aa   : > { %v2176_v30 = vsel %vm2173_vm7, %v2168_v60, %v2170_v37  ;;  %vm6394_vm7 = vmmov %vm6392_vm6 }
 0x3ab   : > { %v2184_v0 = vmul.f32 %v2176_v30, %v2156_v40  ;;  %2555 = vrot.lane.b32.xlu0 %v5128_v27, %s3411_s21  ;;  %v2186_v11 = vadd.f32 %v2182_v9, %v2149_v26  ;;  %v2207_v12 = vpop.permute.xlu1 %2206  ;;  %v2240_v26 = vrot.slane %v5411_v5, %v4272_v35 }
 0x3ad   : > { %v2188_v28 = vadd.f32 %v2184_v0, %v2151_v62  ;;  %v2209_v10 = vpop.permute.xlu0 %2208  ;;  %2545 = vrot.lane.b32.xlu1 %v5352_v24, %s3411_s21 }
 0x3ae   : > { %v2218_v1 = vsel %vm2216_vm8, %v2207_v12, %v2209_v10 }
 0x3af   : > { %v2226_v20 = vmul.f32 %v2218_v1, %v2203_v38  ;;  %2551 = vrot.lane.b32.xlu0 %v5374_v52, %s3411_s21  ;;  %v2213_v42 = vpop.permute.xlu1 %2212 }
 0x3b1   : > { %v2230_v29 = vadd.f32 %v2226_v20, %v2187_v6  ;;  %v2215_v25 = vpop.permute.xlu0 %2214  ;;  %2584 = vrot.lane.b32.xlu1 %v5378_v2, %s3412_s25 }
 0x3b2   : > { %v2220_v39 = vsel %vm2216_vm8, %v2213_v42, %v2215_v25  ;;  %v2273_v25 = vrot.slane %v5431_v55, %v6367_v54 }
 0x3b3   : > { %v2228_v56 = vmul.f32 %v2220_v39, %v2203_v38  ;;  %2586 = vrot.lane.b32.xlu0 %v5381_v7, %s3412_s25  ;;  %v2205_v23 = vpop.permute.xlu1 %2204 }
 0x3b4   : > { %v2217_v32 = vsel %vm2216_vm8, %v2205_v23, %v2207_v12 }
 0x3b5   : > { %v2232_v34 = vadd.f32 %v2228_v56, %v2189_v43  ;;  %v2211_v47 = vpop.permute.xlu0 %2210  ;;  %v2225_v45 = vmul.f32 %v2217_v32, %v2199_v46  ;;  %2590 = vrot.lane.b32.xlu1 %v5388_v4, %s3412_s25 }
 0x3b6   : > { %v2219_v16 = vsel %vm2216_vm8, %v2211_v47, %v2213_v42  ;;  %v2724_v47 = vld [vmem:[%s5799_s9] sm:$0xff]  ;;  %vm6396_vm8 = vmmov %vm6392_vm6 }
 0x3b7   : > { %v2227_v18 = vmul.f32 %v2219_v16, %v2199_v46  ;;  %2592 = vrot.lane.b32.xlu0 %v5128_v27, %s3412_s25  ;;  %v2229_v51 = vadd.f32 %v2225_v45, %v2186_v11  ;;  %v2244_v17 = vpop.permute.xlu1 %2243  ;;  %v2277_v11 = vrot.slane %v5411_v5, %v6367_v54 }
 0x3b9   : > { %v2231_v19 = vadd.f32 %v2227_v18, %v2188_v28  ;;  %v2246_v41 = vpop.permute.xlu0 %2245  ;;  %2582 = vrot.lane.b32.xlu1 %v5352_v24, %s3412_s25  ;;  %v2725_v18 = vld [vmem:[%s5799_s9 + $0x8] sm:$0xff] }
 0x3ba   : > { %v2255_v13 = vsel %vm2253_vm9, %v2244_v17, %v2246_v41 }
 0x3bb   : > { %v2263_v62 = vmul.f32 %v2255_v13, %v2240_v26  ;;  %2588 = vrot.lane.b32.xlu0 %v5374_v52, %s3412_s25  ;;  %v2250_v44 = vpop.permute.xlu1 %2249 }
 0x3bd   : > { %v2267_v50 = vadd.f32 %v2263_v62, %v2230_v29  ;;  %v2252_v33 = vpop.permute.xlu0 %2251  ;;  %2621 = vrot.lane.b32.xlu1 %v5378_v2, %s3413_s26 }
 0x3be   : > { %v2257_v49 = vsel %vm2253_vm9, %v2250_v44, %v2252_v33 }
 0x3bf   : > { %v2265_v37 = vmul.f32 %v2257_v49, %v2240_v26  ;;  %2623 = vrot.lane.b32.xlu0 %v5381_v7, %s3413_s26  ;;  %v2242_v6 = vpop.permute.xlu1 %2241 }
 0x3c0   : > { %v2254_v48 = vsel %vm2253_vm9, %v2242_v6, %v2244_v17 }
 0x3c1   : > { %v2269_v14 = vadd.f32 %v2265_v37, %v2232_v34  ;;  %v2248_v31 = vpop.permute.xlu0 %2247  ;;  %v2262_v40 = vmul.f32 %v2254_v48, %v2236_v21  ;;  %2627 = vrot.lane.b32.xlu1 %v5388_v4, %s3413_s26  ;;  %v2310_v37 = vrot.slane %v5431_v55, %v6369_v61 }
 0x3c2   : > { %v2256_v43 = vsel %vm2253_vm9, %v2248_v31, %v2250_v44  ;;  %vm6398_vm9 = vmmov %vm6392_vm6 }
 0x3c3   : > { %v2264_v22 = vmul.f32 %v2256_v43, %v2236_v21  ;;  %2629 = vrot.lane.b32.xlu0 %v5128_v27, %s3413_s26  ;;  %v2266_v60 = vadd.f32 %v2262_v40, %v2229_v51  ;;  %v2281_v9 = vpop.permute.xlu1 %2280 }
 0x3c5   : > { %v2268_v30 = vadd.f32 %v2264_v22, %v2231_v19  ;;  %v2283_v0 = vpop.permute.xlu0 %2282  ;;  %2619 = vrot.lane.b32.xlu1 %v5352_v24, %s3413_s26  ;;  %v2314_v19 = vrot.slane %v5411_v5, %v6369_v61 }
 0x3c6   : > { %v2292_v12 = vsel %vm2290_vm0, %v2281_v9, %v2283_v0 }
 0x3c7   : > { %v2300_v28 = vmul.f32 %v2292_v12, %v2277_v11  ;;  %2625 = vrot.lane.b32.xlu0 %v5374_v52, %s3413_s26  ;;  %v2287_v10 = vpop.permute.xlu1 %2286  ;;  %v2727_v12 = vld [vmem:[%s6382_s4 + $0x8] sm:$0xff]  ;;  %s6397_s26 = sld [smem:[#allocation16_spill]] }
 0x3c9   : > { %v2304_v38 = vadd.f32 %v2300_v28, %v2267_v50  ;;  %v2289_v1 = vpop.permute.xlu0 %2288  ;;  %2658 = vrot.lane.b32.xlu1 %v5378_v2, %s3414_s30  ;;  %v6383_v28 = vld [vmem:[#allocation21_spill] sm:$0xff] }
 0x3ca   : > { %v2294_v20 = vsel %vm2290_vm0, %v2287_v10, %v2289_v1 }
 0x3cb   : > { %v2302_v42 = vmul.f32 %v2294_v20, %v2277_v11  ;;  %2660 = vrot.lane.b32.xlu0 %v5381_v7, %s3414_s30  ;;  %v2279_v29 = vpop.permute.xlu1 %2278 }
 0x3cc   : > { %v2291_v56 = vsel %vm2290_vm0, %v2279_v29, %v2281_v9 }
 0x3cd   : > { %v2306_v39 = vadd.f32 %v2302_v42, %v2269_v14  ;;  %v2285_v23 = vpop.permute.xlu0 %2284  ;;  %v2299_v46 = vmul.f32 %v2291_v56, %v2273_v25  ;;  %2664 = vrot.lane.b32.xlu1 %v5388_v4, %s3414_s30  ;;  %v2347_v42 = vrot.slane %v5431_v55, %v6370_v63  ;;  %v2883_v55 = vld [vmem:[%s6385_s10] sm:$0xff] }
 0x3ce   : > { %v2293_v34 = vsel %vm2290_vm0, %v2285_v23, %v2287_v10 }
 0x3cf   : > { %v2301_v32 = vmul.f32 %v2293_v34, %v2273_v25  ;;  %2666 = vrot.lane.b32.xlu0 %v5128_v27, %s3414_s30  ;;  %v2303_v45 = vadd.f32 %v2299_v46, %v2266_v60  ;;  %v2318_v16 = vpop.permute.xlu1 %2317 }
 0x3d1   : > { %v2305_v51 = vadd.f32 %v2301_v32, %v2268_v30  ;;  %v2320_v17 = vpop.permute.xlu0 %2319  ;;  %2730 = vperm.xlu1 %3278, %v2724_v47   ;;  %v2351_v30 = vrot.slane %v5411_v5, %v6370_v63  ;;  %v6384_v5 = vld [vmem:[#allocation80_spill] sm:$0xff] }
 0x3d2   : > { %v2329_v41 = vsel %vm2327_vm14, %v2318_v16, %v2320_v17  ;;  %v5511_v10 = vadd.f32 %v6384_v5, %v6383_v28 }
 0x3d3   : > { %v2337_v26 = vmul.f32 %v2329_v41, %v2314_v19  ;;  %2735 = vperm.xlu0 %3277, %v2725_v18   ;;  %v2324_v13 = vpop.permute.xlu1 %2323 }
 0x3d4   : > { %v2382_v29 = vmul.f32 %v2191_v58, %v5511_v10  ;;  %v6386_v58 = vld [vmem:[#allocation69_spill] sm:$0xff] }
 0x3d5   : > { %v2341_v62 = vadd.f32 %v2337_v26, %v2304_v38  ;;  %v2326_v44 = vpop.permute.xlu0 %2325  ;;  %2656 = vrot.lane.b32.xlu1 %v5352_v24, %s3414_s30  ;;  %v5530_v32 = vadd.f32 %v6386_v58, %v6383_v28  ;;  %v2947_v28 = vld [vmem:[%s6387_s16] sm:$0xff] }
 0x3d6   : > { %v2331_v50 = vsel %vm2327_vm14, %v2324_v13, %v2326_v44 }
 0x3d7   : > { %v2339_v33 = vmul.f32 %v2331_v50, %v2314_v19  ;;  %2662 = vrot.lane.b32.xlu0 %v5374_v52, %s3414_s30  ;;  %v2316_v49 = vpop.permute.xlu1 %2315  ;;  %v2885_v19 = vld [vmem:[%s6385_s10 + $0x10] sm:$0xff]  ;;  %v2381_v41 = vmul.f32 %v2190_v59, %v5530_v32  ;;  %v2888_v59 = vld [vmem:[%s6385_s10 + $0x28] sm:$0xff]  ;;  %s485_s30 = sand.u32 1, %s6395_s24  }
 0x3d8   : > { %v2328_v21 = vsel %vm2327_vm14, %v2316_v49, %v2318_v16  ;;  %v2884_v16 = vld [vmem:[%s6385_s10 + $0x8] sm:$0xff]  ;;  %v2887_v49 = vld [vmem:[%s6385_s10 + $0x20] sm:$0xff]  ;;  %s3155_s23 = sshll.u32 %s485_s30, 7  ;;  %s5749_s11 = scalar_lea.sflag [#allocation5], %s485_s30 }
 0x3d9   : > { %v2343_v6 = vadd.f32 %v2339_v33, %v2306_v39  ;;  %v2322_v14 = vpop.permute.xlu0 %2321  ;;  %v2336_v48 = vmul.f32 %v2328_v21, %v2310_v37  ;;  %2697 = vrot.lane.b32.xlu1 %v5378_v2, %s3415_s1  ;;  %v2726_v2 = vld [vmem:[%s6382_s4] sm:$0xff]  ;;  %s5700_s29 = scalar_lea.vmem [#allocation4], %s3155_s23 }
 0x3da   : > { %v2330_v31 = vsel %vm2327_vm14, %v2322_v14, %v2324_v13  ;;  %v2886_v13 = vld [vmem:[%s6385_s10 + $0x18] sm:$0xff]  ;;  %s3089_s2 = sshll.u32 %s5700_s29, 4  ;;  %s5742_s2 = int_to_ptr.vmem [resolvable:$true] %s3089_s2 }
 0x3db   : > { %v2338_v40 = vmul.f32 %v2330_v31, %v2310_v37  ;;  %2699 = vrot.lane.b32.xlu0 %v5381_v7, %s3415_s1  ;;  %v2340_v43 = vadd.f32 %v2336_v48, %v2303_v45  ;;  %v2355_v22 = vpop.permute.xlu1 %2354  ;;  %v2386_v37 = vrot.slane %v2381_v41, %v6376_v53  ;;  %s3301_s12 = scalar_lea.vmem %s5742_s2, 2048  ;;  %p3308_p0 = scmp.lt.s32.totalorder %s5742_s2, %s3306_s15 }
 0x3dc   : > { %p3302_p11 = scmp.ne.s32.totalorder %s5742_s2, %s3301_s12  ;;  %p3309_p1 = scmp.lt.s32.totalorder %s3307_s18, %s3301_s12 }
 0x3dd   : > { %v2342_v60 = vadd.f32 %v2338_v40, %v2305_v51  ;;  %v2357_v9 = vpop.permute.xlu0 %2356  ;;  %2703 = vrot.lane.b32.xlu1 %v5388_v4, %s3415_s1 }
 0x3de   : > { %v2366_v0 = vsel %vm2364_vm10, %v2355_v22, %v2357_v9  ;;  %p3303_p12 = pnand %p3302_p11, %p3537_p5  ;;  %p3310_p2 = por %p3309_p1, %p3308_p0 }
 0x3df   : > { %v2374_v11 = vmul.f32 %v2366_v0, %v2351_v30  ;;  %2705 = vrot.lane.b32.xlu0 %v5128_v27, %s3415_s1  ;;  %v2361_v7 = vpop.permute.xlu1 %2360  ;;  %v2427_v0 = vrot.slane %v2382_v29, %v6379_v36 }
 0x3e0   : > { %p3304_p13 = pneg %p3303_p12 }
 0x3e1   : > { %v2378_v38 = vadd.f32 %v2374_v11, %v2341_v62  ;;  %v2363_v1 = vpop.permute.xlu0 %2362  ;;  %2744 = vperm.xlu1 %3278, %v2726_v2  }
 0x3e2   : > { %v2368_v4 = vsel %vm2364_vm10, %v2361_v7, %v2363_v1  ;;  %v2458_v1 = vrot.slane %v5400_v57, 6  ;;  %v6390_v57 = vld [vmem:[#allocation91_spill] sm:$0xff]  ;;  %p3311_p3 = pnand %p3310_p2, %p3304_p13 }
 0x3e3   : > { %v2376_v20 = vmul.f32 %v2368_v4, %v2351_v30  ;;  %2749 = vperm.xlu0 %3277, %v2727_v12   ;;  %v2353_v27 = vpop.permute.xlu1 %2352  ;;  %v2890_v30 = vld [vmem:[%s6385_s10 + $0x38] sm:$0xff] }
 0x3e4   : > { %v2365_v39 = vsel %vm2364_vm10, %v2353_v27, %v2355_v22  ;;  %v2889_v22 = vld [vmem:[%s6385_s10 + $0x30] sm:$0xff] }
 0x3e5   : > { %v2380_v25 = vadd.f32 %v2376_v20, %v2343_v6  ;;  %v2359_v56 = vpop.permute.xlu0 %2358  ;;  %v2373_v23 = vmul.f32 %v2365_v39, %v2347_v42  ;;  %2695 = vrot.lane.b32.xlu1 %v5352_v24, %s3415_s1  ;;  %v2390_v24 = vrot.slane %v2382_v29, %v6376_v53  ;;  %v2949_v29 = vld [vmem:[%s6387_s16 + $0x10] sm:$0xff] }
 0x3e6   : > { %v2367_v46 = vsel %vm2364_vm10, %v2359_v56, %v2361_v7  ;;  %v2950_v56 = vld [vmem:[%s6387_s16 + $0x18] sm:$0xff] }
 0x3e7   : > { %v2375_v34 = vmul.f32 %v2367_v46, %v2347_v42  ;;  %2701 = vrot.lane.b32.xlu0 %v5374_v52, %s3415_s1  ;;  %v2377_v47 = vadd.f32 %v2373_v23, %v2340_v43  ;;  %v2394_v45 = vpop.permute.xlu1 %2393  ;;  %v5582_v23 = vmul.f32 %v2458_v1, %v5511_v10  ;;  %s3184_s1 = sshll.u32 %s6399_s0, 11 }
 0x3e8   : > { %s5740_s8 = scalar_lea.hbm %s6401_s7, %s3184_s1 }
 0x3e9   : > { %v2379_v18 = vadd.f32 %v2375_v34, %v2342_v60  ;;  %v2396_v51 = vpop.permute.xlu0 %2395  ;;  %2893 = vperm.xlu1 %3278, %v2883_v55  }
 0x3ea   : > { %v2405_v52 = vsel %vm2403_vm3, %v2394_v45, %v2396_v51 }
 0x3eb   : > { %v2413_v17 = vmul.f32 %v2405_v52, %v2390_v24  ;;  %2898 = vperm.xlu0 %3277, %v2884_v16   ;;  %v2400_v26 = vpop.permute.xlu1 %2399  ;;  %v2457_v16 = vrot.slane %v5420_v3, 6 }
 0x3ed   : > { %v2417_v62 = vadd.f32 %v2413_v17, %v2378_v38  ;;  %v2402_v44 = vpop.permute.xlu0 %2401  ;;  %2903 = vperm.xlu1 %3278, %v2885_v19   ;;  %v2948_v38 = vld [vmem:[%s6387_s16 + $0x8] sm:$0xff]  ;;  %v2470_v17 = vrot.slane %v5582_v23, %v6380_v8 }
 0x3ee   : > { %v2407_v50 = vsel %vm2403_vm3, %v2400_v26, %v2402_v44  ;;  %v2954_v44 = vld [vmem:[%s6387_s16 + $0x38] sm:$0xff] }
 0x3ef   : > { %v2415_v33 = vmul.f32 %v2407_v50, %v2390_v24  ;;  %2908 = vperm.xlu0 %3277, %v2886_v13   ;;  %v2392_v6 = vpop.permute.xlu1 %2391  ;;  %v5602_v13 = vmul.f32 %v2457_v16, %v5530_v32 }
 0x3f0   : > { %v2404_v14 = vsel %vm2403_vm3, %v2392_v6, %v2394_v45 }
 0x3f1   : > { %v2419_v21 = vadd.f32 %v2415_v33, %v2380_v25  ;;  %v2398_v48 = vpop.permute.xlu0 %2397  ;;  %v2412_v31 = vmul.f32 %v2404_v14, %v2386_v37  ;;  %2913 = vperm.xlu1 %3278, %v2887_v49   ;;  %v2423_v25 = vrot.slane %v2381_v41, %v6379_v36  ;;  %v2951_v36 = vld [vmem:[%s6387_s16 + $0x20] sm:$0xff] }
 0x3f2   : > { %v2406_v40 = vsel %vm2403_vm3, %v2398_v48, %v2400_v26  ;;  %v2953_v26 = vld [vmem:[%s6387_s16 + $0x30] sm:$0xff] }
 0x3f3   : > { %v2414_v43 = vmul.f32 %v2406_v40, %v2386_v37  ;;  %2918 = vperm.xlu0 %3277, %v2888_v59   ;;  %v2416_v60 = vadd.f32 %v2412_v31, %v2377_v47  ;;  %v2431_v9 = vpop.permute.xlu1 %2430  ;;  %v2466_v59 = vrot.slane %v5602_v13, %v6380_v8 }
 0x3f5   : > { %v2418_v11 = vadd.f32 %v2414_v43, %v2379_v18  ;;  %v2433_v2 = vpop.permute.xlu0 %2432  ;;  %2923 = vperm.xlu1 %3278, %v2889_v22   ;;  %v2952_v18 = vld [vmem:[%s6387_s16 + $0x28] sm:$0xff] }
 0x3f6   : > { %v2442_v7 = vsel %vm2440_vm11, %v2431_v9, %v2433_v2 }
 0x3f7   : > { %v2450_v12 = vmul.f32 %v2442_v7, %v2427_v0  ;;  %2928 = vperm.xlu0 %3277, %v2890_v30   ;;  %v2437_v5 = vpop.permute.xlu1 %2436  ;;  %v2507_v30 = vrot.slane %v5582_v23, %v6381_v15 }
 0x3f9   : > { %v2454_v4 = vadd.f32 %v2450_v12, %v2417_v62  ;;  %v2439_v20 = vpop.permute.xlu0 %2438  ;;  %2957 = vperm.xlu1 %3278, %v2947_v28  }
 0x3fa   : > { %v2444_v27 = vsel %vm2440_vm11, %v2437_v5, %v2439_v20 }
 0x3fb   : > { %v2452_v42 = vmul.f32 %v2444_v27, %v2427_v0  ;;  %2962 = vperm.xlu0 %3277, %v2948_v38   ;;  %v2429_v39 = vpop.permute.xlu1 %2428  ;;  %v2503_v38 = vrot.slane %v5602_v13, %v6381_v15 }
 0x3fc   : > { %v2441_v34 = vsel %vm2440_vm11, %v2429_v39, %v2431_v9 }
 0x3fd   : > { %v2456_v46 = vadd.f32 %v2452_v42, %v2419_v21  ;;  %v2435_v55 = vpop.permute.xlu0 %2434  ;;  %v2449_v58 = vmul.f32 %v2441_v34, %v2423_v25  ;;  %2967 = vperm.xlu1 %3278, %v2949_v29  }
 0x3fe   : > { %v2443_v47 = vsel %vm2440_vm11, %v2435_v55, %v2437_v5  ;;  %v2544_v55 = vrot.slane %v5582_v23, %v4272_v35 }
 0x3ff   : > { %v2451_v45 = vmul.f32 %v2443_v47, %v2423_v25  ;;  %2972 = vperm.xlu0 %3277, %v2950_v56   ;;  %v2453_v24 = vadd.f32 %v2449_v58, %v2416_v60  ;;  %v2474_v10 = vpop.permute.xlu1 %2473 }
 0x401   : > { %v2455_v51 = vadd.f32 %v2451_v45, %v2418_v11  ;;  %v2476_v52 = vpop.permute.xlu0 %2475  ;;  %2977 = vperm.xlu1 %3278, %v2951_v36  }
 0x402   : > { %v2485_v19 = vsel %vm2483_vm13, %v2474_v10, %v2476_v52 }
 0x403   : > { %v2493_v41 = vmul.f32 %v2485_v19, %v2470_v17  ;;  %2982 = vperm.xlu0 %3277, %v2952_v18   ;;  %v2480_v62 = vpop.permute.xlu1 %2479 }
 0x405   : > { %v2497_v50 = vadd.f32 %v2493_v41, %v2454_v4  ;;  %v2482_v33 = vpop.permute.xlu0 %2481  ;;  %2987 = vperm.xlu1 %3278, %v2953_v26  }
 0x406   : > { %v2487_v49 = vsel %vm2483_vm13, %v2480_v62, %v2482_v33 }
 0x407   : > { %v2495_v37 = vmul.f32 %v2487_v49, %v2470_v17  ;;  %2992 = vperm.xlu0 %3277, %v2954_v44   ;;  %v2472_v6 = vpop.permute.xlu1 %2471 }
 0x408   : > { %v2484_v32 = vsel %vm2483_vm13, %v2472_v6, %v2474_v10 }
 0x409   : > { %v2499_v21 = vadd.f32 %v2495_v37, %v2456_v46  ;;  %v2478_v14 = vpop.permute.xlu0 %2477  ;;  %v2492_v48 = vmul.f32 %v2484_v32, %v2466_v59  ;;  %v2581_v37 = vrot.slane %v5582_v23, %v6367_v54 }
 0x40a   : > { %v2486_v31 = vsel %vm2483_vm13, %v2478_v14, %v2480_v62 }
 0x40b   : > { %v2494_v40 = vmul.f32 %v2486_v31, %v2466_v59  ;;  %v2496_v43 = vadd.f32 %v2492_v48, %v2453_v24  ;;  %v2511_v22 = vpop.permute.xlu1 %2510 }
 0x40d   : > { %v2498_v60 = vadd.f32 %v2494_v40, %v2455_v51  ;;  %v2513_v9 = vpop.permute.xlu0 %2512  ;;  %v2540_v51 = vrot.slane %v5602_v13, %v4272_v35  ;;  %v2577_v40 = vrot.slane %v5602_v13, %v6367_v54 }
 0x40e   : > { %v2522_v0 = vsel %vm2520_vm12, %v2511_v22, %v2513_v9 }
 0x40f   : > { %v2530_v11 = vmul.f32 %v2522_v0, %v2507_v30  ;;  %v2517_v8 = vpop.permute.xlu1 %2516 }
 0x411   : > { %v2534_v2 = vadd.f32 %v2530_v11, %v2497_v50  ;;  %v2519_v7 = vpop.permute.xlu0 %2518 }
 0x412   : > { %v2524_v12 = vsel %vm2520_vm12, %v2517_v8, %v2519_v7 }
 0x413   : > { %v2532_v28 = vmul.f32 %v2524_v12, %v2507_v30  ;;  %v2509_v5 = vpop.permute.xlu1 %2508  ;;  %v2618_v12 = vrot.slane %v5582_v23, %v6369_v61 }
 0x414   : > { %v2521_v20 = vsel %vm2520_vm12, %v2509_v5, %v2511_v22 }
 0x415   : > { %v2536_v4 = vadd.f32 %v2532_v28, %v2499_v21  ;;  %v2515_v27 = vpop.permute.xlu0 %2514  ;;  %v2529_v42 = vmul.f32 %v2521_v20, %v2503_v38 }
 0x416   : > { %v2523_v29 = vsel %vm2520_vm12, %v2515_v27, %v2517_v8 }
 0x417   : > { %v2531_v25 = vmul.f32 %v2523_v29, %v2503_v38  ;;  %v2533_v39 = vadd.f32 %v2529_v42, %v2496_v43  ;;  %v2548_v56 = vpop.permute.xlu1 %2547  ;;  %v2614_v29 = vrot.slane %v5602_v13, %v6369_v61 }
 0x419   : > { %v2535_v46 = vadd.f32 %v2531_v25, %v2498_v60  ;;  %v2550_v34 = vpop.permute.xlu0 %2549 }
 0x41a   : > { %v2559_v58 = vsel %vm2557_vm15, %v2548_v56, %v2550_v34 }
 0x41b   : > { %v2567_v47 = vmul.f32 %v2559_v58, %v2544_v55  ;;  %v2554_v15 = vpop.permute.xlu1 %2553 }
 0x41d   : > { %v2571_v45 = vadd.f32 %v2567_v47, %v2534_v2  ;;  %v2556_v36 = vpop.permute.xlu0 %2555 }
 0x41e   : > { %v2561_v24 = vsel %vm2557_vm15, %v2554_v15, %v2556_v36  ;;  %v2655_v36 = vrot.slane %v5582_v23, %v6370_v63 }
 0x41f   : > { %v2569_v10 = vmul.f32 %v2561_v24, %v2544_v55  ;;  %v2546_v18 = vpop.permute.xlu1 %2545 }
 0x420   : > { %v2558_v17 = vsel %vm2557_vm15, %v2546_v18, %v2548_v56 }
 0x421   : > { %v2573_v52 = vadd.f32 %v2569_v10, %v2536_v4  ;;  %v2552_v19 = vpop.permute.xlu0 %2551  ;;  %v2566_v41 = vmul.f32 %v2558_v17, %v2540_v51 }
 0x422   : > { %v2560_v26 = vsel %vm2557_vm15, %v2552_v19, %v2554_v15 }
 0x423   : > { %v2568_v62 = vmul.f32 %v2560_v26, %v2540_v51  ;;  %v2570_v44 = vadd.f32 %v2566_v41, %v2533_v39  ;;  %v2585_v50 = vpop.permute.xlu1 %2584  ;;  %v6388_v26 = vld [vmem:[#allocation22_spill] sm:$0xff] }
 0x425   : > { %v2572_v33 = vadd.f32 %v2568_v62, %v2535_v46  ;;  %v2587_v49 = vpop.permute.xlu0 %2586  ;;  %v6389_v62 = vld [vmem:[#allocation26_spill] sm:$0xff] }
 0x426   : > { %v2596_v6 = vsel %vm2594_vm1, %v2585_v50, %v2587_v49  ;;  %v2651_v49 = vrot.slane %v5602_v13, %v6370_v63 }
 0x427   : > { %v2604_v59 = vmul.f32 %v2596_v6, %v2581_v37  ;;  %v2591_v35 = vpop.permute.xlu1 %2590 }
 0x429   : > { %v2608_v21 = vadd.f32 %v2604_v59, %v2571_v45  ;;  %v2593_v32 = vpop.permute.xlu0 %2592 }
 0x42a   : > { %v2598_v14 = vsel %vm2594_vm1, %v2591_v35, %v2593_v32 }
 0x42b   : > { %v2606_v48 = vmul.f32 %v2598_v14, %v2581_v37  ;;  %v2583_v31 = vpop.permute.xlu1 %2582 }
 0x42c   : > { %v2595_v22 = vsel %vm2594_vm1, %v2583_v31, %v2585_v50 }
 0x42d   : > { %v2610_v43 = vadd.f32 %v2606_v48, %v2573_v52  ;;  %v2589_v60 = vpop.permute.xlu0 %2588  ;;  %v2603_v9 = vmul.f32 %v2595_v22, %v2577_v40 }
 0x42e   : > { %v2597_v30 = vsel %vm2594_vm1, %v2589_v60, %v2591_v35 }
 0x42f   : > { %v2605_v0 = vmul.f32 %v2597_v30, %v2577_v40  ;;  %v2607_v11 = vadd.f32 %v2603_v9, %v2570_v44  ;;  %v2622_v8 = vpop.permute.xlu1 %2621  ;;  %v830_v44 = vadd.f32 %v6389_v62, %v6388_v26 }
 0x431   : > { %v2609_v2 = vadd.f32 %v2605_v0, %v2572_v33  ;;  %v2624_v7 = vpop.permute.xlu0 %2623  ;;  %v2686_v23 = vmul.f32 %v2458_v1, %v830_v44  ;;  %v828_v1 = vadd.f32 %v6390_v57, %v6388_v26  ;;  %v3014_v57 = vld [vmem:[%s6397_s26 + $0x18] sm:$0xff] }
 0x432   : > { %v2633_v28 = vsel %vm2631_vm2, %v2622_v8, %v2624_v7 }
 0x433   : > { %v2641_v5 = vmul.f32 %v2633_v28, %v2618_v12  ;;  %v2628_v54 = vpop.permute.xlu1 %2627  ;;  %v2694_v48 = vrot.slane %v2686_v23, %v6376_v53  ;;  %v3011_v23 = vld [vmem:[%s6397_s26] sm:$0xff] }
 0x435   : > { %v2645_v38 = vadd.f32 %v2641_v5, %v2608_v21  ;;  %v2630_v4 = vpop.permute.xlu0 %2629 }
 0x436   : > { %v2635_v20 = vsel %vm2631_vm2, %v2628_v54, %v2630_v4 }
 0x437   : > { %v2643_v27 = vmul.f32 %v2635_v20, %v2618_v12  ;;  %v2620_v42 = vpop.permute.xlu1 %2619 }
 0x438   : > { %v2632_v39 = vsel %vm2631_vm2, %v2620_v42, %v2622_v8 }
 0x439   : > { %v2647_v25 = vadd.f32 %v2643_v27, %v2610_v43  ;;  %v2626_v56 = vpop.permute.xlu0 %2625  ;;  %v2640_v46 = vmul.f32 %v2632_v39, %v2614_v29 }
 0x43a   : > { %v2634_v34 = vsel %vm2631_vm2, %v2626_v56, %v2628_v54 }
 0x43b   : > { %v2642_v55 = vmul.f32 %v2634_v34, %v2614_v29  ;;  %v2644_v58 = vadd.f32 %v2640_v46, %v2607_v11  ;;  %v2659_v47 = vpop.permute.xlu1 %2658  ;;  %v2685_v11 = vmul.f32 %v2457_v16, %v828_v1 }
 0x43d   : > { %v2646_v15 = vadd.f32 %v2642_v55, %v2609_v2  ;;  %v2661_v45 = vpop.permute.xlu0 %2660  ;;  %v2690_v5 = vrot.slane %v2685_v11, %v6376_v53 }
 0x43e   : > { %v2670_v24 = vsel %vm2668_vm4, %v2659_v47, %v2661_v45  ;;  %v3284_v45 = vld [vmem:[%s6391_s22] sm:$0xff]  }
 0x43f   : > { %v2678_v10 = vmul.f32 %v2670_v24, %v2655_v36  ;;  %v2665_v61 = vpop.permute.xlu1 %2664  ;;  %v3285_v24 = vld [vmem:[%s6391_s22 + $0x8] sm:$0xff]  }
 0x441   : > { %v2682_v18 = vadd.f32 %v2678_v10, %v2645_v38  ;;  %v2667_v51 = vpop.permute.xlu0 %2666  ;;  %v3286_v10 = vld [vmem:[%s6391_s22 + $0x10] sm:$0xff]  }
 0x442   : > { %v2672_v52 = vsel %vm2668_vm4, %v2665_v61, %v2667_v51 }
 0x443   : > { %v2680_v17 = vmul.f32 %v2672_v52, %v2655_v36  ;;  %v6393_v36 = vmov 0  }
 0x445   : > { %v2684_v19 = vadd.f32 %v2680_v17, %v2647_v25 }
 0x450   : > { %v2731_v41 = vpop.permute.xlu1 %2730 }
 0x452   : > { %v2736_v50 = vpop.permute.xlu0 %2735 }
 0x454   : > { %v2657_v33 = vpop.permute.xlu1 %2656 }
 0x455   : > { %v2669_v37 = vsel %vm2668_vm4, %v2657_v33, %v2659_v47 }
 0x456   : > { %v2663_v6 = vpop.permute.xlu0 %2662  ;;  %v2677_v59 = vmul.f32 %v2669_v37, %v2651_v49 }
 0x457   : > { %v2671_v35 = vsel %vm2668_vm4, %v2663_v6, %v2665_v61  ;;  %v3287_v61 = vld [vmem:[%s6391_s22 + $0x18] sm:$0xff]  }
 0x458   : > { %v2679_v21 = vmul.f32 %v2671_v35, %v2651_v49  ;;  %v2681_v32 = vadd.f32 %v2677_v59, %v2644_v58  ;;  %v2698_v14 = vpop.permute.xlu1 %2697  ;;  %v3012_v35 = vld [vmem:[%s6397_s26 + $0x8] sm:$0xff] }
 0x45a   : > { %v2683_v31 = vadd.f32 %v2679_v21, %v2646_v15  ;;  %v2700_v40 = vpop.permute.xlu0 %2699 }
 0x45b   : > { %v2709_v43 = vsel %vm2707_vm5, %v2698_v14, %v2700_v40 }
 0x45c   : > { %v2717_v63 = vmul.f32 %v2709_v43, %v2694_v48  ;;  %v2704_v13 = vpop.permute.xlu1 %2703 }
 0x45e   : > { %v2721_v22 = vadd.f32 %v2717_v63, %v2682_v18  ;;  %v2706_v60 = vpop.permute.xlu0 %2705 }
 0x45f   : > { %v2711_v9 = vsel %vm2707_vm5, %v2704_v13, %v2706_v60 }
 0x460   : > { %v2719_v30 = vmul.f32 %v2711_v9, %v2694_v48  ;;  %v2739_v0 = vmul.f32 %v2731_v41, %v2721_v22  ;;  %v2745_v8 = vpop.permute.xlu1 %2744 }
 0x462   : > { %v2723_v2 = vadd.f32 %v2719_v30, %v2684_v19  ;;  %v2750_v7 = vpop.permute.xlu0 %2749  ;;  %v2753_v12 = vadd.f32 %v2745_v8, %v2739_v0 }
 0x464   : > { %v2741_v28 = vmul.f32 %v2736_v50, %v2723_v2  ;;  %v2696_v54 = vpop.permute.xlu1 %2695  ;;  %v2757_v29 = vmax.f32 %v2753_v12, 0.0 }
 0x465   : > { %v2708_v4 = vsel %vm2707_vm5, %v2696_v54, %v2698_v14 }
 0x466   : > { %v2755_v38 = vadd.f32 %v2750_v7, %v2741_v28  ;;  %v2702_v20 = vpop.permute.xlu0 %2701  ;;  %v2716_v27 = vmul.f32 %v2708_v4, %v2690_v5  ;;  %v3015_v28 = vld [vmem:[%s6397_s26 + $0x20] sm:$0xff]  ;;  %v3016_v4 = vld [vmem:[%s6397_s26 + $0x28] sm:$0xff] }
 0x467   : > { %v2710_v42 = vsel %vm2707_vm5, %v2702_v20, %v2704_v13 }
 0x468   : > { %v2759_v25 = vmax.f32 %v2755_v38, 0.0  ;;  %v2718_v39 = vmul.f32 %v2710_v42, %v2690_v5  ;;  %v2720_v3 = vadd.f32 %v2716_v27, %v2681_v32  ;;  %v2894_v18 = vpop.permute.xlu1 %2893 }
 0x46a   : > { %v2722_v16 = vadd.f32 %v2718_v39, %v2683_v31  ;;  %v2777_v56 = vpack.c.bf16 %v2759_v25, %v2757_v29  ;;  %v2738_v46 = vmul.f32 %v2731_v41, %v2720_v3  ;;  %v2899_v51 = vpop.permute.xlu0 %2898  ;;  %v3013_v31 = vld [vmem:[%s6397_s26 + $0x10] sm:$0xff] }
 0x46b   : > { %v3017_v25 = vld [vmem:[%s6397_s26 + $0x30] sm:$0xff] }
 0x46c   : > { %v2740_v34 = vmul.f32 %v2736_v50, %v2722_v16  ;;  %2810 = vmatprep.subr.bf16.mxu0 %v2777_v56  ;;  %v2752_v55 = vadd.f32 %v2745_v8, %v2738_v46  ;;  %v2904_v52 = vpop.permute.xlu1 %2903  ;;  %v3018_v56 = vld [vmem:[%s6397_s26 + $0x38] sm:$0xff] }
 0x46e   : > { %v2754_v58 = vadd.f32 %v2750_v7, %v2740_v34  ;;  %v2756_v53 = vmax.f32 %v2752_v55, 0.0  ;;  %v2909_v17 = vpop.permute.xlu0 %2908 }
 0x470   : > { %v2758_v47 = vmax.f32 %v2754_v58, 0.0  ;;  %v5685_v19 = vpop.permute.xlu1 %2913 }
 0x472   : > { %v2776_v15 = vpack.c.bf16 %v2758_v47, %v2756_v53  ;;  %v5687_v41 = vpop.permute.xlu0 %2918 }
 0x474   : > { %2811 = vmatpush1.bf16.msra.mxu0 %v2776_v15  ;;  %v5689_v26 = vpop.permute.xlu1 %2923 }
 0x476   : > { %v5691_v62 = vpop.permute.xlu0 %2928 }
 0x477   : > { %3174 = vmatmul.mubr.msk.bf16.vlgmr.msra.gmra.mrb[4].mxu0 %vm6392_vm6, %v3284_v45 }
 0x478   : > { %2852 = vmatprep.mubr.bf16.mxu0 %v6393_v36  ;;  %v2958_v49 = vpop.permute.xlu1 %2957 }
 0x47a   : > { %v2963_v14 = vpop.permute.xlu0 %2962 }
 0x47c   : > { %v2968_v7 = vpop.permute.xlu1 %2967 }
 0x47e   : > { %v2973_v42 = vpop.permute.xlu0 %2972 }
 0x47f   : > { %3175 = vmatmul.mubr.msk.bf16.gmra.mrb[8].mxu0 %vm6394_vm7, %v3285_v24 }
 0x480   : > { %2862 = vmatprep.mubr.bf16.mxu0 %v6393_v36 }
 0x487   : > { %3176 = vmatmul.mubr.msk.bf16.gmra.mrb[12].mxu0 %vm6396_vm8, %v3286_v10  ;;  %v2978_v10 = vpop.permute.xlu1 %2977 }
 0x488   : > { %2872 = vmatprep.mubr.bf16.mxu0 %v6393_v36 }
 0x48f   : > { %3177 = vmatmul.mubr.msk.bf16.gmra.mrb[16].mxu0 %vm6398_vm9, %v3287_v61 }
 0x54a   : > { %v2844_v44 = vpop.f32.mrb[4].mxu0 }
 0x54b   : > { %v2931_v50 = vmul.f32 %v2894_v18, %v2844_v44  ;;  %v2846_v33 = vpop.f32.mrb[5].mxu0  ;;  %v3020_v44 = vld [vmem:[%s6397_s26 + $0x48] sm:$0xff] }
 0x54c   : > { %v2932_v37 = vmul.f32 %v2894_v18, %v2846_v33  ;;  %v2848_v6 = vpop.f32.mrb[6].mxu0  ;;  %v3019_v18 = vld [vmem:[%s6397_s26 + $0x40] sm:$0xff] }
 0x54d   : > { %v2995_v59 = vadd.f32 %v2958_v49, %v2931_v50  ;;  %v2933_v21 = vmul.f32 %v2899_v51, %v2848_v6  ;;  %v2850_v32 = vpop.f32.mrb[7].mxu0 }
 0x54e   : > { %v2996_v48 = vadd.f32 %v2958_v49, %v2932_v37  ;;  %v2934_v40 = vmul.f32 %v2899_v51, %v2850_v32  ;;  %v2983_v49 = vpop.permute.xlu0 %2982  ;;  %v3021_v37 = vld [vmem:[%s6397_s26 + $0x50] sm:$0xff] }
 0x54f   : > { %v3027_v43 = vadd.f32 %v3011_v23, %v2995_v59  ;;  %v2997_v63 = vadd.f32 %v2963_v14, %v2933_v21  ;;  %v3022_v21 = vld [vmem:[%s6397_s26 + $0x58] sm:$0xff] }
 0x550   : > { %v3028_v1 = vadd.f32 %v3012_v35, %v2996_v48  ;;  %v2998_v13 = vadd.f32 %v2963_v14, %v2934_v40 }
 0x551   : > { %v3043_v22 = vmax.f32 %v3027_v43, 0.0  ;;  %v3029_v60 = vadd.f32 %v3013_v31, %v2997_v63 }
 0x552   : > { %v3044_v9 = vmax.f32 %v3028_v1, 0.0  ;;  %v3030_v30 = vadd.f32 %v3014_v57, %v2998_v13  ;;  %v2854_v0 = vpop.f32.mrb[8].mxu0  ;;  %v2988_v1 = vpop.permute.xlu1 %2987 }
 0x553   : > { %3059 = vst [vmem:[%s5700_s29] sm:$0xff] %v3043_v22  ;;  %v3045_v11 = vmax.f32 %v3029_v60, 0.0  ;;  %v2935_v8 = vmul.f32 %v2904_v52, %v2854_v0  ;;  %v2856_v2 = vpop.f32.mrb[9].mxu0  ;;  %v3023_v22 = vld [vmem:[%s6397_s26 + $0x60] sm:$0xff]  ;;  %v3024_v0 = vld [vmem:[%s6397_s26 + $0x68] sm:$0xff] }
 0x554   : > { %3060 = vst [vmem:[%s5700_s29 + $0x8] sm:$0xff] %v3044_v9  ;;  %v3046_v12 = vmax.f32 %v3030_v30, 0.0  ;;  %v2936_v5 = vmul.f32 %v2904_v52, %v2856_v2  ;;  %v2858_v54 = vpop.f32.mrb[10].mxu0  ;;  %v2993_v2 = vpop.permute.xlu0 %2992 }
 0x555   : > { %3061 = vst [vmem:[%s5700_s29 + $0x10] sm:$0xff] %v3045_v11  ;;  %v2999_v38 = vadd.f32 %v2968_v7, %v2935_v8  ;;  %v2937_v20 = vmul.f32 %v2909_v17, %v2858_v54  ;;  %v2860_v27 = vpop.f32.mrb[11].mxu0 }
 0x556   : > { %3062 = vst [vmem:[%s5700_s29 + $0x18] sm:$0xff] %v3046_v12  ;;  %v3000_v29 = vadd.f32 %v2968_v7, %v2936_v5  ;;  %v2938_v39 = vmul.f32 %v2909_v17, %v2860_v27  ;;  %v3025_v12 = vld [vmem:[%s6397_s26 + $0x70] sm:$0xff] }
 0x557   : > { %v3031_v3 = vadd.f32 %v3015_v28, %v2999_v38  ;;  %v3001_v16 = vadd.f32 %v2973_v42, %v2937_v20 }
 0x558   : > { %v3032_v46 = vadd.f32 %v3016_v4, %v3000_v29  ;;  %v3002_v34 = vadd.f32 %v2973_v42, %v2938_v39 }
 0x559   : > { %v3047_v55 = vmax.f32 %v3031_v3, 0.0  ;;  %v3033_v58 = vadd.f32 %v3017_v25, %v3001_v16 }
 0x55a   : > { %v3048_v53 = vmax.f32 %v3032_v46, 0.0  ;;  %v3034_v47 = vadd.f32 %v3018_v56, %v3002_v34  ;;  %v2864_v15 = vpop.f32.mrb[12].mxu0 }
 0x55b   : > { %3063 = vst [vmem:[%s5700_s29 + $0x20] sm:$0xff] %v3047_v55  ;;  %v3049_v45 = vmax.f32 %v3033_v58, 0.0  ;;  %v2939_v36 = vmul.f32 %v5685_v19, %v2864_v15  ;;  %v2866_v24 = vpop.f32.mrb[13].mxu0 }
 0x55c   : > { %3064 = vst [vmem:[%s5700_s29 + $0x28] sm:$0xff] %v3048_v53  ;;  %v3050_v61 = vmax.f32 %v3034_v47, 0.0  ;;  %v2940_v51 = vmul.f32 %v5685_v19, %v2866_v24  ;;  %v2868_v52 = vpop.f32.mrb[14].mxu0 }
 0x55d   : > { %3065 = vst [vmem:[%s5700_s29 + $0x30] sm:$0xff] %v3049_v45  ;;  %v3003_v17 = vadd.f32 %v2978_v10, %v2939_v36  ;;  %v2941_v50 = vmul.f32 %v5687_v41, %v2868_v52  ;;  %v2870_v33 = vpop.f32.mrb[15].mxu0 }
 0x55e   : > { %3066 = vst [vmem:[%s5700_s29 + $0x38] sm:$0xff] %v3050_v61  ;;  %v3004_v23 = vadd.f32 %v2978_v10, %v2940_v51  ;;  %v2942_v6 = vmul.f32 %v5687_v41, %v2870_v33 }
 0x55f   : > { %v3035_v59 = vadd.f32 %v3019_v18, %v3003_v17  ;;  %v3005_v35 = vadd.f32 %v2983_v49, %v2941_v50 }
 0x560   : > { %v3036_v19 = vadd.f32 %v3020_v44, %v3004_v23  ;;  %v3006_v32 = vadd.f32 %v2983_v49, %v2942_v6 }
 0x561   : > { %v3051_v14 = vmax.f32 %v3035_v59, 0.0  ;;  %v3037_v48 = vadd.f32 %v3021_v37, %v3005_v35 }
 0x562   : > { %v3052_v31 = vmax.f32 %v3036_v19, 0.0  ;;  %v3038_v40 = vadd.f32 %v3022_v21, %v3006_v32  ;;  %v2874_v43 = vpop.f32.mrb[16].mxu0 }
 0x563   : > { %3067 = vst [vmem:[%s5700_s29 + $0x40] sm:$0xff] %v3051_v14  ;;  %v3053_v63 = vmax.f32 %v3037_v48, 0.0  ;;  %v2943_v57 = vmul.f32 %v5689_v26, %v2874_v43  ;;  %v2876_v41 = vpop.f32.mrb[17].mxu0 }
 0x564   : > { %3068 = vst [vmem:[%s5700_s29 + $0x48] sm:$0xff] %v3052_v31  ;;  %v3054_v13 = vmax.f32 %v3038_v40, 0.0  ;;  %v2944_v60 = vmul.f32 %v5689_v26, %v2876_v41  ;;  %v2878_v9 = vpop.f32.mrb[18].mxu0  ;;  %v3026_v26 = vld [vmem:[%s6397_s26 + $0x78] sm:$0xff] }
 0x565   : > { %3069 = vst [vmem:[%s5700_s29 + $0x50] sm:$0xff] %v3053_v63  ;;  %v3007_v30 = vadd.f32 %v2988_v1, %v2943_v57  ;;  %v2945_v11 = vmul.f32 %v5691_v62, %v2878_v9  ;;  %v2880_v8 = vpop.f32.mrb[19].mxu0 }
 0x566   : > { %3070 = vst [vmem:[%s5700_s29 + $0x58] sm:$0xff] %v3054_v13  ;;  %v3008_v7 = vadd.f32 %v2988_v1, %v2944_v60  ;;  %v2946_v28 = vmul.f32 %v5691_v62, %v2880_v8 }
 0x567   : > { %v3039_v5 = vadd.f32 %v3023_v22, %v3007_v30  ;;  %v3009_v54 = vadd.f32 %v2993_v2, %v2945_v11 }
 0x568   : > { %v3040_v38 = vadd.f32 %v3024_v0, %v3008_v7  ;;  %v3010_v4 = vadd.f32 %v2993_v2, %v2946_v28 }
 0x569   : > { %v3055_v20 = vmax.f32 %v3039_v5, 0.0  ;;  %v3041_v27 = vadd.f32 %v3025_v12, %v3009_v54 }
 0x56a   : > { %v3056_v42 = vmax.f32 %v3040_v38, 0.0  ;;  %v3042_v29 = vadd.f32 %v3026_v26, %v3010_v4 }
 0x56b   : > { %3071 = vst [vmem:[%s5700_s29 + $0x60] sm:$0xff] %v3055_v20  ;;  %v3057_v25 = vmax.f32 %v3041_v27, 0.0 }
 0x56c   : > { %3072 = vst [vmem:[%s5700_s29 + $0x68] sm:$0xff] %v3056_v42  ;;  %v3058_v62 = vmax.f32 %v3042_v29, 0.0 }
 0x56d   : > { %3073 = vst [vmem:[%s5700_s29 + $0x70] sm:$0xff] %v3057_v25 }
 0x56e   : > { %3074 = vst [vmem:[%s5700_s29 + $0x78] sm:$0xff] %v3058_v62 }
 0x56f   : > { %3314 = shalt.err (!%p3311_p3)
}
 0x570   : > { %s3315_s19 = scalar_lea.hbm %s5740_s8, 2048  ;;  %s3319_s24 = scalar_lea.hbm %s6401_s7, 4096 }
 0x571   : > { %p3316_p4 = scmp.ne.s32.totalorder %s5740_s8, %s3315_s19  ;;  %p3320_p9 = scmp.lt.u32.totalorder %s5740_s8, %s6401_s7 }
 0x572   : > { %p3321_p10 = scmp.lt.u32.totalorder %s3319_s24, %s3315_s19  ;;  %p3323_p12 = scmp.lt.u32.totalorder %s3315_s19, %s5740_s8 }
 0x573   : > { %p3317_p7 = pnand %p3316_p4, %p3537_p5 }
 0x574   : > { %p3322_p11 = por %p3321_p10, %p3320_p9 }
 0x575   : > { %p3318_p8 = pneg %p3317_p7 }
 0x576   : > { %p3324_p13 = por %p3323_p12, %p3322_p11 }
 0x578   : > { %p3325_p0 = pnand %p3324_p13, %p3318_p8 }
 0x57a   : > { %3328 = shalt.err (!%p3325_p0)
}
 0x57b   : > { %s3417_s17 = smov 256   ;;  %s3418_s25 = smov 16  }
 0x57c   : > { %3185 = dma.vmem_to_hbm [thread:$0]  (%p3537_p5), %s5742_s2, 2048, %s5740_s8, %s5749_s11, %s3417_s17, %s3417_s17, %s3418_s25  }
 0x57d PF: > { %s6402_s26 = sld [smem:[#allocation10_spill]]  ;;  %s6403_s30 = sld [smem:[#allocation7_spill]] }
 0x583   : > { %p3191_p1 = scmp.ge.s32.totalorder %s6402_s26, 2  ;;  %s3104_s29 = sand.u32 1, %s6403_s30  }
 0x584   : > { %s3105_s0 = scalar_lea.sflag [#allocation5], %s3104_s29 }
 0x585   : > { %p3188_p2 = pnand %p3191_p1, %p3541_p6 }
 0x587   : > { %3346 = dma.done.wait (!%p3188_p2), %s3105_s0, 2048  }
 0x588   : > { %3348 = vsyncadd (!%p3188_p2), %s3105_s0, 4294965248  ;;  %s6405_s21 = sld [smem:[#allocation12_spill]]  ;;  %s6406_s18 = sld [smem:[#allocation8_spill]] }
 0x589   : > { %s6407_s19 = sld [smem:[#allocation9_spill]]  ;;  %s6408_s20 = sld [smem:[#allocation13_spill]] }
 0x58e   : > { %p25_p3 = scmp.ge.s32.totalorder %s6405_s21, 4  }
 0x590   :  { %27 = sbr.rel (!%p25_p3) target bundleno = 18 (0x12), region = 115 }
 0x597   :  { %3110 = vsyncpa [#allocation5], 1 }
 0x598   :  { %3112 = vsyncpa [#allocation5 + $0x1], 1 }

</bundles_post_ra>
